<compile_context>
chip_gen: v5e
topology: v5e:2x2
jax: 0.10.0
libtpu: 0.0.40
codegen_flags: <defaults>
</compile_context>

<pallas_src>
import jax
import jax.numpy as jnp
from jax.experimental import pallas as pl
from jax.experimental.pallas import tpu as pltpu


def _round_up(n, m):
    return ((n + m - 1) // m) * m


def _default_vmem_budget():
    """Per-generation scoped-VMEM budget (bytes) with headroom."""
    cap = None
    try:
        info = pltpu.get_tpu_info()
        cap = getattr(info, "vmem_capacity_bytes", None)
    except Exception:
        cap = None
    if cap is None:
        cap = 64 * 1024 * 1024          # conservative: v7x per-core VMEM
    budget = int(cap * 0.70)            # leave headroom for the compiler
    return max(32 * 1024 * 1024, min(budget, 100 * 1024 * 1024))


def _choose_tiles(M, d_model, d_inner, act_itemsize, vmem_budget):
    """Pick (tm, tn, tk) under the VMEM budget, minimizing weight re-streaming."""
    m_align = 16                         # bf16-safe sublane packing (also ok for f32)
    M_a = _round_up(max(M, 1), m_align)

    def vmem_usage(tm, tn, tk):
        dbl = 2                          # pipeline double-buffering
        x_b = dbl * tm * d_model * act_itemsize
        w1_b = dbl * d_model * tk * act_itemsize
        b1_b = dbl * 8 * tk * act_itemsize
        w2_b = dbl * tk * tn * act_itemsize
        b2_b = dbl * 8 * tn * act_itemsize
        out_b = dbl * tm * tn * act_itemsize
        acc_b = tm * tn * 4              # f32 scratch accumulator
        return x_b + w1_b + b1_b + w2_b + b2_b + out_b + acc_b

    # Row tile: largest ladder entry whose padding waste is small.
    tm = m_align
    for cand in (512, 256, 128, 64, 32, 16):
        if cand > M_a:
            continue
        waste = _round_up(M, cand) - M
        if waste <= max(M // 8, m_align):
            tm = cand
            break

    # Output-column tile: split d_model across cores only for small-M shapes
    # (single row tile) so the second TensorCore is not idle.
    gm = _round_up(M, tm) // tm
    if gm == 1 and tm <= 128 and d_model >= 256 and d_model % 256 == 0:
        tn = d_model // 2
    else:
        tn = d_model
    # TODO(synk): alternatively split K across cores with a cross-core partial-sum
    # reduction to avoid the redundant first-matmul compute of the N split.

    # Reduction tile: prefer a single K step if it fits VMEM.
    tk_cands = [d_inner] + [t for t in (2048, 1024, 512, 256, 128) if t < d_inner]
    tk = None
    for cand in tk_cands:
        if vmem_usage(tm, tn, cand) <= vmem_budget:
            tk = cand
            break
    if tk is None:
        tk = 128
        while tm > m_align and vmem_usage(tm, tn, tk) > vmem_budget:
            tm = max(m_align, tm // 2)

    return tm, tn, tk


def ffn_kernel(x_ref, w1_ref, b1_ref, w2_ref, b2_ref, o_ref, acc_ref):
    # x_ref:  (tm, d_model)     w1_ref: (d_model, tk)   b1_ref: (1, tk)
    # w2_ref: (tk, tn)          b2_ref: (1, tn)
    # o_ref:  (tm, tn)          acc_ref: (tm, tn) f32 scratch
    k = pl.program_id(2)
    nk = pl.num_programs(2)

    @pl.when(k == 0)
    def _():
        # Seed the accumulator with the output bias (saves an add at finalize).
        acc_ref[...] = jnp.broadcast_to(
            b2_ref[...].astype(jnp.float32), acc_ref.shape)

    x = x_ref[...]
    # First linear (K-slice of d_inner) + ReLU; f32 accumulation on the MXU.
    h = jnp.dot(x, w1_ref[...], preferred_element_type=jnp.float32)
    h = jnp.maximum(h + b1_ref[...].astype(jnp.float32), 0.0)
    # Second linear: partial contribution of this d_inner slice.
    partial = jnp.dot(h.astype(w2_ref.dtype), w2_ref[...],
                      preferred_element_type=jnp.float32)

    @pl.when(k < nk - 1)
    def _():
        acc_ref[...] += partial

    @pl.when(k == nk - 1)
    def _():
        # Write output directly from acc + last partial (no extra acc RMW).
        o_ref[...] = (acc_ref[...] + partial).astype(o_ref.dtype)


def feed_forward(x, w1, b1, w2, b2, *, vmem_budget=None):
    """x: [batch, seq, d_model] -> [batch, seq, d_model]

    w1: [d_model, d_inner], b1: [d_inner], w2: [d_inner, d_model], b2: [d_model]
    Works for f32 or bf16 activations/weights (f32 accumulation inside).
    """
    batch, seq, d_model = x.shape
    d_inner = w1.shape[1]
    M = batch * seq

    if vmem_budget is None:
        vmem_budget = _default_vmem_budget()

    act_itemsize = jnp.dtype(x.dtype).itemsize
    tm, tn, tk = _choose_tiles(M, d_model, d_inner, act_itemsize, vmem_budget)

    M_pad = _round_up(M, tm)
    K_pad = d_inner if tk == d_inner else _round_up(d_inner, tk)

    x2d = x.reshape(M, d_model)
    if M_pad != M:
        x2d = jnp.pad(x2d, ((0, M_pad - M), (0, 0)))

    w1p, b1p, w2p = w1, b1, w2
    if K_pad != d_inner:
        # Zero-padded d_inner columns/rows contribute exactly 0 to the output.
        w1p = jnp.pad(w1, ((0, 0), (0, K_pad - d_inner)))
        b1p = jnp.pad(b1, (0, K_pad - d_inner))
        w2p = jnp.pad(w2, ((0, K_pad - d_inner), (0, 0)))

    b1r = b1p.reshape(1, K_pad)
    b2r = b2.reshape(1, d_model)

    gm = M_pad // tm
    gn = d_model // tn
    gk = K_pad // tk
    grid = (gm, gn, gk)

    # Advisory cost estimate reflecting real traffic: W1 is re-streamed once per
    # (row tile, column tile); W2 once per row tile.
    w_itemsize = jnp.dtype(w1p.dtype).itemsize
    flops = 2 * M_pad * K_pad * d_model * (gn + 1)
    bytes_accessed = (
        M_pad * d_model * act_itemsize                       # x
        + gm * gn * d_model * K_pad * w_itemsize             # W1 (re-streamed)
        + gm * K_pad * d_model * w_itemsize                  # W2 (re-streamed)
        + gm * gn * K_pad * jnp.dtype(b1r.dtype).itemsize    # b1
        + gm * d_model * jnp.dtype(b2r.dtype).itemsize       # b2
        + M_pad * d_model * act_itemsize                     # out
    )

    out2d = pl.pallas_call(
        ffn_kernel,
        out_shape=jax.ShapeDtypeStruct((M_pad, d_model), x.dtype),
        grid_spec=pltpu.PrefetchScalarGridSpec(
            num_scalar_prefetch=0,
            grid=grid,
            in_specs=[
                pl.BlockSpec((tm, d_model), lambda i, j, k: (i, 0)),  # x (resident over j,k)
                pl.BlockSpec((d_model, tk), lambda i, j, k: (0, k)),  # W1 K-slice
                pl.BlockSpec((1, tk), lambda i, j, k: (0, k)),        # b1 K-slice
                pl.BlockSpec((tk, tn), lambda i, j, k: (k, j)),       # W2 (K, N)-slice
                pl.BlockSpec((1, tn), lambda i, j, k: (0, j)),        # b2 N-slice
            ],
            out_specs=pl.BlockSpec((tm, tn), lambda i, j, k: (i, j)),
            scratch_shapes=[pltpu.VMEM((tm, tn), jnp.float32)],
        ),
        compiler_params=pltpu.CompilerParams(
            dimension_semantics=("parallel", "parallel", "arbitrary"),
            vmem_limit_bytes=int(vmem_budget),
        ),
        cost_estimate=pl.CostEstimate(
            flops=flops, transcendentals=0, bytes_accessed=int(bytes_accessed)),
    )(x2d, w1p, b1r, w2p, b2r)

    if M_pad != M:
        out2d = out2d[:M]
    return out2d.reshape(batch, seq, d_model)


def init_params(key, d_model, d_inner, dtype=jnp.float32):
    # Deterministic synthetic init (PyTorch-style uniform bounds), not a checkpoint load.
    k1, k2, k3, k4 = jax.random.split(key, 4)
    bound1 = 1.0 / (d_model ** 0.5)
    bound2 = 1.0 / (d_inner ** 0.5)
    w1 = jax.random.uniform(k1, (d_model, d_inner), dtype, -bound1, bound1)
    b1 = jax.random.uniform(k2, (d_inner,), dtype, -bound1, bound1)
    w2 = jax.random.uniform(k3, (d_inner, d_model), dtype, -bound2, bound2)
    b2 = jax.random.uniform(k4, (d_model,), dtype, -bound2, bound2)
    return w1, b1, w2, b2


if __name__ == "__main__":
    # Small shapes consistent with the module defaults (d_model=512, d_inner=2048).
    batch, seq = 2, 8
    d_model, d_inner = 512, 2048

    key = jax.random.PRNGKey(0)
    kx, kp = jax.random.split(key)
    x = jax.random.normal(kx, (batch, seq, d_model), jnp.float32)
    w1, b1, w2, b2 = init_params(kp, d_model, d_inner)

    # Reference in plain JAX (matches PyTorch forward semantics, f32).
    ref = jnp.maximum(x.reshape(-1, d_model) @ w1 + b1, 0.0) @ w2 + b2
    ref = ref.reshape(batch, seq, d_model)

    # f32 path (matches the PyTorch fp32 module; tight tolerance).
    out = feed_forward(x, w1, b1, w2, b2)
    out = jax.block_until_ready(out)
    assert out.shape == (batch, seq, d_model)
    assert jnp.allclose(out, ref, atol=1e-4, rtol=1e-4)

    # bf16 path (preferred production config: half the weight HBM traffic and
    # native MXU rate; accumulation stays f32 inside the kernel).
    out_bf = feed_forward(
        x.astype(jnp.bfloat16),
        w1.astype(jnp.bfloat16), b1.astype(jnp.bfloat16),
        w2.astype(jnp.bfloat16), b2.astype(jnp.bfloat16))
    out_bf = jax.block_until_ready(out_bf)
    rel_err = (jnp.linalg.norm(out_bf.astype(jnp.float32) - ref)
               / jnp.linalg.norm(ref))
    assert out_bf.shape == (batch, seq, d_model)
    assert float(rel_err) < 2e-2, f"bf16 rel err too large: {float(rel_err)}"

    print("KERNEL_OK")
</pallas_src>

<mosaic_0001>
module attributes {stable_mosaic.version = 11 : i64} {
  func.func @ffn_kernel(%arg0: i32, %arg1: i32, %arg2: i32, %arg3: memref<16x512xf32, #tpu.memory_space<vmem>>, %arg4: memref<512x2048xf32, #tpu.memory_space<vmem>>, %arg5: memref<1x2048xf32, #tpu.memory_space<vmem>>, %arg6: memref<2048x256xf32, #tpu.memory_space<vmem>>, %arg7: memref<1x256xf32, #tpu.memory_space<vmem>>, %arg8: memref<16x256xf32, #tpu.memory_space<vmem>>, %arg9: memref<16x256xf32, #tpu.memory_space<vmem>>) attributes {dimension_semantics = [#tpu.dimension_semantics<parallel>, #tpu.dimension_semantics<parallel>, #tpu.dimension_semantics<arbitrary>], iteration_bounds = array<i64: 1, 2, 1>, scalar_prefetch = 0 : i64, scratch_operands = 1 : i64, tpu.core_type = #tpu.core_type<tc>, window_params = [{transform_indices = @transform_0, window_bounds = array<i64: 16, 512>}, {transform_indices = @transform_1, window_bounds = array<i64: 512, 2048>}, {transform_indices = @transform_2, window_bounds = array<i64: 1, 2048>}, {transform_indices = @transform_3, window_bounds = array<i64: 2048, 256>}, {transform_indices = @transform_4, window_bounds = array<i64: 1, 256>}, {transform_indices = @transform_5, window_bounds = array<i64: 16, 256>}]} {
    %c0_i32 = arith.constant 0 : i32
    %0 = arith.cmpi eq, %arg2, %c0_i32 : i32
    %1 = arith.extui %0 : i1 to i32
    %c0_i32_0 = arith.constant 0 : i32
    %2 = arith.cmpi ne, %1, %c0_i32_0 : i32
    scf.if %2 {
      %c0_14 = arith.constant 0 : index
      %c0_15 = arith.constant 0 : index
      %19 = vector.load %arg7[%c0_14, %c0_15] : memref<1x256xf32, #tpu.memory_space<vmem>>, vector<1x256xf32>
      %20 = vector.shape_cast %19 : vector<1x256xf32> to vector<1x256xf32>
      %21 = vector.broadcast %20 : vector<1x256xf32> to vector<16x256xf32>
      %c0_16 = arith.constant 0 : index
      %c0_17 = arith.constant 0 : index
      %22 = vector.load %arg9[%c0_16, %c0_17] : memref<16x256xf32, #tpu.memory_space<vmem>>, vector<16x256xf32>
      tpu.vector_store %arg9[%c0_16, %c0_17], %21 {strides = array<i32>} : memref<16x256xf32, #tpu.memory_space<vmem>>, vector<16x256xf32>,
    } else {
    }
    %c0 = arith.constant 0 : index
    %c0_1 = arith.constant 0 : index
    %3 = vector.load %arg3[%c0, %c0_1] : memref<16x512xf32, #tpu.memory_space<vmem>>, vector<16x512xf32>
    %c0_2 = arith.constant 0 : index
    %c0_3 = arith.constant 0 : index
    %4 = vector.load %arg4[%c0_2, %c0_3] : memref<512x2048xf32, #tpu.memory_space<vmem>>, vector<512x2048xf32>
    %cst = arith.constant dense<0.000000e+00> : vector<16x2048xf32>
    %5 = tpu.matmul %3, %4, %cst {dimension_numbers = #tpu.dot_dimension_numbers<[1], [0], [0], [1], [0, 0, 1, 1], [], []>} : vector<16x512xf32>, vector<512x2048xf32>, vector<16x2048xf32> -> vector<16x2048xf32>
    %c0_4 = arith.constant 0 : index
    %c0_5 = arith.constant 0 : index
    %6 = vector.load %arg5[%c0_4, %c0_5] : memref<1x2048xf32, #tpu.memory_space<vmem>>, vector<1x2048xf32>
    %7 = vector.broadcast %6 : vector<1x2048xf32> to vector<16x2048xf32>
    %8 = arith.addf %5, %7 : vector<16x2048xf32>
    %cst_6 = arith.constant 0.000000e+00 : f32
    %9 = vector.broadcast %cst_6 : f32 to vector<16x2048xf32>
    %10 = arith.maximumf %8, %9 : vector<16x2048xf32>
    %c0_7 = arith.constant 0 : index
    %c0_8 = arith.constant 0 : index
    %11 = vector.load %arg6[%c0_7, %c0_8] : memref<2048x256xf32, #tpu.memory_space<vmem>>, vector<2048x256xf32>
    %cst_9 = arith.constant dense<0.000000e+00> : vector<16x256xf32>
    %12 = tpu.matmul %10, %11, %cst_9 {dimension_numbers = #tpu.dot_dimension_numbers<[1], [0], [0], [1], [0, 0, 1, 1], [], []>} : vector<16x2048xf32>, vector<2048x256xf32>, vector<16x256xf32> -> vector<16x256xf32>
    %c0_i32_10 = arith.constant 0 : i32
    %13 = arith.cmpi slt, %arg2, %c0_i32_10 : i32
    %14 = arith.extui %13 : i1 to i32
    %c0_i32_11 = arith.constant 0 : i32
    %15 = arith.cmpi ne, %14, %c0_i32_11 : i32
    scf.if %15 {
      %c0_14 = arith.constant 0 : index
      %c0_15 = arith.constant 0 : index
      %19 = vector.load %arg9[%c0_14, %c0_15] : memref<16x256xf32, #tpu.memory_space<vmem>>, vector<16x256xf32>
      %20 = arith.addf %19, %12 : vector<16x256xf32>
      %c0_16 = arith.constant 0 : index
      %c0_17 = arith.constant 0 : index
      %21 = vector.load %arg9[%c0_16, %c0_17] : memref<16x256xf32, #tpu.memory_space<vmem>>, vector<16x256xf32>
      tpu.vector_store %arg9[%c0_16, %c0_17], %20 {strides = array<i32>} : memref<16x256xf32, #tpu.memory_space<vmem>>, vector<16x256xf32>,
    } else {
    }
    %c0_i32_12 = arith.constant 0 : i32
    %16 = arith.cmpi eq, %arg2, %c0_i32_12 : i32
    %17 = arith.extui %16 : i1 to i32
    %c0_i32_13 = arith.constant 0 : i32
    %18 = arith.cmpi ne, %17, %c0_i32_13 : i32
    scf.if %18 {
      %c0_14 = arith.constant 0 : index
      %c0_15 = arith.constant 0 : index
      %19 = vector.load %arg9[%c0_14, %c0_15] : memref<16x256xf32, #tpu.memory_space<vmem>>, vector<16x256xf32>
      %20 = arith.addf %19, %12 : vector<16x256xf32>
      %c0_16 = arith.constant 0 : index
      %c0_17 = arith.constant 0 : index
      %21 = vector.load %arg8[%c0_16, %c0_17] : memref<16x256xf32, #tpu.memory_space<vmem>>, vector<16x256xf32>
      tpu.vector_store %arg8[%c0_16, %c0_17], %20 {strides = array<i32>} : memref<16x256xf32, #tpu.memory_space<vmem>>, vector<16x256xf32>,
    } else {
    }
    return
  }
  func.func @transform_0(%arg0: i32, %arg1: i32, %arg2: i32) -> (i32, i32) {
    %c0_i32 = arith.constant 0 : i32
    %c0_i32_0 = arith.constant 0 : i32
    return %arg0, %c0_i32 : i32, i32
  }
  func.func @transform_1(%arg0: i32, %arg1: i32, %arg2: i32) -> (i32, i32) {
    %c0_i32 = arith.constant 0 : i32
    %c0_i32_0 = arith.constant 0 : i32
    return %c0_i32, %arg2 : i32, i32
  }
  func.func @transform_2(%arg0: i32, %arg1: i32, %arg2: i32) -> (i32, i32) {
    %c0_i32 = arith.constant 0 : i32
    %c0_i32_0 = arith.constant 0 : i32
    return %c0_i32, %arg2 : i32, i32
  }
  func.func @transform_3(%arg0: i32, %arg1: i32, %arg2: i32) -> (i32, i32) {
    %c0_i32 = arith.constant 0 : i32
    return %arg2, %arg1 : i32, i32
  }
  func.func @transform_4(%arg0: i32, %arg1: i32, %arg2: i32) -> (i32, i32) {
    %c0_i32 = arith.constant 0 : i32
    %c0_i32_0 = arith.constant 0 : i32
    return %c0_i32, %arg1 : i32, i32
  }
  func.func @transform_5(%arg0: i32, %arg1: i32, %arg2: i32) -> (i32, i32) {
    %c0_i32 = arith.constant 0 : i32
    return %arg0, %arg1 : i32, i32
  }
}

</mosaic_0001>

<bundles_post_ra>
// kernel: tpu_custom_call.1
= control target key start
LH: loop header
LB: loop body
LE: loop exit
PB: predicated region body
PF: predicated region fallthrough
CT: control target
= control target key end

     0   :  { %s6427_s0 = inlined_call_operand.hbm [shape: f32[16,512], index: 0, kind: input, shape index: {}]   ;;  %s6428_s1 = inlined_call_operand.hbm [shape: f32[512,2048], index: 1, kind: input, shape index: {}]   ;;  %s6429_s2 = inlined_call_operand.hbm [shape: f32[1,2048], index: 2, kind: input, shape index: {}]   ;;  %s6430_s3 = inlined_call_operand.hbm [shape: f32[2048,512], index: 3, kind: input, shape index: {}]   ;;  %s6431_s4 = inlined_call_operand.hbm [shape: f32[1,512], index: 4, kind: input, shape index: {}]   ;;  %s6432_s5 = inlined_call_operand.hbm [shape: f32[16,512], index: 5, kind: output, shape index: {}]  }
   0x1   :  { %6466 = sst [smem:[#allocation38_spill]] %s6428_s1 }
   0x2   :  { %6467 = sst [smem:[#allocation39_spill]] %s6430_s3 }
   0x3   :  { %10 = vsyncpa [#allocation4], 0 }
   0x4   :  { %11 = vsyncpa [#allocation7], 0 }
   0x5   :  { %12 = vsyncpa [#allocation10], 0 }
   0x6   :  { %14 = vsyncpa [#allocation10 + $0x1], 0 }
   0x7   :  { %15 = vsyncpa [#allocation5], 0 }
   0x8   :  { %17 = vsyncpa [#allocation5 + $0x1], 0  ;;  %s4860_s18 = smov 0   ;;  %s4862_s19 = smov 0  }
   0x9   :  { %s4864_s20 = smov 0   ;;  %s4866_s21 = smov 0  }
   0xa   :  { %s4868_s22 = smov 0   ;;  %s4870_s23 = smov 0  }
   0xb LB: > { %6468 = sst [smem:[#allocation17_spill]] %s4796_s18  ;;  %s4891_s24 = sadd.s32 4294967295, %s4816_s23   ;;  %s4816_s23 = sphi %s4870_s23, %s23_s23   ;;  %s4812_s22 = sphi %s4868_s22, %s6562_s22   ;;  %s4808_s21 = sphi %s4866_s21, %s6561_s21   ;;  %s4804_s20 = sphi %s4864_s20, %s6557_s20   ;;  %s4800_s19 = sphi %s4862_s19, %s6560_s19   ;;  %s4796_s18 = sphi %s4860_s18, %s6559_s18  }
   0xc   : > { %6469 = sst [smem:[#allocation18_spill]] %s4804_s20  ;;  %s4419_s25 = sadd.s32 4294967294, %s4816_s23  }
   0xd   : > { %6470 = sst [smem:[#allocation19_spill]] %s4816_s23  ;;  %p142_p0 = scmp.ne.s32.totalorder %s4800_s19, %s4796_s18 }
   0xe   : > { %p143_p1 = scmp.eq.s32.totalorder %s4891_s24, 0  ;;  %p194_p2 = scmp.eq.s32.totalorder %s4891_s24, 1 }
   0xf   : > { %p200_p3 = scmp.eq.s32.totalorder %s4419_s25, 1  ;;  %p4420_p5 = scmp.ge.s32.totalorder %s4816_s23, 1 }
  0x10   : > { %p4900_p4 = por %p143_p1, %p142_p0  ;;  %p207_p7 = scmp.lt.s32.totalorder %s4816_s23, 3 }
  0x11   : > { %p4905_p6 = por %p200_p3, %p142_p0  ;;  %s6474_s1 = sld [smem:[#allocation38_spill]] }
  0x12   : > { %p4913_p8 = pnand %p4420_p5, %p207_p7  ;;  %s4818_s7 = smov [#allocation6]  }
  0x13   : > { %s6472_s27 = scalar_select %p4905_p6, 1, 0 }
  0x14   : > { %p4462_p9 = pneg %p4913_p8  ;;  %s241_s8 = sshll.u32 %s4818_s7, 4  ;;  %s242_s8 = int_to_ptr.vmem [resolvable:$true] %s241_s8 }
  0x15   : > { %6473 = sst [smem:[#allocation20_spill]] %s6472_s27  ;;  %p4424_p11 = scmp.ge.s32.totalorder %s4816_s23, 2 }
  0x16   : > { %p4921_p10 = pnand %p4462_p9, %p143_p1  ;;  %s4819_s10 = smov 2048  }
  0x17   : > { %s239_s30 = sshll.u32 %s6474_s1, 4  ;;  %s4820_s11 = smov 128   ;;  %s240_s30 = int_to_ptr.hbm [resolvable:$true] %s239_s30 }
  0x18   : > { %4468 = dma.hbm_to_vmem [thread:$0]  (!%p4921_p10), %s240_s30, 131072, %s242_s8, [#allocation7], %s4819_s10, %s4819_s10, %s4820_s11  }
  0x19   : > { %s38_s12 = sadd.s32 1, %s4812_s22  ;;  %s129_s13 = sadd.s32 1, %s4804_s20 }
  0x1a   : > { %p40_p12 = scmp.ge.s32.totalorder %s38_s12, 2  ;;  %p136_p13 = scmp.ne.s32.totalorder %s4804_s20, %s4800_s19 }
  0x1b   : > { %p137_p0 = scmp.eq.s32.totalorder %s4816_s23, 0  ;;  %p4486_p9 = scmp.lt.s32.totalorder %s4816_s23, 2 }
  0x1c   : > { %s6564_s12 = smov (%p40_p12, %s38_s12), 0  ;;  %p4941_p5 = por %p194_p2, %p136_p13 }
  0x1d   : > { %6477 = sst [smem:[#allocation21_spill]] %s6564_s12  ;;  %p4935_p3 = por %p137_p0, %p136_p13 }
  0x1e   : > { %s125_s16 = ssub.s32 %s4812_s22, %s6564_s12  ;;  %s269_s17 = sand.u32 1, %s4816_s23  }
  0x1f   : > { %p127_p7 = scmp.eq.s32.totalorder %s125_s16, 0  ;;  %s271_s25 = sand.u32 1, %s4804_s20  }
  0x20   : > { %s4425_s29 = sshll.u32 %s271_s25, 12  ;;  %s4442_s30 = sshll.u32 %s4812_s22, 4 }
  0x21   : > { %s4951_s28 = scalar_select %p127_p7, %s4804_s20, %s129_s13  }
  0x22   : > { %s6481_s3 = sld [smem:[#allocation39_spill]]  ;;  %s273_s11 = scalar_lea.vmem [#allocation9], %s4425_s29 }
  0x23   : > { %6480 = sst [smem:[#allocation22_spill]] %s4951_s28  ;;  %s284_s1 = sshll.u32 %s273_s11, 4  ;;  %s285_s1 = int_to_ptr.vmem [resolvable:$true] %s284_s1 }
  0x24   : > { %p4959_p2 = pnand %p4486_p9, %p4935_p3  ;;  %s270_s13 = scalar_lea.sflag [#allocation10], %s269_s17 }
  0x25   : > { %s4821_s12 = smov 512   ;;  %s4822_s28 = smov 256  }
  0x26   : > { %s4823_s20 = smov 16   ;;  %s222_s7 = sshll.u32 %s6427_s0, 4  ;;  %s223_s7 = int_to_ptr.hbm [resolvable:$true] %s222_s7 }
  0x27   : > { %s4824_s8 = smov [#allocation3]   ;;  %s4825_s17 = smov 32  }
  0x28   : > { %s281_s10 = scalar_lea.hbm %s6481_s3, %s4442_s30  ;;  %s224_s14 = sshll.u32 %s4824_s8, 4  ;;  %s225_s14 = int_to_ptr.vmem [resolvable:$true] %s224_s14 }
  0x29   : > { %s282_s27 = sshll.u32 %s281_s10, 4  ;;  %s256_s3 = sshll.u32 %s6429_s2, 4  ;;  %s283_s27 = int_to_ptr.hbm [resolvable:$true] %s282_s27  ;;  %s257_s3 = int_to_ptr.hbm [resolvable:$true] %s256_s3 }
  0x2a   : > { %4475 = dma.hbm_to_vmem [thread:$0]  (!%p4959_p2), %s283_s27, 65536, %s285_s1, %s270_s13, %s4821_s12, %s4822_s28, %s4823_s20  }
  0x2b   : > { %4465 = dma.hbm_to_vmem [thread:$0]  (!%p4921_p10), %s223_s7, 1024, %s225_s14, [#allocation4], %s4821_s12, %s4821_s12, %s4825_s17  }
  0x2c   : > { %s4826_s23 = smov [#allocation8]   ;;  %s4428_s1 = sshll.u32 %s271_s25, 1 }
  0x2d   : > { %s258_s18 = sshll.u32 %s4826_s23, 4  ;;  %s4429_s20 = sshll.u32 %s4812_s22, 1  ;;  %s259_s18 = int_to_ptr.vmem [resolvable:$true] %s258_s18 }
  0x2e   : > { %4471 = dma.hbm_to_vmem [thread:$0]  (!%p4921_p10), %s257_s3, 256, %s259_s18, [#allocation7]  }
  0x2f   : > { %s298_s27 = scalar_lea.vmem [#allocation11], %s4428_s1  ;;  %s302_s8 = scalar_lea.hbm %s6431_s4, %s4429_s20 }
  0x30   : > { %s306_s28 = sshll.u32 %s298_s27, 4  ;;  %s304_s10 = sshll.u32 %s302_s8, 4  ;;  %s307_s28 = int_to_ptr.vmem [resolvable:$true] %s306_s28  ;;  %s305_s10 = int_to_ptr.hbm [resolvable:$true] %s304_s10 }
  0x31   : > { %4478 = dma.hbm_to_vmem [thread:$0]  (!%p4959_p2), %s305_s10, 32, %s307_s28, %s270_s13  }
  0x32   : > { %315 = sbr.rel (%p4913_p8) target bundleno = 1146 (0x47a), region = 40 }
  0x37   : > { %4779 = dma.done.wait (%p143_p1), [#allocation4], 1024  }
  0x38   : > { %4781 = vsyncadd (%p143_p1), [#allocation4], 4294966272 }
  0x39   : > { %4783 = dma.done.wait (%p143_p1), [#allocation7], 131328  }
  0x3a   : > { %4785 = vsyncadd (%p143_p1), [#allocation7], 4294835968  ;;  %s332_s3 = sand.u32 1, %s4891_s24   ;;  %s4993_s18 = sand.u32 1, %s4800_s19  }
  0x3b   : > { %s4434_s23 = sshll.u32 %s4993_s18, 12  ;;  %s333_s6 = scalar_lea.sflag [#allocation10], %s332_s3 }
  0x3c   : > { %s4996_s9 = scalar_lea.vmem [#allocation9], %s4434_s23 }
  0x3d   : > { %4787 = dma.done.wait (%p4900_p4), %s333_s6, 65568  }
  0x3e   : > { %4789 = vsyncadd (%p4900_p4), %s333_s6, 4294901728  ;;  %v649_v0 = vld [vmem:[#allocation6 + $0x780] sm:$0xff]  ;;  %s4435_s24 = sshll.u32 %s4993_s18, 1  ;;  %s4436_s12 = sshll.u32 %s4993_s18, 5 }
  0x3f   : > { %v905_v1 = vld [vmem:[#allocation6 + $0xf80] sm:$0xff]  ;;  %1469 = vmatpush.msra.mxu0 %v649_v0  ;;  %v650_v0 = vld [vmem:[#allocation6 + $0x788] sm:$0xff]  ;;  %s346_s26 = scalar_lea.vmem [#allocation11], %s4435_s24  ;;  %s6381_s25 = scalar_lea.vmem [#allocation12], %s4436_s12 }
  0x40   : > { %v1161_v2 = vld [vmem:[#allocation6 + $0x1780] sm:$0xff]  ;;  %1492 = vmatpush.msra.mxu1 %v905_v1  ;;  %v906_v1 = vld [vmem:[#allocation6 + $0xf88] sm:$0xff]  ;;  %s4443_s16 = sshll.u32 %s4808_s21, 4  ;;  %s4268_s11 = sshll.u32 %s6381_s25, 4  ;;  %s4269_s11 = int_to_ptr.vmem [resolvable:$true] %s4268_s11 }
  0x41   : > { %v1417_v3 = vld [vmem:[#allocation6 + $0x1f80] sm:$0xff]  ;;  %1515 = vmatpush.msra.mxu2 %v1161_v2  ;;  %v1162_v2 = vld [vmem:[#allocation6 + $0x1788] sm:$0xff]  ;;  %s4267_s14 = scalar_lea.hbm %s6432_s5, %s4443_s16  ;;  %s4253_s21 = scalar_lea.sflag [#allocation5], %s4993_s18 }
  0x42   : > { %v633_v4 = vld [vmem:[#allocation6 + $0x700] sm:$0xff]  ;;  %1538 = vmatpush.msra.mxu3 %v1417_v3  ;;  %v1418_v3 = vld [vmem:[#allocation6 + $0x1f88] sm:$0xff]  ;;  %s4270_s17 = sshll.u32 %s4267_s14, 4  ;;  %s4746_s29 = scalar_lea.hbm %s6432_s5, 64  ;;  %s4271_s17 = int_to_ptr.hbm [resolvable:$true] %s4270_s17 }
  0x43   : > { %v889_v5 = vld [vmem:[#allocation6 + $0xf00] sm:$0xff]  ;;  %1470 = vmatpush.msra.mxu0 %v633_v4  ;;  %v634_v4 = vld [vmem:[#allocation6 + $0x708] sm:$0xff]  ;;  %s4740_s1 = sshra.s32 %s4271_s17, 4  ;;  %s4741_s1 = int_to_ptr.hbm [resolvable:$true] %s4740_s1 }
  0x44   : > { %v1145_v6 = vld [vmem:[#allocation6 + $0x1700] sm:$0xff]  ;;  %1493 = vmatpush.msra.mxu1 %v889_v5  ;;  %v890_v5 = vld [vmem:[#allocation6 + $0xf08] sm:$0xff]  ;;  %s4742_s20 = scalar_lea.hbm %s4741_s1, 32  ;;  %p4747_p10 = scmp.lt.s32.totalorder %s4741_s1, %s6432_s5 }
  0x45   : > { %v1401_v7 = vld [vmem:[#allocation6 + $0x1f00] sm:$0xff]  ;;  %1516 = vmatpush.msra.mxu2 %v1145_v6  ;;  %v1146_v6 = vld [vmem:[#allocation6 + $0x1708] sm:$0xff]  ;;  %p4743_p1 = scmp.ne.s32.totalorder %s4741_s1, %s4742_s20  ;;  %p4748_p12 = scmp.lt.s32.totalorder %s4746_s29, %s4742_s20 }
  0x46   : > { %v617_v8 = vld [vmem:[#allocation6 + $0x680] sm:$0xff]  ;;  %1539 = vmatpush.msra.mxu3 %v1401_v7  ;;  %v1402_v7 = vld [vmem:[#allocation6 + $0x1f08] sm:$0xff] }
  0x47   : > { %v873_v9 = vld [vmem:[#allocation6 + $0xe80] sm:$0xff]  ;;  %1471 = vmatpush.msra.mxu0 %v617_v8  ;;  %v618_v8 = vld [vmem:[#allocation6 + $0x688] sm:$0xff]  ;;  %p4744_p4 = pnand %p4743_p1, %p4941_p5  ;;  %p4749_p13 = por %p4748_p12, %p4747_p10 }
  0x48   : > { %v1129_v10 = vld [vmem:[#allocation6 + $0x1680] sm:$0xff]  ;;  %1494 = vmatpush.msra.mxu1 %v873_v9  ;;  %v874_v9 = vld [vmem:[#allocation6 + $0xe88] sm:$0xff] }
  0x49   : > { %v1385_v11 = vld [vmem:[#allocation6 + $0x1e80] sm:$0xff]  ;;  %1517 = vmatpush.msra.mxu2 %v1129_v10  ;;  %v1130_v10 = vld [vmem:[#allocation6 + $0x1688] sm:$0xff]  ;;  %p4745_p8 = pneg %p4744_p4 }
  0x4a   : > { %v601_v12 = vld [vmem:[#allocation6 + $0x600] sm:$0xff]  ;;  %1540 = vmatpush.msra.mxu3 %v1385_v11  ;;  %v1386_v11 = vld [vmem:[#allocation6 + $0x1e88] sm:$0xff] }
  0x4b   : > { %v857_v13 = vld [vmem:[#allocation6 + $0xe00] sm:$0xff]  ;;  %1472 = vmatpush.msra.mxu0 %v601_v12  ;;  %v602_v12 = vld [vmem:[#allocation6 + $0x608] sm:$0xff]  ;;  %p4750_p0 = pnand %p4749_p13, %p4745_p8 }
  0x4c   : > { %v1113_v14 = vld [vmem:[#allocation6 + $0x1600] sm:$0xff]  ;;  %1495 = vmatpush.msra.mxu1 %v857_v13  ;;  %v858_v13 = vld [vmem:[#allocation6 + $0xe08] sm:$0xff] }
  0x4d   : > { %v1369_v15 = vld [vmem:[#allocation6 + $0x1e00] sm:$0xff]  ;;  %1518 = vmatpush.msra.mxu2 %v1113_v14  ;;  %v1114_v14 = vld [vmem:[#allocation6 + $0x1608] sm:$0xff] }
  0x4e   : > { %v585_v16 = vld [vmem:[#allocation6 + $0x580] sm:$0xff]  ;;  %1541 = vmatpush.msra.mxu3 %v1369_v15  ;;  %v1370_v15 = vld [vmem:[#allocation6 + $0x1e08] sm:$0xff] }
  0x4f   : > { %v841_v17 = vld [vmem:[#allocation6 + $0xd80] sm:$0xff]  ;;  %1473 = vmatpush.msra.mxu0 %v585_v16  ;;  %v586_v16 = vld [vmem:[#allocation6 + $0x588] sm:$0xff] }
  0x50   : > { %v1097_v18 = vld [vmem:[#allocation6 + $0x1580] sm:$0xff]  ;;  %1496 = vmatpush.msra.mxu1 %v841_v17  ;;  %v842_v17 = vld [vmem:[#allocation6 + $0xd88] sm:$0xff] }
  0x51   : > { %v1353_v19 = vld [vmem:[#allocation6 + $0x1d80] sm:$0xff]  ;;  %1519 = vmatpush.msra.mxu2 %v1097_v18  ;;  %v1098_v18 = vld [vmem:[#allocation6 + $0x1588] sm:$0xff] }
  0x52   : > { %v569_v20 = vld [vmem:[#allocation6 + $0x500] sm:$0xff]  ;;  %1542 = vmatpush.msra.mxu3 %v1353_v19  ;;  %v1354_v19 = vld [vmem:[#allocation6 + $0x1d88] sm:$0xff] }
  0x53   : > { %v825_v21 = vld [vmem:[#allocation6 + $0xd00] sm:$0xff]  ;;  %1474 = vmatpush.msra.mxu0 %v569_v20  ;;  %v570_v20 = vld [vmem:[#allocation6 + $0x508] sm:$0xff] }
  0x54   : > { %v1081_v22 = vld [vmem:[#allocation6 + $0x1500] sm:$0xff]  ;;  %1497 = vmatpush.msra.mxu1 %v825_v21  ;;  %v826_v21 = vld [vmem:[#allocation6 + $0xd08] sm:$0xff] }
  0x55   : > { %v1337_v23 = vld [vmem:[#allocation6 + $0x1d00] sm:$0xff]  ;;  %1520 = vmatpush.msra.mxu2 %v1081_v22  ;;  %v1082_v22 = vld [vmem:[#allocation6 + $0x1508] sm:$0xff] }
  0x56   : > { %v553_v24 = vld [vmem:[#allocation6 + $0x480] sm:$0xff]  ;;  %1543 = vmatpush.msra.mxu3 %v1337_v23  ;;  %v1338_v23 = vld [vmem:[#allocation6 + $0x1d08] sm:$0xff] }
  0x57   : > { %v809_v25 = vld [vmem:[#allocation6 + $0xc80] sm:$0xff]  ;;  %1475 = vmatpush.msra.mxu0 %v553_v24  ;;  %v554_v24 = vld [vmem:[#allocation6 + $0x488] sm:$0xff] }
  0x58   : > { %v1065_v26 = vld [vmem:[#allocation6 + $0x1480] sm:$0xff]  ;;  %1498 = vmatpush.msra.mxu1 %v809_v25  ;;  %v810_v25 = vld [vmem:[#allocation6 + $0xc88] sm:$0xff] }
  0x59   : > { %v1321_v27 = vld [vmem:[#allocation6 + $0x1c80] sm:$0xff]  ;;  %1521 = vmatpush.msra.mxu2 %v1065_v26  ;;  %v1066_v26 = vld [vmem:[#allocation6 + $0x1488] sm:$0xff] }
  0x5a   : > { %v537_v28 = vld [vmem:[#allocation6 + $0x400] sm:$0xff]  ;;  %1544 = vmatpush.msra.mxu3 %v1321_v27  ;;  %v1322_v27 = vld [vmem:[#allocation6 + $0x1c88] sm:$0xff] }
  0x5b   : > { %v793_v29 = vld [vmem:[#allocation6 + $0xc00] sm:$0xff]  ;;  %1476 = vmatpush.msra.mxu0 %v537_v28  ;;  %v538_v28 = vld [vmem:[#allocation6 + $0x408] sm:$0xff] }
  0x5c   : > { %v1049_v30 = vld [vmem:[#allocation6 + $0x1400] sm:$0xff]  ;;  %1499 = vmatpush.msra.mxu1 %v793_v29  ;;  %v794_v29 = vld [vmem:[#allocation6 + $0xc08] sm:$0xff] }
  0x5d   : > { %v1305_v31 = vld [vmem:[#allocation6 + $0x1c00] sm:$0xff]  ;;  %1522 = vmatpush.msra.mxu2 %v1049_v30  ;;  %v1050_v30 = vld [vmem:[#allocation6 + $0x1408] sm:$0xff] }
  0x5e   : > { %v521_v32 = vld [vmem:[#allocation6 + $0x380] sm:$0xff]  ;;  %1545 = vmatpush.msra.mxu3 %v1305_v31  ;;  %v1306_v31 = vld [vmem:[#allocation6 + $0x1c08] sm:$0xff] }
  0x5f   : > { %v777_v33 = vld [vmem:[#allocation6 + $0xb80] sm:$0xff]  ;;  %1477 = vmatpush.msra.mxu0 %v521_v32  ;;  %v522_v32 = vld [vmem:[#allocation6 + $0x388] sm:$0xff] }
  0x60   : > { %v1033_v34 = vld [vmem:[#allocation6 + $0x1380] sm:$0xff]  ;;  %1500 = vmatpush.msra.mxu1 %v777_v33  ;;  %v778_v33 = vld [vmem:[#allocation6 + $0xb88] sm:$0xff] }
  0x61   : > { %v1289_v35 = vld [vmem:[#allocation6 + $0x1b80] sm:$0xff]  ;;  %1523 = vmatpush.msra.mxu2 %v1033_v34  ;;  %v1034_v34 = vld [vmem:[#allocation6 + $0x1388] sm:$0xff] }
  0x62   : > { %v505_v36 = vld [vmem:[#allocation6 + $0x300] sm:$0xff]  ;;  %1546 = vmatpush.msra.mxu3 %v1289_v35  ;;  %v1290_v35 = vld [vmem:[#allocation6 + $0x1b88] sm:$0xff] }
  0x63   : > { %v761_v37 = vld [vmem:[#allocation6 + $0xb00] sm:$0xff]  ;;  %1478 = vmatpush.msra.mxu0 %v505_v36  ;;  %v506_v36 = vld [vmem:[#allocation6 + $0x308] sm:$0xff] }
  0x64   : > { %v1017_v38 = vld [vmem:[#allocation6 + $0x1300] sm:$0xff]  ;;  %1501 = vmatpush.msra.mxu1 %v761_v37  ;;  %v762_v37 = vld [vmem:[#allocation6 + $0xb08] sm:$0xff] }
  0x65   : > { %v1273_v39 = vld [vmem:[#allocation6 + $0x1b00] sm:$0xff]  ;;  %1524 = vmatpush.msra.mxu2 %v1017_v38  ;;  %v1018_v38 = vld [vmem:[#allocation6 + $0x1308] sm:$0xff] }
  0x66   : > { %v489_v40 = vld [vmem:[#allocation6 + $0x280] sm:$0xff]  ;;  %1547 = vmatpush.msra.mxu3 %v1273_v39  ;;  %v1274_v39 = vld [vmem:[#allocation6 + $0x1b08] sm:$0xff] }
  0x67   : > { %v745_v41 = vld [vmem:[#allocation6 + $0xa80] sm:$0xff]  ;;  %1479 = vmatpush.msra.mxu0 %v489_v40  ;;  %v490_v40 = vld [vmem:[#allocation6 + $0x288] sm:$0xff] }
  0x68   : > { %v1001_v42 = vld [vmem:[#allocation6 + $0x1280] sm:$0xff]  ;;  %1502 = vmatpush.msra.mxu1 %v745_v41  ;;  %v746_v41 = vld [vmem:[#allocation6 + $0xa88] sm:$0xff] }
  0x69   : > { %v1257_v43 = vld [vmem:[#allocation6 + $0x1a80] sm:$0xff]  ;;  %1525 = vmatpush.msra.mxu2 %v1001_v42  ;;  %v1002_v42 = vld [vmem:[#allocation6 + $0x1288] sm:$0xff] }
  0x6a   : > { %v473_v44 = vld [vmem:[#allocation6 + $0x200] sm:$0xff]  ;;  %1548 = vmatpush.msra.mxu3 %v1257_v43  ;;  %v1258_v43 = vld [vmem:[#allocation6 + $0x1a88] sm:$0xff] }
  0x6b   : > { %v729_v45 = vld [vmem:[#allocation6 + $0xa00] sm:$0xff]  ;;  %1480 = vmatpush.msra.mxu0 %v473_v44  ;;  %v474_v44 = vld [vmem:[#allocation6 + $0x208] sm:$0xff] }
  0x6c   : > { %v985_v46 = vld [vmem:[#allocation6 + $0x1200] sm:$0xff]  ;;  %1503 = vmatpush.msra.mxu1 %v729_v45  ;;  %v730_v45 = vld [vmem:[#allocation6 + $0xa08] sm:$0xff] }
  0x6d   : > { %v1241_v47 = vld [vmem:[#allocation6 + $0x1a00] sm:$0xff]  ;;  %1526 = vmatpush.msra.mxu2 %v985_v46  ;;  %v986_v46 = vld [vmem:[#allocation6 + $0x1208] sm:$0xff] }
  0x6e   : > { %v457_v48 = vld [vmem:[#allocation6 + $0x180] sm:$0xff]  ;;  %1549 = vmatpush.msra.mxu3 %v1241_v47  ;;  %v1242_v47 = vld [vmem:[#allocation6 + $0x1a08] sm:$0xff] }
  0x6f   : > { %v713_v49 = vld [vmem:[#allocation6 + $0x980] sm:$0xff]  ;;  %1481 = vmatpush.msra.mxu0 %v457_v48  ;;  %v458_v48 = vld [vmem:[#allocation6 + $0x188] sm:$0xff] }
  0x70   : > { %v969_v50 = vld [vmem:[#allocation6 + $0x1180] sm:$0xff]  ;;  %1504 = vmatpush.msra.mxu1 %v713_v49  ;;  %v714_v49 = vld [vmem:[#allocation6 + $0x988] sm:$0xff] }
  0x71   : > { %v1225_v51 = vld [vmem:[#allocation6 + $0x1980] sm:$0xff]  ;;  %1527 = vmatpush.msra.mxu2 %v969_v50  ;;  %v970_v50 = vld [vmem:[#allocation6 + $0x1188] sm:$0xff] }
  0x72   : > { %v441_v52 = vld [vmem:[#allocation6 + $0x100] sm:$0xff]  ;;  %1550 = vmatpush.msra.mxu3 %v1225_v51  ;;  %v1226_v51 = vld [vmem:[#allocation6 + $0x1988] sm:$0xff] }
  0x73   : > { %v697_v53 = vld [vmem:[#allocation6 + $0x900] sm:$0xff]  ;;  %1482 = vmatpush.msra.mxu0 %v441_v52  ;;  %v442_v52 = vld [vmem:[#allocation6 + $0x108] sm:$0xff] }
  0x74   : > { %v953_v54 = vld [vmem:[#allocation6 + $0x1100] sm:$0xff]  ;;  %1505 = vmatpush.msra.mxu1 %v697_v53  ;;  %v698_v53 = vld [vmem:[#allocation6 + $0x908] sm:$0xff] }
  0x75   : > { %v1209_v55 = vld [vmem:[#allocation6 + $0x1900] sm:$0xff]  ;;  %1528 = vmatpush.msra.mxu2 %v953_v54  ;;  %v954_v54 = vld [vmem:[#allocation6 + $0x1108] sm:$0xff] }
  0x76   : > { %v425_v56 = vld [vmem:[#allocation6 + $0x80] sm:$0xff]  ;;  %1551 = vmatpush.msra.mxu3 %v1209_v55  ;;  %v1210_v55 = vld [vmem:[#allocation6 + $0x1908] sm:$0xff] }
  0x77   : > { %v681_v57 = vld [vmem:[#allocation6 + $0x880] sm:$0xff]  ;;  %1483 = vmatpush.msra.mxu0 %v425_v56  ;;  %v426_v56 = vld [vmem:[#allocation6 + $0x88] sm:$0xff] }
  0x78   : > { %v937_v58 = vld [vmem:[#allocation6 + $0x1080] sm:$0xff]  ;;  %1506 = vmatpush.msra.mxu1 %v681_v57  ;;  %v682_v57 = vld [vmem:[#allocation6 + $0x888] sm:$0xff] }
  0x79   : > { %v1193_v59 = vld [vmem:[#allocation6 + $0x1880] sm:$0xff]  ;;  %1529 = vmatpush.msra.mxu2 %v937_v58  ;;  %v938_v58 = vld [vmem:[#allocation6 + $0x1088] sm:$0xff] }
  0x7a   : > { %v409_v60 = vld [vmem:[#allocation6] sm:$0xff]  ;;  %1552 = vmatpush.msra.mxu3 %v1193_v59  ;;  %v1194_v59 = vld [vmem:[#allocation6 + $0x1888] sm:$0xff] }
  0x7b   : > { %v665_v61 = vld [vmem:[#allocation6 + $0x800] sm:$0xff]  ;;  %1484 = vmatpush.msra.mxu0 %v409_v60  ;;  %v410_v60 = vld [vmem:[#allocation6 + $0x8] sm:$0xff] }
  0x7c   : > { %v921_v62 = vld [vmem:[#allocation6 + $0x1000] sm:$0xff]  ;;  %1507 = vmatpush.msra.mxu1 %v665_v61  ;;  %v666_v61 = vld [vmem:[#allocation6 + $0x808] sm:$0xff] }
  0x7d   : > { %v1177_v63 = vld [vmem:[#allocation6 + $0x1800] sm:$0xff]  ;;  %1530 = vmatpush.msra.mxu2 %v921_v62  ;;  %1561 = vmatpush.msrb.mxu0 %v650_v0  ;;  %v922_v62 = vld [vmem:[#allocation6 + $0x1008] sm:$0xff] }
  0x7e   : > { %1553 = vmatpush.msra.mxu3 %v1177_v63  ;;  %1584 = vmatpush.msrb.mxu1 %v906_v1  ;;  %v1178_v63 = vld [vmem:[#allocation6 + $0x1808] sm:$0xff]  ;;  %v5002_v0 = vld [vmem:[#allocation3] sm:$0xff] }
  0x7f   : > { %1607 = vmatpush.msrb.mxu2 %v1162_v2  ;;  %1562 = vmatpush.msrb.mxu0 %v634_v4  ;;  %v5004_v1 = vld [vmem:[#allocation3 + $0x8] sm:$0xff]  ;;  %v5006_v2 = vld [vmem:[#allocation3 + $0x10] sm:$0xff] }
  0x80   : > { %1630 = vmatpush.msrb.mxu3 %v1418_v3  ;;  %1585 = vmatpush.msrb.mxu1 %v890_v5  ;;  %v5008_v3 = vld [vmem:[#allocation3 + $0x18] sm:$0xff]  ;;  %v651_v4 = vld [vmem:[#allocation6 + $0x790] sm:$0xff] }
  0x81   : > { %1608 = vmatpush.msrb.mxu2 %v1146_v6  ;;  %1563 = vmatpush.msrb.mxu0 %v618_v8  ;;  %v907_v5 = vld [vmem:[#allocation6 + $0xf90] sm:$0xff] }
  0x82   : > { %1631 = vmatpush.msrb.mxu3 %v1402_v7  ;;  %1586 = vmatpush.msrb.mxu1 %v874_v9  ;;  %v1163_v6 = vld [vmem:[#allocation6 + $0x1790] sm:$0xff] }
  0x83   : > { %1609 = vmatpush.msrb.mxu2 %v1130_v10  ;;  %1564 = vmatpush.msrb.mxu0 %v602_v12  ;;  %v1419_v7 = vld [vmem:[#allocation6 + $0x1f90] sm:$0xff] }
  0x84   : > { %1632 = vmatpush.msrb.mxu3 %v1386_v11  ;;  %1587 = vmatpush.msrb.mxu1 %v858_v13  ;;  %v635_v8 = vld [vmem:[#allocation6 + $0x710] sm:$0xff] }
  0x85   : > { %1610 = vmatpush.msrb.mxu2 %v1114_v14  ;;  %1565 = vmatpush.msrb.mxu0 %v586_v16  ;;  %v891_v9 = vld [vmem:[#allocation6 + $0xf10] sm:$0xff] }
  0x86   : > { %1633 = vmatpush.msrb.mxu3 %v1370_v15  ;;  %1588 = vmatpush.msrb.mxu1 %v842_v17  ;;  %v1147_v10 = vld [vmem:[#allocation6 + $0x1710] sm:$0xff] }
  0x87   : > { %1611 = vmatpush.msrb.mxu2 %v1098_v18  ;;  %1566 = vmatpush.msrb.mxu0 %v570_v20  ;;  %v1403_v11 = vld [vmem:[#allocation6 + $0x1f10] sm:$0xff] }
  0x88   : > { %1634 = vmatpush.msrb.mxu3 %v1354_v19  ;;  %1589 = vmatpush.msrb.mxu1 %v826_v21  ;;  %v619_v12 = vld [vmem:[#allocation6 + $0x690] sm:$0xff] }
  0x89   : > { %1612 = vmatpush.msrb.mxu2 %v1082_v22  ;;  %1567 = vmatpush.msrb.mxu0 %v554_v24  ;;  %v875_v13 = vld [vmem:[#allocation6 + $0xe90] sm:$0xff] }
  0x8a   : > { %1635 = vmatpush.msrb.mxu3 %v1338_v23  ;;  %1590 = vmatpush.msrb.mxu1 %v810_v25  ;;  %v1131_v14 = vld [vmem:[#allocation6 + $0x1690] sm:$0xff] }
  0x8b   : > { %1613 = vmatpush.msrb.mxu2 %v1066_v26  ;;  %1568 = vmatpush.msrb.mxu0 %v538_v28  ;;  %v1387_v15 = vld [vmem:[#allocation6 + $0x1e90] sm:$0xff] }
  0x8c   : > { %1636 = vmatpush.msrb.mxu3 %v1322_v27  ;;  %1591 = vmatpush.msrb.mxu1 %v794_v29  ;;  %v603_v16 = vld [vmem:[#allocation6 + $0x610] sm:$0xff] }
  0x8d   : > { %1614 = vmatpush.msrb.mxu2 %v1050_v30  ;;  %1569 = vmatpush.msrb.mxu0 %v522_v32  ;;  %v859_v17 = vld [vmem:[#allocation6 + $0xe10] sm:$0xff] }
  0x8e   : > { %1637 = vmatpush.msrb.mxu3 %v1306_v31  ;;  %1592 = vmatpush.msrb.mxu1 %v778_v33  ;;  %v1115_v18 = vld [vmem:[#allocation6 + $0x1610] sm:$0xff] }
  0x8f   : > { %1615 = vmatpush.msrb.mxu2 %v1034_v34  ;;  %1570 = vmatpush.msrb.mxu0 %v506_v36  ;;  %v1371_v19 = vld [vmem:[#allocation6 + $0x1e10] sm:$0xff] }
  0x90   : > { %1638 = vmatpush.msrb.mxu3 %v1290_v35  ;;  %1593 = vmatpush.msrb.mxu1 %v762_v37  ;;  %v587_v20 = vld [vmem:[#allocation6 + $0x590] sm:$0xff] }
  0x91   : > { %1616 = vmatpush.msrb.mxu2 %v1018_v38  ;;  %1571 = vmatpush.msrb.mxu0 %v490_v40  ;;  %v843_v21 = vld [vmem:[#allocation6 + $0xd90] sm:$0xff] }
  0x92   : > { %1639 = vmatpush.msrb.mxu3 %v1274_v39  ;;  %1594 = vmatpush.msrb.mxu1 %v746_v41  ;;  %v1099_v22 = vld [vmem:[#allocation6 + $0x1590] sm:$0xff] }
  0x93   : > { %1617 = vmatpush.msrb.mxu2 %v1002_v42  ;;  %1572 = vmatpush.msrb.mxu0 %v474_v44  ;;  %v1355_v23 = vld [vmem:[#allocation6 + $0x1d90] sm:$0xff] }
  0x94   : > { %1640 = vmatpush.msrb.mxu3 %v1258_v43  ;;  %1595 = vmatpush.msrb.mxu1 %v730_v45  ;;  %v571_v24 = vld [vmem:[#allocation6 + $0x510] sm:$0xff] }
  0x95   : > { %1618 = vmatpush.msrb.mxu2 %v986_v46  ;;  %1573 = vmatpush.msrb.mxu0 %v458_v48  ;;  %v827_v25 = vld [vmem:[#allocation6 + $0xd10] sm:$0xff] }
  0x96   : > { %1641 = vmatpush.msrb.mxu3 %v1242_v47  ;;  %1596 = vmatpush.msrb.mxu1 %v714_v49  ;;  %v1083_v26 = vld [vmem:[#allocation6 + $0x1510] sm:$0xff] }
  0x97   : > { %1619 = vmatpush.msrb.mxu2 %v970_v50  ;;  %1574 = vmatpush.msrb.mxu0 %v442_v52  ;;  %v1339_v27 = vld [vmem:[#allocation6 + $0x1d10] sm:$0xff]  ;;  %v5014_v52 = vld [vmem:[#allocation3 + $0x20] sm:$0xff] }
  0x98   : > { %1642 = vmatpush.msrb.mxu3 %v1226_v51  ;;  %1597 = vmatpush.msrb.mxu1 %v698_v53  ;;  %v555_v28 = vld [vmem:[#allocation6 + $0x490] sm:$0xff]  ;;  %v5016_v53 = vld [vmem:[#allocation3 + $0x28] sm:$0xff] }
  0x99   : > { %1620 = vmatpush.msrb.mxu2 %v954_v54  ;;  %1575 = vmatpush.msrb.mxu0 %v426_v56  ;;  %v811_v29 = vld [vmem:[#allocation6 + $0xc90] sm:$0xff] }
  0x9a   : > { %1643 = vmatpush.msrb.mxu3 %v1210_v55  ;;  %1598 = vmatpush.msrb.mxu1 %v682_v57  ;;  %v1067_v30 = vld [vmem:[#allocation6 + $0x1490] sm:$0xff]  ;;  %v5020_v55 = vld [vmem:[#allocation3 + $0x38] sm:$0xff] }
  0x9b   : > { %1621 = vmatpush.msrb.mxu2 %v938_v58  ;;  %1576 = vmatpush.msrb.mxu0 %v410_v60  ;;  %v1323_v31 = vld [vmem:[#allocation6 + $0x1c90] sm:$0xff] }
  0x9c   : > { %1644 = vmatpush.msrb.mxu3 %v1194_v59  ;;  %1599 = vmatpush.msrb.mxu1 %v666_v61  ;;  %v539_v32 = vld [vmem:[#allocation6 + $0x410] sm:$0xff] }
  0x9d   : > { %1622 = vmatpush.msrb.mxu2 %v922_v62  ;;  %1485 = vmatmul.f32.vlgmr.msra.gmra.mxu0 %v5002_v0  ;;  %v795_v33 = vld [vmem:[#allocation6 + $0xc10] sm:$0xff] }
  0x9e   : > { %1645 = vmatpush.msrb.mxu3 %v1178_v63  ;;  %1508 = vmatmul.f32.vlgmr.msra.gmra.mxu1 %v5004_v1  ;;  %v1051_v34 = vld [vmem:[#allocation6 + $0x1410] sm:$0xff] }
  0x9f   : > { %1531 = vmatmul.f32.vlgmr.msra.gmra.mxu2 %v5006_v2  ;;  %1554 = vmatmul.f32.vlgmr.msra.gmra.mxu3 %v5008_v3  ;;  %v1307_v35 = vld [vmem:[#allocation6 + $0x1c10] sm:$0xff] }
  0xa0   : > { %1653 = vmatpush.msra.mxu0 %v651_v4  ;;  %1676 = vmatpush.msra.mxu1 %v907_v5  ;;  %v523_v36 = vld [vmem:[#allocation6 + $0x390] sm:$0xff] }
  0xa1   : > { %1699 = vmatpush.msra.mxu2 %v1163_v6  ;;  %1722 = vmatpush.msra.mxu3 %v1419_v7  ;;  %v779_v37 = vld [vmem:[#allocation6 + $0xb90] sm:$0xff] }
  0xa2   : > { %1654 = vmatpush.msra.mxu0 %v635_v8  ;;  %1677 = vmatpush.msra.mxu1 %v891_v9  ;;  %v1035_v38 = vld [vmem:[#allocation6 + $0x1390] sm:$0xff] }
  0xa3   : > { %1700 = vmatpush.msra.mxu2 %v1147_v10  ;;  %1723 = vmatpush.msra.mxu3 %v1403_v11  ;;  %v1291_v39 = vld [vmem:[#allocation6 + $0x1b90] sm:$0xff] }
  0xa4   : > { %1655 = vmatpush.msra.mxu0 %v619_v12  ;;  %1678 = vmatpush.msra.mxu1 %v875_v13  ;;  %v507_v40 = vld [vmem:[#allocation6 + $0x310] sm:$0xff]  ;;  %v652_v12 = vld [vmem:[#allocation6 + $0x798] sm:$0xff] }
  0xa5   : > { %1701 = vmatpush.msra.mxu2 %v1131_v14  ;;  %1724 = vmatpush.msra.mxu3 %v1387_v15  ;;  %v763_v41 = vld [vmem:[#allocation6 + $0xb10] sm:$0xff]  ;;  %v908_v13 = vld [vmem:[#allocation6 + $0xf98] sm:$0xff] }
  0xa6   : > { %1656 = vmatpush.msra.mxu0 %v603_v16  ;;  %1679 = vmatpush.msra.mxu1 %v859_v17  ;;  %v1019_v42 = vld [vmem:[#allocation6 + $0x1310] sm:$0xff]  ;;  %v1164_v14 = vld [vmem:[#allocation6 + $0x1798] sm:$0xff] }
  0xa7   : > { %1702 = vmatpush.msra.mxu2 %v1115_v18  ;;  %1725 = vmatpush.msra.mxu3 %v1371_v19  ;;  %v1275_v43 = vld [vmem:[#allocation6 + $0x1b10] sm:$0xff]  ;;  %v1420_v15 = vld [vmem:[#allocation6 + $0x1f98] sm:$0xff] }
  0xa8   : > { %1657 = vmatpush.msra.mxu0 %v587_v20  ;;  %1680 = vmatpush.msra.mxu1 %v843_v21  ;;  %v491_v44 = vld [vmem:[#allocation6 + $0x290] sm:$0xff]  ;;  %v636_v16 = vld [vmem:[#allocation6 + $0x718] sm:$0xff] }
  0xa9   : > { %1703 = vmatpush.msra.mxu2 %v1099_v22  ;;  %1726 = vmatpush.msra.mxu3 %v1355_v23  ;;  %v747_v45 = vld [vmem:[#allocation6 + $0xa90] sm:$0xff]  ;;  %v892_v17 = vld [vmem:[#allocation6 + $0xf18] sm:$0xff] }
  0xaa   : > { %1658 = vmatpush.msra.mxu0 %v571_v24  ;;  %1681 = vmatpush.msra.mxu1 %v827_v25  ;;  %v1003_v46 = vld [vmem:[#allocation6 + $0x1290] sm:$0xff]  ;;  %v1148_v18 = vld [vmem:[#allocation6 + $0x1718] sm:$0xff] }
  0xab   : > { %1704 = vmatpush.msra.mxu2 %v1083_v26  ;;  %1727 = vmatpush.msra.mxu3 %v1339_v27  ;;  %v1259_v47 = vld [vmem:[#allocation6 + $0x1a90] sm:$0xff]  ;;  %v1404_v19 = vld [vmem:[#allocation6 + $0x1f18] sm:$0xff] }
  0xac   : > { %1659 = vmatpush.msra.mxu0 %v555_v28  ;;  %1682 = vmatpush.msra.mxu1 %v811_v29  ;;  %v475_v48 = vld [vmem:[#allocation6 + $0x210] sm:$0xff]  ;;  %v620_v20 = vld [vmem:[#allocation6 + $0x698] sm:$0xff] }
  0xad   : > { %1705 = vmatpush.msra.mxu2 %v1067_v30  ;;  %1728 = vmatpush.msra.mxu3 %v1323_v31  ;;  %v731_v49 = vld [vmem:[#allocation6 + $0xa10] sm:$0xff]  ;;  %v876_v21 = vld [vmem:[#allocation6 + $0xe98] sm:$0xff] }
  0xae   : > { %1660 = vmatpush.msra.mxu0 %v539_v32  ;;  %1683 = vmatpush.msra.mxu1 %v795_v33  ;;  %v987_v50 = vld [vmem:[#allocation6 + $0x1210] sm:$0xff]  ;;  %v1132_v22 = vld [vmem:[#allocation6 + $0x1698] sm:$0xff] }
  0xaf   : > { %1706 = vmatpush.msra.mxu2 %v1051_v34  ;;  %1729 = vmatpush.msra.mxu3 %v1307_v35  ;;  %v1243_v51 = vld [vmem:[#allocation6 + $0x1a10] sm:$0xff]  ;;  %v1388_v23 = vld [vmem:[#allocation6 + $0x1e98] sm:$0xff] }
  0xb0   : > { %1661 = vmatpush.msra.mxu0 %v523_v36  ;;  %1684 = vmatpush.msra.mxu1 %v779_v37  ;;  %v5018_v54 = vld [vmem:[#allocation3 + $0x30] sm:$0xff]  ;;  %v604_v24 = vld [vmem:[#allocation6 + $0x618] sm:$0xff] }
  0xb1   : > { %1707 = vmatpush.msra.mxu2 %v1035_v38  ;;  %1730 = vmatpush.msra.mxu3 %v1291_v39  ;;  %v459_v56 = vld [vmem:[#allocation6 + $0x190] sm:$0xff]  ;;  %v860_v25 = vld [vmem:[#allocation6 + $0xe18] sm:$0xff] }
  0xb2   : > { %1662 = vmatpush.msra.mxu0 %v507_v40  ;;  %1685 = vmatpush.msra.mxu1 %v763_v41  ;;  %v715_v57 = vld [vmem:[#allocation6 + $0x990] sm:$0xff]  ;;  %v1116_v26 = vld [vmem:[#allocation6 + $0x1618] sm:$0xff] }
  0xb3   : > { %1708 = vmatpush.msra.mxu2 %v1019_v42  ;;  %1731 = vmatpush.msra.mxu3 %v1275_v43  ;;  %v971_v58 = vld [vmem:[#allocation6 + $0x1190] sm:$0xff]  ;;  %v1372_v27 = vld [vmem:[#allocation6 + $0x1e18] sm:$0xff] }
  0xb4   : > { %1663 = vmatpush.msra.mxu0 %v491_v44  ;;  %1686 = vmatpush.msra.mxu1 %v747_v45  ;;  %v1227_v59 = vld [vmem:[#allocation6 + $0x1990] sm:$0xff]  ;;  %v588_v28 = vld [vmem:[#allocation6 + $0x598] sm:$0xff] }
  0xb5   : > { %1709 = vmatpush.msra.mxu2 %v1003_v46  ;;  %1732 = vmatpush.msra.mxu3 %v1259_v47  ;;  %v443_v60 = vld [vmem:[#allocation6 + $0x110] sm:$0xff]  ;;  %v844_v29 = vld [vmem:[#allocation6 + $0xd98] sm:$0xff] }
  0xb6   : > { %1664 = vmatpush.msra.mxu0 %v475_v48  ;;  %1687 = vmatpush.msra.mxu1 %v731_v49  ;;  %v699_v61 = vld [vmem:[#allocation6 + $0x910] sm:$0xff]  ;;  %v1100_v30 = vld [vmem:[#allocation6 + $0x1598] sm:$0xff] }
  0xb7   : > { %1710 = vmatpush.msra.mxu2 %v987_v50  ;;  %1733 = vmatpush.msra.mxu3 %v1243_v51  ;;  %v955_v62 = vld [vmem:[#allocation6 + $0x1110] sm:$0xff]  ;;  %v1356_v31 = vld [vmem:[#allocation6 + $0x1d98] sm:$0xff] }
  0xb8   : > { %1488 = vmatmul.f32.gmra.mxu0 %v5014_v52  ;;  %1511 = vmatmul.f32.gmra.mxu1 %v5016_v53  ;;  %v1211_v63 = vld [vmem:[#allocation6 + $0x1910] sm:$0xff]  ;;  %v572_v32 = vld [vmem:[#allocation6 + $0x518] sm:$0xff] }
  0xb9   : > { %1534 = vmatmul.f32.gmra.mxu2 %v5018_v54  ;;  %1557 = vmatmul.f32.gmra.mxu3 %v5020_v55  ;;  %v427_v4 = vld [vmem:[#allocation6 + $0x90] sm:$0xff]  ;;  %v828_v33 = vld [vmem:[#allocation6 + $0xd18] sm:$0xff] }
  0xba   : > { %1665 = vmatpush.msra.mxu0 %v459_v56  ;;  %1688 = vmatpush.msra.mxu1 %v715_v57  ;;  %v683_v5 = vld [vmem:[#allocation6 + $0x890] sm:$0xff]  ;;  %v1084_v34 = vld [vmem:[#allocation6 + $0x1518] sm:$0xff] }
  0xbb   : > { %1711 = vmatpush.msra.mxu2 %v971_v58  ;;  %1734 = vmatpush.msra.mxu3 %v1227_v59  ;;  %v939_v6 = vld [vmem:[#allocation6 + $0x1090] sm:$0xff]  ;;  %v1340_v35 = vld [vmem:[#allocation6 + $0x1d18] sm:$0xff] }
  0xbc   : > { %1666 = vmatpush.msra.mxu0 %v443_v60  ;;  %1689 = vmatpush.msra.mxu1 %v699_v61  ;;  %v1195_v7 = vld [vmem:[#allocation6 + $0x1890] sm:$0xff]  ;;  %v556_v36 = vld [vmem:[#allocation6 + $0x498] sm:$0xff] }
  0xbd   : > { %1712 = vmatpush.msra.mxu2 %v955_v62  ;;  %1735 = vmatpush.msra.mxu3 %v1211_v63  ;;  %v411_v8 = vld [vmem:[#allocation6 + $0x10] sm:$0xff]  ;;  %v812_v37 = vld [vmem:[#allocation6 + $0xc98] sm:$0xff] }
  0xbe   : > { %v667_v9 = vld [vmem:[#allocation6 + $0x810] sm:$0xff]  ;;  %1667 = vmatpush.msra.mxu0 %v427_v4  ;;  %1690 = vmatpush.msra.mxu1 %v683_v5  ;;  %v1068_v38 = vld [vmem:[#allocation6 + $0x1498] sm:$0xff] }
  0xbf   : > { %v923_v10 = vld [vmem:[#allocation6 + $0x1010] sm:$0xff]  ;;  %1713 = vmatpush.msra.mxu2 %v939_v6  ;;  %1736 = vmatpush.msra.mxu3 %v1195_v7  ;;  %v1324_v39 = vld [vmem:[#allocation6 + $0x1c98] sm:$0xff] }
  0xc0   : > { %v1179_v11 = vld [vmem:[#allocation6 + $0x1810] sm:$0xff]  ;;  %1668 = vmatpush.msra.mxu0 %v411_v8  ;;  %1691 = vmatpush.msra.mxu1 %v667_v9  ;;  %v540_v40 = vld [vmem:[#allocation6 + $0x418] sm:$0xff] }
  0xc1   : > { %1714 = vmatpush.msra.mxu2 %v923_v10  ;;  %1737 = vmatpush.msra.mxu3 %v1179_v11  ;;  %v796_v41 = vld [vmem:[#allocation6 + $0xc18] sm:$0xff] }
  0xc2   : > { %1577 = vmatmul.f32.vlgmr.msrb.gmra.mxu0 %v5002_v0  ;;  %1600 = vmatmul.f32.vlgmr.msrb.gmra.mxu1 %v5004_v1  ;;  %v1052_v42 = vld [vmem:[#allocation6 + $0x1418] sm:$0xff] }
  0xc3   : > { %1623 = vmatmul.f32.vlgmr.msrb.gmra.mxu2 %v5006_v2  ;;  %1646 = vmatmul.f32.vlgmr.msrb.gmra.mxu3 %v5008_v3  ;;  %v1308_v43 = vld [vmem:[#allocation6 + $0x1c18] sm:$0xff] }
  0xc4   : > { %1745 = vmatpush.msrb.mxu0 %v652_v12  ;;  %1768 = vmatpush.msrb.mxu1 %v908_v13  ;;  %v524_v44 = vld [vmem:[#allocation6 + $0x398] sm:$0xff] }
  0xc5   : > { %1791 = vmatpush.msrb.mxu2 %v1164_v14  ;;  %1814 = vmatpush.msrb.mxu3 %v1420_v15  ;;  %v780_v45 = vld [vmem:[#allocation6 + $0xb98] sm:$0xff] }
  0xc6   : > { %1746 = vmatpush.msrb.mxu0 %v636_v16  ;;  %1769 = vmatpush.msrb.mxu1 %v892_v17  ;;  %v1036_v46 = vld [vmem:[#allocation6 + $0x1398] sm:$0xff] }
  0xc7   : > { %1792 = vmatpush.msrb.mxu2 %v1148_v18  ;;  %1815 = vmatpush.msrb.mxu3 %v1404_v19  ;;  %v1292_v47 = vld [vmem:[#allocation6 + $0x1b98] sm:$0xff] }
  0xc8   : > { %1747 = vmatpush.msrb.mxu0 %v620_v20  ;;  %1770 = vmatpush.msrb.mxu1 %v876_v21  ;;  %v508_v48 = vld [vmem:[#allocation6 + $0x318] sm:$0xff]  ;;  %v653_v20 = vld [vmem:[#allocation6 + $0x7a0] sm:$0xff] }
  0xc9   : > { %1793 = vmatpush.msrb.mxu2 %v1132_v22  ;;  %1816 = vmatpush.msrb.mxu3 %v1388_v23  ;;  %v764_v49 = vld [vmem:[#allocation6 + $0xb18] sm:$0xff]  ;;  %v909_v21 = vld [vmem:[#allocation6 + $0xfa0] sm:$0xff] }
  0xca   : > { %1748 = vmatpush.msrb.mxu0 %v604_v24  ;;  %1771 = vmatpush.msrb.mxu1 %v860_v25  ;;  %v1020_v50 = vld [vmem:[#allocation6 + $0x1318] sm:$0xff]  ;;  %v1165_v22 = vld [vmem:[#allocation6 + $0x17a0] sm:$0xff] }
  0xcb   : > { %1794 = vmatpush.msrb.mxu2 %v1116_v26  ;;  %1817 = vmatpush.msrb.mxu3 %v1372_v27  ;;  %v1276_v51 = vld [vmem:[#allocation6 + $0x1b18] sm:$0xff]  ;;  %v1421_v23 = vld [vmem:[#allocation6 + $0x1fa0] sm:$0xff] }
  0xcc   : > { %1749 = vmatpush.msrb.mxu0 %v588_v28  ;;  %1772 = vmatpush.msrb.mxu1 %v844_v29  ;;  %v492_v56 = vld [vmem:[#allocation6 + $0x298] sm:$0xff]  ;;  %v637_v24 = vld [vmem:[#allocation6 + $0x720] sm:$0xff] }
  0xcd   : > { %1795 = vmatpush.msrb.mxu2 %v1100_v30  ;;  %1818 = vmatpush.msrb.mxu3 %v1356_v31  ;;  %v748_v57 = vld [vmem:[#allocation6 + $0xa98] sm:$0xff]  ;;  %v893_v25 = vld [vmem:[#allocation6 + $0xf20] sm:$0xff] }
  0xce   : > { %1750 = vmatpush.msrb.mxu0 %v572_v32  ;;  %1773 = vmatpush.msrb.mxu1 %v828_v33  ;;  %v1004_v58 = vld [vmem:[#allocation6 + $0x1298] sm:$0xff]  ;;  %v1149_v26 = vld [vmem:[#allocation6 + $0x1720] sm:$0xff] }
  0xcf   : > { %1796 = vmatpush.msrb.mxu2 %v1084_v34  ;;  %1819 = vmatpush.msrb.mxu3 %v1340_v35  ;;  %v1260_v59 = vld [vmem:[#allocation6 + $0x1a98] sm:$0xff]  ;;  %v1405_v27 = vld [vmem:[#allocation6 + $0x1f20] sm:$0xff] }
  0xd0   : > { %1751 = vmatpush.msrb.mxu0 %v556_v36  ;;  %1774 = vmatpush.msrb.mxu1 %v812_v37  ;;  %v476_v60 = vld [vmem:[#allocation6 + $0x218] sm:$0xff]  ;;  %v621_v28 = vld [vmem:[#allocation6 + $0x6a0] sm:$0xff] }
  0xd1   : > { %1797 = vmatpush.msrb.mxu2 %v1068_v38  ;;  %1820 = vmatpush.msrb.mxu3 %v1324_v39  ;;  %v732_v61 = vld [vmem:[#allocation6 + $0xa18] sm:$0xff]  ;;  %v877_v29 = vld [vmem:[#allocation6 + $0xea0] sm:$0xff] }
  0xd2   : > { %1752 = vmatpush.msrb.mxu0 %v540_v40  ;;  %1775 = vmatpush.msrb.mxu1 %v796_v41  ;;  %v988_v62 = vld [vmem:[#allocation6 + $0x1218] sm:$0xff]  ;;  %v1133_v30 = vld [vmem:[#allocation6 + $0x16a0] sm:$0xff] }
  0xd3   : > { %1798 = vmatpush.msrb.mxu2 %v1052_v42  ;;  %1821 = vmatpush.msrb.mxu3 %v1308_v43  ;;  %v1244_v63 = vld [vmem:[#allocation6 + $0x1a18] sm:$0xff]  ;;  %v1389_v31 = vld [vmem:[#allocation6 + $0x1ea0] sm:$0xff] }
  0xd4   : > { %1753 = vmatpush.msrb.mxu0 %v524_v44  ;;  %1776 = vmatpush.msrb.mxu1 %v780_v45  ;;  %v460_v4 = vld [vmem:[#allocation6 + $0x198] sm:$0xff]  ;;  %v605_v32 = vld [vmem:[#allocation6 + $0x620] sm:$0xff] }
  0xd5   : > { %1799 = vmatpush.msrb.mxu2 %v1036_v46  ;;  %1822 = vmatpush.msrb.mxu3 %v1292_v47  ;;  %v716_v5 = vld [vmem:[#allocation6 + $0x998] sm:$0xff]  ;;  %v861_v33 = vld [vmem:[#allocation6 + $0xe20] sm:$0xff] }
  0xd6   : > { %1754 = vmatpush.msrb.mxu0 %v508_v48  ;;  %1777 = vmatpush.msrb.mxu1 %v764_v49  ;;  %v972_v6 = vld [vmem:[#allocation6 + $0x1198] sm:$0xff]  ;;  %v1117_v34 = vld [vmem:[#allocation6 + $0x1620] sm:$0xff] }
  0xd7   : > { %1800 = vmatpush.msrb.mxu2 %v1020_v50  ;;  %1823 = vmatpush.msrb.mxu3 %v1276_v51  ;;  %v1228_v7 = vld [vmem:[#allocation6 + $0x1998] sm:$0xff]  ;;  %v1373_v35 = vld [vmem:[#allocation6 + $0x1e20] sm:$0xff] }
  0xd8   : > { %1755 = vmatpush.msrb.mxu0 %v492_v56  ;;  %1778 = vmatpush.msrb.mxu1 %v748_v57  ;;  %v444_v8 = vld [vmem:[#allocation6 + $0x118] sm:$0xff]  ;;  %v589_v36 = vld [vmem:[#allocation6 + $0x5a0] sm:$0xff] }
  0xd9   : > { %1801 = vmatpush.msrb.mxu2 %v1004_v58  ;;  %1824 = vmatpush.msrb.mxu3 %v1260_v59  ;;  %v700_v9 = vld [vmem:[#allocation6 + $0x918] sm:$0xff]  ;;  %v845_v37 = vld [vmem:[#allocation6 + $0xda0] sm:$0xff] }
  0xda   : > { %1756 = vmatpush.msrb.mxu0 %v476_v60  ;;  %1779 = vmatpush.msrb.mxu1 %v732_v61  ;;  %v956_v10 = vld [vmem:[#allocation6 + $0x1118] sm:$0xff]  ;;  %v1101_v38 = vld [vmem:[#allocation6 + $0x15a0] sm:$0xff] }
  0xdb   : > { %1802 = vmatpush.msrb.mxu2 %v988_v62  ;;  %1825 = vmatpush.msrb.mxu3 %v1244_v63  ;;  %v1212_v11 = vld [vmem:[#allocation6 + $0x1918] sm:$0xff]  ;;  %v1357_v39 = vld [vmem:[#allocation6 + $0x1da0] sm:$0xff] }
  0xdc   : > { %1580 = vmatmul.f32.gmra.mxu0 %v5014_v52  ;;  %1603 = vmatmul.f32.gmra.mxu1 %v5016_v53  ;;  %v428_v12 = vld [vmem:[#allocation6 + $0x98] sm:$0xff]  ;;  %v573_v40 = vld [vmem:[#allocation6 + $0x520] sm:$0xff] }
  0xdd   : > { %1626 = vmatmul.f32.gmra.mxu2 %v5018_v54  ;;  %1649 = vmatmul.f32.gmra.mxu3 %v5020_v55  ;;  %v684_v13 = vld [vmem:[#allocation6 + $0x898] sm:$0xff]  ;;  %v829_v41 = vld [vmem:[#allocation6 + $0xd20] sm:$0xff] }
  0xde   : > { %1757 = vmatpush.msrb.mxu0 %v460_v4  ;;  %1780 = vmatpush.msrb.mxu1 %v716_v5  ;;  %v940_v14 = vld [vmem:[#allocation6 + $0x1098] sm:$0xff]  ;;  %v1085_v42 = vld [vmem:[#allocation6 + $0x1520] sm:$0xff] }
  0xdf   : > { %1803 = vmatpush.msrb.mxu2 %v972_v6  ;;  %1826 = vmatpush.msrb.mxu3 %v1228_v7  ;;  %v1196_v15 = vld [vmem:[#allocation6 + $0x1898] sm:$0xff]  ;;  %v1341_v43 = vld [vmem:[#allocation6 + $0x1d20] sm:$0xff] }
  0xe0   : > { %1758 = vmatpush.msrb.mxu0 %v444_v8  ;;  %1781 = vmatpush.msrb.mxu1 %v700_v9  ;;  %v412_v16 = vld [vmem:[#allocation6 + $0x18] sm:$0xff]  ;;  %v557_v44 = vld [vmem:[#allocation6 + $0x4a0] sm:$0xff] }
  0xe1   : > { %1804 = vmatpush.msrb.mxu2 %v956_v10  ;;  %1827 = vmatpush.msrb.mxu3 %v1212_v11  ;;  %v668_v17 = vld [vmem:[#allocation6 + $0x818] sm:$0xff]  ;;  %v813_v45 = vld [vmem:[#allocation6 + $0xca0] sm:$0xff] }
  0xe2   : > { %1759 = vmatpush.msrb.mxu0 %v428_v12  ;;  %1782 = vmatpush.msrb.mxu1 %v684_v13  ;;  %v924_v18 = vld [vmem:[#allocation6 + $0x1018] sm:$0xff]  ;;  %v1069_v46 = vld [vmem:[#allocation6 + $0x14a0] sm:$0xff] }
  0xe3   : > { %v1180_v19 = vld [vmem:[#allocation6 + $0x1818] sm:$0xff]  ;;  %1805 = vmatpush.msrb.mxu2 %v940_v14  ;;  %1828 = vmatpush.msrb.mxu3 %v1196_v15  ;;  %v1325_v47 = vld [vmem:[#allocation6 + $0x1ca0] sm:$0xff] }
  0xe4   : > { %1760 = vmatpush.msrb.mxu0 %v412_v16  ;;  %1783 = vmatpush.msrb.mxu1 %v668_v17  ;;  %v541_v48 = vld [vmem:[#allocation6 + $0x420] sm:$0xff] }
  0xe5   : > { %1806 = vmatpush.msrb.mxu2 %v924_v18  ;;  %1829 = vmatpush.msrb.mxu3 %v1180_v19  ;;  %v797_v49 = vld [vmem:[#allocation6 + $0xc20] sm:$0xff] }
  0xe6   : > { %1669 = vmatmul.f32.vlgmr.msra.gmra.mxu0 %v5002_v0  ;;  %1692 = vmatmul.f32.vlgmr.msra.gmra.mxu1 %v5004_v1  ;;  %v1053_v50 = vld [vmem:[#allocation6 + $0x1420] sm:$0xff] }
  0xe7   : > { %1715 = vmatmul.f32.vlgmr.msra.gmra.mxu2 %v5006_v2  ;;  %1738 = vmatmul.f32.vlgmr.msra.gmra.mxu3 %v5008_v3  ;;  %v1309_v51 = vld [vmem:[#allocation6 + $0x1c20] sm:$0xff] }
  0xe8   : > { %1837 = vmatpush.msra.mxu0 %v653_v20  ;;  %1860 = vmatpush.msra.mxu1 %v909_v21  ;;  %v525_v56 = vld [vmem:[#allocation6 + $0x3a0] sm:$0xff] }
  0xe9   : > { %1883 = vmatpush.msra.mxu2 %v1165_v22  ;;  %1906 = vmatpush.msra.mxu3 %v1421_v23  ;;  %v781_v57 = vld [vmem:[#allocation6 + $0xba0] sm:$0xff] }
  0xea   : > { %1838 = vmatpush.msra.mxu0 %v637_v24  ;;  %1861 = vmatpush.msra.mxu1 %v893_v25  ;;  %v1037_v58 = vld [vmem:[#allocation6 + $0x13a0] sm:$0xff] }
  0xeb   : > { %1884 = vmatpush.msra.mxu2 %v1149_v26  ;;  %1907 = vmatpush.msra.mxu3 %v1405_v27  ;;  %v1293_v59 = vld [vmem:[#allocation6 + $0x1ba0] sm:$0xff] }
  0xec   : > { %1839 = vmatpush.msra.mxu0 %v621_v28  ;;  %1862 = vmatpush.msra.mxu1 %v877_v29  ;;  %v509_v60 = vld [vmem:[#allocation6 + $0x320] sm:$0xff]  ;;  %v654_v28 = vld [vmem:[#allocation6 + $0x7a8] sm:$0xff] }
  0xed   : > { %1885 = vmatpush.msra.mxu2 %v1133_v30  ;;  %1908 = vmatpush.msra.mxu3 %v1389_v31  ;;  %v765_v61 = vld [vmem:[#allocation6 + $0xb20] sm:$0xff]  ;;  %v910_v29 = vld [vmem:[#allocation6 + $0xfa8] sm:$0xff] }
  0xee   : > { %1840 = vmatpush.msra.mxu0 %v605_v32  ;;  %1863 = vmatpush.msra.mxu1 %v861_v33  ;;  %v1021_v62 = vld [vmem:[#allocation6 + $0x1320] sm:$0xff]  ;;  %v1166_v30 = vld [vmem:[#allocation6 + $0x17a8] sm:$0xff] }
  0xef   : > { %1886 = vmatpush.msra.mxu2 %v1117_v34  ;;  %1909 = vmatpush.msra.mxu3 %v1373_v35  ;;  %v1277_v63 = vld [vmem:[#allocation6 + $0x1b20] sm:$0xff]  ;;  %v1422_v31 = vld [vmem:[#allocation6 + $0x1fa8] sm:$0xff] }
  0xf0   : > { %1841 = vmatpush.msra.mxu0 %v589_v36  ;;  %1864 = vmatpush.msra.mxu1 %v845_v37  ;;  %v493_v4 = vld [vmem:[#allocation6 + $0x2a0] sm:$0xff]  ;;  %v638_v32 = vld [vmem:[#allocation6 + $0x728] sm:$0xff] }
  0xf1   : > { %1887 = vmatpush.msra.mxu2 %v1101_v38  ;;  %1910 = vmatpush.msra.mxu3 %v1357_v39  ;;  %v749_v5 = vld [vmem:[#allocation6 + $0xaa0] sm:$0xff]  ;;  %v894_v33 = vld [vmem:[#allocation6 + $0xf28] sm:$0xff] }
  0xf2   : > { %1842 = vmatpush.msra.mxu0 %v573_v40  ;;  %1865 = vmatpush.msra.mxu1 %v829_v41  ;;  %v1005_v6 = vld [vmem:[#allocation6 + $0x12a0] sm:$0xff]  ;;  %v1150_v34 = vld [vmem:[#allocation6 + $0x1728] sm:$0xff] }
  0xf3   : > { %1888 = vmatpush.msra.mxu2 %v1085_v42  ;;  %1911 = vmatpush.msra.mxu3 %v1341_v43  ;;  %v1261_v7 = vld [vmem:[#allocation6 + $0x1aa0] sm:$0xff]  ;;  %v1406_v35 = vld [vmem:[#allocation6 + $0x1f28] sm:$0xff] }
  0xf4   : > { %1843 = vmatpush.msra.mxu0 %v557_v44  ;;  %1866 = vmatpush.msra.mxu1 %v813_v45  ;;  %v477_v8 = vld [vmem:[#allocation6 + $0x220] sm:$0xff]  ;;  %v622_v36 = vld [vmem:[#allocation6 + $0x6a8] sm:$0xff] }
  0xf5   : > { %1889 = vmatpush.msra.mxu2 %v1069_v46  ;;  %1912 = vmatpush.msra.mxu3 %v1325_v47  ;;  %v733_v9 = vld [vmem:[#allocation6 + $0xa20] sm:$0xff]  ;;  %v878_v37 = vld [vmem:[#allocation6 + $0xea8] sm:$0xff] }
  0xf6   : > { %1844 = vmatpush.msra.mxu0 %v541_v48  ;;  %1867 = vmatpush.msra.mxu1 %v797_v49  ;;  %v989_v10 = vld [vmem:[#allocation6 + $0x1220] sm:$0xff]  ;;  %v606_v38 = vld [vmem:[#allocation6 + $0x628] sm:$0xff] }
  0xf7   : > { %1890 = vmatpush.msra.mxu2 %v1053_v50  ;;  %1913 = vmatpush.msra.mxu3 %v1309_v51  ;;  %v1245_v11 = vld [vmem:[#allocation6 + $0x1a20] sm:$0xff]  ;;  %v1374_v39 = vld [vmem:[#allocation6 + $0x1e28] sm:$0xff] }
  0xf8   : > { %1845 = vmatpush.msra.mxu0 %v525_v56  ;;  %1868 = vmatpush.msra.mxu1 %v781_v57  ;;  %v461_v12 = vld [vmem:[#allocation6 + $0x1a0] sm:$0xff]  ;;  %v590_v40 = vld [vmem:[#allocation6 + $0x5a8] sm:$0xff] }
  0xf9   : > { %1891 = vmatpush.msra.mxu2 %v1037_v58  ;;  %1914 = vmatpush.msra.mxu3 %v1293_v59  ;;  %v717_v13 = vld [vmem:[#allocation6 + $0x9a0] sm:$0xff]  ;;  %v846_v41 = vld [vmem:[#allocation6 + $0xda8] sm:$0xff] }
  0xfa   : > { %1846 = vmatpush.msra.mxu0 %v509_v60  ;;  %1869 = vmatpush.msra.mxu1 %v765_v61  ;;  %v973_v14 = vld [vmem:[#allocation6 + $0x11a0] sm:$0xff]  ;;  %v1102_v42 = vld [vmem:[#allocation6 + $0x15a8] sm:$0xff] }
  0xfb   : > { %1892 = vmatpush.msra.mxu2 %v1021_v62  ;;  %1915 = vmatpush.msra.mxu3 %v1277_v63  ;;  %v1229_v15 = vld [vmem:[#allocation6 + $0x19a0] sm:$0xff]  ;;  %v1358_v43 = vld [vmem:[#allocation6 + $0x1da8] sm:$0xff] }
  0xfc   : > { %1847 = vmatpush.msra.mxu0 %v493_v4  ;;  %1870 = vmatpush.msra.mxu1 %v749_v5  ;;  %v445_v16 = vld [vmem:[#allocation6 + $0x120] sm:$0xff]  ;;  %v574_v44 = vld [vmem:[#allocation6 + $0x528] sm:$0xff] }
  0xfd   : > { %1893 = vmatpush.msra.mxu2 %v1005_v6  ;;  %1916 = vmatpush.msra.mxu3 %v1261_v7  ;;  %v701_v17 = vld [vmem:[#allocation6 + $0x920] sm:$0xff]  ;;  %v830_v45 = vld [vmem:[#allocation6 + $0xd28] sm:$0xff] }
  0xfe   : > { %1848 = vmatpush.msra.mxu0 %v477_v8  ;;  %1871 = vmatpush.msra.mxu1 %v733_v9  ;;  %v957_v18 = vld [vmem:[#allocation6 + $0x1120] sm:$0xff]  ;;  %v1086_v46 = vld [vmem:[#allocation6 + $0x1528] sm:$0xff] }
  0xff   : > { %1894 = vmatpush.msra.mxu2 %v989_v10  ;;  %1917 = vmatpush.msra.mxu3 %v1245_v11  ;;  %v1213_v19 = vld [vmem:[#allocation6 + $0x1920] sm:$0xff]  ;;  %v1342_v47 = vld [vmem:[#allocation6 + $0x1d28] sm:$0xff] }
 0x100   : > { %1672 = vmatmul.f32.gmra.mxu0 %v5014_v52  ;;  %1695 = vmatmul.f32.gmra.mxu1 %v5016_v53  ;;  %v429_v20 = vld [vmem:[#allocation6 + $0xa0] sm:$0xff]  ;;  %v558_v48 = vld [vmem:[#allocation6 + $0x4a8] sm:$0xff] }
 0x101   : > { %1718 = vmatmul.f32.gmra.mxu2 %v5018_v54  ;;  %1741 = vmatmul.f32.gmra.mxu3 %v5020_v55  ;;  %v685_v21 = vld [vmem:[#allocation6 + $0x8a0] sm:$0xff]  ;;  %v814_v49 = vld [vmem:[#allocation6 + $0xca8] sm:$0xff] }
 0x102   : > { %1849 = vmatpush.msra.mxu0 %v461_v12  ;;  %1872 = vmatpush.msra.mxu1 %v717_v13  ;;  %v941_v22 = vld [vmem:[#allocation6 + $0x10a0] sm:$0xff]  ;;  %v1070_v50 = vld [vmem:[#allocation6 + $0x14a8] sm:$0xff] }
 0x103   : > { %1895 = vmatpush.msra.mxu2 %v973_v14  ;;  %1918 = vmatpush.msra.mxu3 %v1229_v15  ;;  %v1197_v23 = vld [vmem:[#allocation6 + $0x18a0] sm:$0xff]  ;;  %v1326_v51 = vld [vmem:[#allocation6 + $0x1ca8] sm:$0xff] }
 0x104   : > { %1850 = vmatpush.msra.mxu0 %v445_v16  ;;  %1873 = vmatpush.msra.mxu1 %v701_v17  ;;  %v413_v24 = vld [vmem:[#allocation6 + $0x20] sm:$0xff]  ;;  %v542_v56 = vld [vmem:[#allocation6 + $0x428] sm:$0xff] }
 0x105   : > { %1896 = vmatpush.msra.mxu2 %v957_v18  ;;  %1919 = vmatpush.msra.mxu3 %v1213_v19  ;;  %v669_v25 = vld [vmem:[#allocation6 + $0x820] sm:$0xff]  ;;  %v798_v57 = vld [vmem:[#allocation6 + $0xc28] sm:$0xff] }
 0x106   : > { %1851 = vmatpush.msra.mxu0 %v429_v20  ;;  %1874 = vmatpush.msra.mxu1 %v685_v21  ;;  %v925_v26 = vld [vmem:[#allocation6 + $0x1020] sm:$0xff]  ;;  %v1054_v58 = vld [vmem:[#allocation6 + $0x1428] sm:$0xff] }
 0x107   : > { %v1181_v27 = vld [vmem:[#allocation6 + $0x1820] sm:$0xff]  ;;  %1897 = vmatpush.msra.mxu2 %v941_v22  ;;  %1920 = vmatpush.msra.mxu3 %v1197_v23  ;;  %v1310_v59 = vld [vmem:[#allocation6 + $0x1c28] sm:$0xff] }
 0x108   : > { %1852 = vmatpush.msra.mxu0 %v413_v24  ;;  %1875 = vmatpush.msra.mxu1 %v669_v25  ;;  %v526_v60 = vld [vmem:[#allocation6 + $0x3a8] sm:$0xff] }
 0x109   : > { %1898 = vmatpush.msra.mxu2 %v925_v26  ;;  %1921 = vmatpush.msra.mxu3 %v1181_v27  ;;  %v782_v61 = vld [vmem:[#allocation6 + $0xba8] sm:$0xff] }
 0x10a   : > { %1761 = vmatmul.f32.vlgmr.msrb.gmra.mxu0 %v5002_v0  ;;  %1784 = vmatmul.f32.vlgmr.msrb.gmra.mxu1 %v5004_v1  ;;  %v1134_v0 = vld [vmem:[#allocation6 + $0x16a8] sm:$0xff] }
 0x10b   : > { %1807 = vmatmul.f32.vlgmr.msrb.gmra.mxu2 %v5006_v2  ;;  %1830 = vmatmul.f32.vlgmr.msrb.gmra.mxu3 %v5008_v3  ;;  %v1390_v1 = vld [vmem:[#allocation6 + $0x1ea8] sm:$0xff] }
 0x10c   : > { %1929 = vmatpush.msrb.mxu0 %v654_v28  ;;  %1952 = vmatpush.msrb.mxu1 %v910_v29  ;;  %v862_v2 = vld [vmem:[#allocation6 + $0xe28] sm:$0xff]  ;;  %v655_v28 = vld [vmem:[#allocation6 + $0x7b0] sm:$0xff] }
 0x10d   : > { %1975 = vmatpush.msrb.mxu2 %v1166_v30  ;;  %1998 = vmatpush.msrb.mxu3 %v1422_v31  ;;  %v1118_v3 = vld [vmem:[#allocation6 + $0x1628] sm:$0xff]  ;;  %v911_v29 = vld [vmem:[#allocation6 + $0xfb0] sm:$0xff]  ;;  %v5050_v30 = vld [vmem:[#allocation3] sm:$0xff] }
 0x10e   : > { %1930 = vmatpush.msrb.mxu0 %v638_v32  ;;  %1953 = vmatpush.msrb.mxu1 %v894_v33  ;;  %v1038_v62 = vld [vmem:[#allocation6 + $0x13a8] sm:$0xff]  ;;  %v1167_v32 = vld [vmem:[#allocation6 + $0x17b0] sm:$0xff] }
 0x10f   : > { %1976 = vmatpush.msrb.mxu2 %v1150_v34  ;;  %1999 = vmatpush.msrb.mxu3 %v1406_v35  ;;  %v1294_v63 = vld [vmem:[#allocation6 + $0x1ba8] sm:$0xff]  ;;  %v1423_v33 = vld [vmem:[#allocation6 + $0x1fb0] sm:$0xff]  ;;  %v5059_v35 = vld [vmem:[#allocation3 + $0x18] sm:$0xff] }
 0x110   : > { %1931 = vmatpush.msrb.mxu0 %v622_v36  ;;  %1954 = vmatpush.msrb.mxu1 %v878_v37  ;;  %v510_v4 = vld [vmem:[#allocation6 + $0x328] sm:$0xff]  ;;  %v5056_v34 = vld [vmem:[#allocation3 + $0x10] sm:$0xff] }
 0x111   : > { %1977 = vmatpush.msrb.mxu2 %v1134_v0  ;;  %2000 = vmatpush.msrb.mxu3 %v1390_v1  ;;  %v766_v5 = vld [vmem:[#allocation6 + $0xb28] sm:$0xff]  ;;  %v639_v36 = vld [vmem:[#allocation6 + $0x730] sm:$0xff] }
 0x112   : > { %1932 = vmatpush.msrb.mxu0 %v606_v38  ;;  %1955 = vmatpush.msrb.mxu1 %v862_v2  ;;  %v1022_v6 = vld [vmem:[#allocation6 + $0x1328] sm:$0xff]  ;;  %v895_v37 = vld [vmem:[#allocation6 + $0xf30] sm:$0xff] }
 0x113   : > { %1978 = vmatpush.msrb.mxu2 %v1118_v3  ;;  %2001 = vmatpush.msrb.mxu3 %v1374_v39  ;;  %v1278_v7 = vld [vmem:[#allocation6 + $0x1b28] sm:$0xff]  ;;  %v1151_v0 = vld [vmem:[#allocation6 + $0x1730] sm:$0xff] }
 0x114   : > { %1933 = vmatpush.msrb.mxu0 %v590_v40  ;;  %1956 = vmatpush.msrb.mxu1 %v846_v41  ;;  %v494_v8 = vld [vmem:[#allocation6 + $0x2a8] sm:$0xff]  ;;  %v1407_v1 = vld [vmem:[#allocation6 + $0x1f30] sm:$0xff] }
 0x115   : > { %1979 = vmatpush.msrb.mxu2 %v1102_v42  ;;  %2002 = vmatpush.msrb.mxu3 %v1358_v43  ;;  %v750_v9 = vld [vmem:[#allocation6 + $0xaa8] sm:$0xff]  ;;  %v623_v38 = vld [vmem:[#allocation6 + $0x6b0] sm:$0xff] }
 0x116   : > { %1934 = vmatpush.msrb.mxu0 %v574_v44  ;;  %1957 = vmatpush.msrb.mxu1 %v830_v45  ;;  %v1006_v10 = vld [vmem:[#allocation6 + $0x12a8] sm:$0xff]  ;;  %v879_v2 = vld [vmem:[#allocation6 + $0xeb0] sm:$0xff] }
 0x117   : > { %1980 = vmatpush.msrb.mxu2 %v1086_v46  ;;  %2003 = vmatpush.msrb.mxu3 %v1342_v47  ;;  %v1262_v11 = vld [vmem:[#allocation6 + $0x1aa8] sm:$0xff]  ;;  %v1135_v3 = vld [vmem:[#allocation6 + $0x16b0] sm:$0xff] }
 0x118   : > { %1935 = vmatpush.msrb.mxu0 %v558_v48  ;;  %1958 = vmatpush.msrb.mxu1 %v814_v49  ;;  %v478_v12 = vld [vmem:[#allocation6 + $0x228] sm:$0xff]  ;;  %v1391_v39 = vld [vmem:[#allocation6 + $0x1eb0] sm:$0xff] }
 0x119   : > { %1981 = vmatpush.msrb.mxu2 %v1070_v50  ;;  %2004 = vmatpush.msrb.mxu3 %v1326_v51  ;;  %v734_v13 = vld [vmem:[#allocation6 + $0xa28] sm:$0xff]  ;;  %v607_v40 = vld [vmem:[#allocation6 + $0x630] sm:$0xff] }
 0x11a   : > { %1936 = vmatpush.msrb.mxu0 %v542_v56  ;;  %1959 = vmatpush.msrb.mxu1 %v798_v57  ;;  %v990_v14 = vld [vmem:[#allocation6 + $0x1228] sm:$0xff]  ;;  %v863_v41 = vld [vmem:[#allocation6 + $0xe30] sm:$0xff] }
 0x11b   : > { %1982 = vmatpush.msrb.mxu2 %v1054_v58  ;;  %2005 = vmatpush.msrb.mxu3 %v1310_v59  ;;  %v1246_v15 = vld [vmem:[#allocation6 + $0x1a28] sm:$0xff]  ;;  %v1119_v42 = vld [vmem:[#allocation6 + $0x1630] sm:$0xff] }
 0x11c   : > { %1937 = vmatpush.msrb.mxu0 %v526_v60  ;;  %1960 = vmatpush.msrb.mxu1 %v782_v61  ;;  %v462_v16 = vld [vmem:[#allocation6 + $0x1a8] sm:$0xff]  ;;  %v1375_v43 = vld [vmem:[#allocation6 + $0x1e30] sm:$0xff] }
 0x11d   : > { %1983 = vmatpush.msrb.mxu2 %v1038_v62  ;;  %2006 = vmatpush.msrb.mxu3 %v1294_v63  ;;  %v718_v17 = vld [vmem:[#allocation6 + $0x9a8] sm:$0xff]  ;;  %v591_v44 = vld [vmem:[#allocation6 + $0x5b0] sm:$0xff] }
 0x11e   : > { %1938 = vmatpush.msrb.mxu0 %v510_v4  ;;  %1961 = vmatpush.msrb.mxu1 %v766_v5  ;;  %v974_v18 = vld [vmem:[#allocation6 + $0x11a8] sm:$0xff]  ;;  %v847_v45 = vld [vmem:[#allocation6 + $0xdb0] sm:$0xff] }
 0x11f   : > { %1984 = vmatpush.msrb.mxu2 %v1022_v6  ;;  %2007 = vmatpush.msrb.mxu3 %v1278_v7  ;;  %v1230_v19 = vld [vmem:[#allocation6 + $0x19a8] sm:$0xff]  ;;  %v1103_v46 = vld [vmem:[#allocation6 + $0x15b0] sm:$0xff] }
 0x120   : > { %1939 = vmatpush.msrb.mxu0 %v494_v8  ;;  %1962 = vmatpush.msrb.mxu1 %v750_v9  ;;  %v446_v20 = vld [vmem:[#allocation6 + $0x128] sm:$0xff]  ;;  %v1359_v47 = vld [vmem:[#allocation6 + $0x1db0] sm:$0xff] }
 0x121   : > { %1985 = vmatpush.msrb.mxu2 %v1006_v10  ;;  %2008 = vmatpush.msrb.mxu3 %v1262_v11  ;;  %v702_v21 = vld [vmem:[#allocation6 + $0x928] sm:$0xff]  ;;  %v575_v48 = vld [vmem:[#allocation6 + $0x530] sm:$0xff] }
 0x122   : > { %1940 = vmatpush.msrb.mxu0 %v478_v12  ;;  %1963 = vmatpush.msrb.mxu1 %v734_v13  ;;  %v958_v22 = vld [vmem:[#allocation6 + $0x1128] sm:$0xff]  ;;  %v831_v49 = vld [vmem:[#allocation6 + $0xd30] sm:$0xff] }
 0x123   : > { %1986 = vmatpush.msrb.mxu2 %v990_v14  ;;  %2009 = vmatpush.msrb.mxu3 %v1246_v15  ;;  %v1214_v23 = vld [vmem:[#allocation6 + $0x1928] sm:$0xff]  ;;  %v1087_v50 = vld [vmem:[#allocation6 + $0x1530] sm:$0xff] }
 0x124   : > { %1764 = vmatmul.f32.gmra.mxu0 %v5014_v52  ;;  %1787 = vmatmul.f32.gmra.mxu1 %v5016_v53  ;;  %v430_v24 = vld [vmem:[#allocation6 + $0xa8] sm:$0xff]  ;;  %v1343_v51 = vld [vmem:[#allocation6 + $0x1d30] sm:$0xff] }
 0x125   : > { %1810 = vmatmul.f32.gmra.mxu2 %v5018_v54  ;;  %1833 = vmatmul.f32.gmra.mxu3 %v5020_v55  ;;  %v686_v25 = vld [vmem:[#allocation6 + $0x8a8] sm:$0xff]  ;;  %v559_v56 = vld [vmem:[#allocation6 + $0x4b0] sm:$0xff] }
 0x126   : > { %1941 = vmatpush.msrb.mxu0 %v462_v16  ;;  %1964 = vmatpush.msrb.mxu1 %v718_v17  ;;  %v942_v52 = vld [vmem:[#allocation6 + $0x10a8] sm:$0xff]  ;;  %v815_v57 = vld [vmem:[#allocation6 + $0xcb0] sm:$0xff] }
 0x127   : > { %1987 = vmatpush.msrb.mxu2 %v974_v18  ;;  %2010 = vmatpush.msrb.mxu3 %v1230_v19  ;;  %v1198_v53 = vld [vmem:[#allocation6 + $0x18a8] sm:$0xff]  ;;  %v1071_v58 = vld [vmem:[#allocation6 + $0x14b0] sm:$0xff] }
 0x128   : > { %1942 = vmatpush.msrb.mxu0 %v446_v20  ;;  %1965 = vmatpush.msrb.mxu1 %v702_v21  ;;  %v414_v26 = vld [vmem:[#allocation6 + $0x28] sm:$0xff]  ;;  %v1327_v59 = vld [vmem:[#allocation6 + $0x1cb0] sm:$0xff] }
 0x129   : > { %1988 = vmatpush.msrb.mxu2 %v958_v22  ;;  %2011 = vmatpush.msrb.mxu3 %v1214_v23  ;;  %v670_v54 = vld [vmem:[#allocation6 + $0x828] sm:$0xff]  ;;  %v543_v60 = vld [vmem:[#allocation6 + $0x430] sm:$0xff]  ;;  %v5062_v22 = vld [vmem:[#allocation3 + $0x20] sm:$0xff] }
 0x12a   : > { %1943 = vmatpush.msrb.mxu0 %v430_v24  ;;  %1966 = vmatpush.msrb.mxu1 %v686_v25  ;;  %v926_v55 = vld [vmem:[#allocation6 + $0x1028] sm:$0xff]  ;;  %v799_v61 = vld [vmem:[#allocation6 + $0xc30] sm:$0xff] }
 0x12b   : > { %v1182_v27 = vld [vmem:[#allocation6 + $0x1828] sm:$0xff]  ;;  %1989 = vmatpush.msrb.mxu2 %v942_v52  ;;  %2012 = vmatpush.msrb.mxu3 %v1198_v53  ;;  %v1055_v62 = vld [vmem:[#allocation6 + $0x1430] sm:$0xff]  ;;  %v5071_v53 = vld [vmem:[#allocation3 + $0x38] sm:$0xff] }
 0x12c   : > { %1944 = vmatpush.msrb.mxu0 %v414_v26  ;;  %1967 = vmatpush.msrb.mxu1 %v670_v54  ;;  %v5053_v31 = vld [vmem:[#allocation3 + $0x8] sm:$0xff]  ;;  %v1311_v63 = vld [vmem:[#allocation6 + $0x1c30] sm:$0xff] }
 0x12d   : > { %1990 = vmatpush.msrb.mxu2 %v926_v55  ;;  %2013 = vmatpush.msrb.mxu3 %v1182_v27  ;;  %v527_v4 = vld [vmem:[#allocation6 + $0x3b0] sm:$0xff]  ;;  %v5065_v23 = vld [vmem:[#allocation3 + $0x28] sm:$0xff] }
 0x12e   : > { %1853 = vmatmul.f32.vlgmr.msra.gmra.mxu0 %v5050_v30  ;;  %1876 = vmatmul.f32.vlgmr.msra.gmra.mxu1 %v5053_v31  ;;  %v783_v5 = vld [vmem:[#allocation6 + $0xbb0] sm:$0xff] }
 0x12f   : > { %1899 = vmatmul.f32.vlgmr.msra.gmra.mxu2 %v5056_v34  ;;  %1922 = vmatmul.f32.vlgmr.msra.gmra.mxu3 %v5059_v35  ;;  %v1039_v6 = vld [vmem:[#allocation6 + $0x13b0] sm:$0xff] }
 0x130   : > { %2021 = vmatpush.msra.mxu0 %v655_v28  ;;  %2044 = vmatpush.msra.mxu1 %v911_v29  ;;  %v1295_v7 = vld [vmem:[#allocation6 + $0x1bb0] sm:$0xff] }
 0x131   : > { %2067 = vmatpush.msra.mxu2 %v1167_v32  ;;  %2090 = vmatpush.msra.mxu3 %v1423_v33  ;;  %v511_v8 = vld [vmem:[#allocation6 + $0x330] sm:$0xff] }
 0x132   : > { %2022 = vmatpush.msra.mxu0 %v639_v36  ;;  %2045 = vmatpush.msra.mxu1 %v895_v37  ;;  %v767_v9 = vld [vmem:[#allocation6 + $0xb30] sm:$0xff] }
 0x133   : > { %2068 = vmatpush.msra.mxu2 %v1151_v0  ;;  %2091 = vmatpush.msra.mxu3 %v1407_v1  ;;  %v1023_v10 = vld [vmem:[#allocation6 + $0x1330] sm:$0xff] }
 0x134   : > { %2023 = vmatpush.msra.mxu0 %v623_v38  ;;  %2046 = vmatpush.msra.mxu1 %v879_v2  ;;  %v1279_v11 = vld [vmem:[#allocation6 + $0x1b30] sm:$0xff]  ;;  %v5074_v38 = vpop.f32.mrf.mxu0  ;;  %v5076_v2 = vpop.f32.mrf.mxu1 }
 0x135   : > { %2069 = vmatpush.msra.mxu2 %v1135_v3  ;;  %2092 = vmatpush.msra.mxu3 %v1391_v39  ;;  %v495_v12 = vld [vmem:[#allocation6 + $0x2b0] sm:$0xff]  ;;  %v656_v3 = vld [vmem:[#allocation6 + $0x7b8] sm:$0xff] }
 0x136   : > { %2024 = vmatpush.msra.mxu0 %v607_v40  ;;  %2047 = vmatpush.msra.mxu1 %v863_v41  ;;  %v751_v13 = vld [vmem:[#allocation6 + $0xab0] sm:$0xff]  ;;  %v912_v39 = vld [vmem:[#allocation6 + $0xfb8] sm:$0xff] }
 0x137   : > { %2070 = vmatpush.msra.mxu2 %v1119_v42  ;;  %2093 = vmatpush.msra.mxu3 %v1375_v43  ;;  %v1007_v14 = vld [vmem:[#allocation6 + $0x12b0] sm:$0xff]  ;;  %v1168_v40 = vld [vmem:[#allocation6 + $0x17b8] sm:$0xff] }
 0x138   : > { %2025 = vmatpush.msra.mxu0 %v591_v44  ;;  %2048 = vmatpush.msra.mxu1 %v847_v45  ;;  %v1263_v15 = vld [vmem:[#allocation6 + $0x1ab0] sm:$0xff]  ;;  %v1424_v41 = vld [vmem:[#allocation6 + $0x1fb8] sm:$0xff] }
 0x139   : > { %2071 = vmatpush.msra.mxu2 %v1103_v46  ;;  %2094 = vmatpush.msra.mxu3 %v1359_v47  ;;  %v479_v16 = vld [vmem:[#allocation6 + $0x230] sm:$0xff]  ;;  %v640_v42 = vld [vmem:[#allocation6 + $0x738] sm:$0xff] }
 0x13a   : > { %2026 = vmatpush.msra.mxu0 %v575_v48  ;;  %2049 = vmatpush.msra.mxu1 %v831_v49  ;;  %v735_v17 = vld [vmem:[#allocation6 + $0xa30] sm:$0xff]  ;;  %v896_v43 = vld [vmem:[#allocation6 + $0xf38] sm:$0xff] }
 0x13b   : > { %2072 = vmatpush.msra.mxu2 %v1087_v50  ;;  %2095 = vmatpush.msra.mxu3 %v1343_v51  ;;  %v991_v18 = vld [vmem:[#allocation6 + $0x1230] sm:$0xff]  ;;  %v1152_v44 = vld [vmem:[#allocation6 + $0x1738] sm:$0xff] }
 0x13c   : > { %2027 = vmatpush.msra.mxu0 %v559_v56  ;;  %2050 = vmatpush.msra.mxu1 %v815_v57  ;;  %v1247_v19 = vld [vmem:[#allocation6 + $0x1a30] sm:$0xff]  ;;  %v1408_v45 = vld [vmem:[#allocation6 + $0x1f38] sm:$0xff]  ;;  %v5082_v56 = vpop.f32.mrf.mxu2  ;;  %v5084_v57 = vpop.f32.mrf.mxu3 }
 0x13d   : > { %2073 = vmatpush.msra.mxu2 %v1071_v58  ;;  %2096 = vmatpush.msra.mxu3 %v1327_v59  ;;  %v463_v20 = vld [vmem:[#allocation6 + $0x1b0] sm:$0xff]  ;;  %v624_v46 = vld [vmem:[#allocation6 + $0x6b8] sm:$0xff] }
 0x13e   : > { %2028 = vmatpush.msra.mxu0 %v543_v60  ;;  %2051 = vmatpush.msra.mxu1 %v799_v61  ;;  %v719_v21 = vld [vmem:[#allocation6 + $0x9b0] sm:$0xff]  ;;  %v880_v47 = vld [vmem:[#allocation6 + $0xeb8] sm:$0xff]  ;;  %v5086_v60 = vpop.f32.mrf.mxu0  ;;  %v5088_v61 = vpop.f32.mrf.mxu1 }
 0x13f   : > { %2074 = vmatpush.msra.mxu2 %v1055_v62  ;;  %2097 = vmatpush.msra.mxu3 %v1311_v63  ;;  %v975_v24 = vld [vmem:[#allocation6 + $0x11b0] sm:$0xff]  ;;  %v1136_v48 = vld [vmem:[#allocation6 + $0x16b8] sm:$0xff] }
 0x140   : > { %2029 = vmatpush.msra.mxu0 %v527_v4  ;;  %2052 = vmatpush.msra.mxu1 %v783_v5  ;;  %v1231_v25 = vld [vmem:[#allocation6 + $0x19b0] sm:$0xff]  ;;  %v1392_v49 = vld [vmem:[#allocation6 + $0x1eb8] sm:$0xff] }
 0x141   : > { %2075 = vmatpush.msra.mxu2 %v1039_v6  ;;  %2098 = vmatpush.msra.mxu3 %v1295_v7  ;;  %v5068_v52 = vld [vmem:[#allocation3 + $0x30] sm:$0xff]  ;;  %v608_v50 = vld [vmem:[#allocation6 + $0x638] sm:$0xff] }
 0x142   : > { %2030 = vmatpush.msra.mxu0 %v511_v8  ;;  %2053 = vmatpush.msra.mxu1 %v767_v9  ;;  %v447_v26 = vld [vmem:[#allocation6 + $0x130] sm:$0xff]  ;;  %v864_v51 = vld [vmem:[#allocation6 + $0xe38] sm:$0xff] }
 0x143   : > { %2076 = vmatpush.msra.mxu2 %v1023_v10  ;;  %2099 = vmatpush.msra.mxu3 %v1279_v11  ;;  %v703_v54 = vld [vmem:[#allocation6 + $0x930] sm:$0xff]  ;;  %v1120_v58 = vld [vmem:[#allocation6 + $0x1638] sm:$0xff] }
 0x144   : > { %2031 = vmatpush.msra.mxu0 %v495_v12  ;;  %2054 = vmatpush.msra.mxu1 %v751_v13  ;;  %v959_v55 = vld [vmem:[#allocation6 + $0x1130] sm:$0xff]  ;;  %v1376_v59 = vld [vmem:[#allocation6 + $0x1e38] sm:$0xff] }
 0x145   : > { %2077 = vmatpush.msra.mxu2 %v1007_v14  ;;  %2100 = vmatpush.msra.mxu3 %v1263_v15  ;;  %v1215_v27 = vld [vmem:[#allocation6 + $0x1930] sm:$0xff]  ;;  %v592_v62 = vld [vmem:[#allocation6 + $0x5b8] sm:$0xff] }
 0x146   : > { %2032 = vmatpush.msra.mxu0 %v479_v16  ;;  %2055 = vmatpush.msra.mxu1 %v735_v17  ;;  %v431_v28 = vld [vmem:[#allocation6 + $0xb0] sm:$0xff]  ;;  %v848_v63 = vld [vmem:[#allocation6 + $0xdb8] sm:$0xff]  ;;  %v5090_v16 = vpop.f32.mrf.mxu2  ;;  %v5092_v17 = vpop.f32.mrf.mxu3 }
 0x147   : > { %2078 = vmatpush.msra.mxu2 %v991_v18  ;;  %2101 = vmatpush.msra.mxu3 %v1247_v19  ;;  %v687_v29 = vld [vmem:[#allocation6 + $0x8b0] sm:$0xff]  ;;  %v1104_v4 = vld [vmem:[#allocation6 + $0x15b8] sm:$0xff] }
 0x148   : > { %1856 = vmatmul.f32.gmra.mxu0 %v5062_v22  ;;  %1879 = vmatmul.f32.gmra.mxu1 %v5065_v23  ;;  %v943_v32 = vld [vmem:[#allocation6 + $0x10b0] sm:$0xff]  ;;  %v1360_v5 = vld [vmem:[#allocation6 + $0x1db8] sm:$0xff] }
 0x149   : > { %1902 = vmatmul.f32.gmra.mxu2 %v5068_v52  ;;  %1925 = vmatmul.f32.gmra.mxu3 %v5071_v53  ;;  %v1199_v33 = vld [vmem:[#allocation6 + $0x18b0] sm:$0xff]  ;;  %v576_v6 = vld [vmem:[#allocation6 + $0x538] sm:$0xff] }
 0x14a   : > { %2033 = vmatpush.msra.mxu0 %v463_v20  ;;  %2056 = vmatpush.msra.mxu1 %v719_v21  ;;  %v415_v36 = vld [vmem:[#allocation6 + $0x30] sm:$0xff]  ;;  %v832_v7 = vld [vmem:[#allocation6 + $0xd38] sm:$0xff] }
 0x14b   : > { %2079 = vmatpush.msra.mxu2 %v975_v24  ;;  %2102 = vmatpush.msra.mxu3 %v1231_v25  ;;  %v671_v37 = vld [vmem:[#allocation6 + $0x830] sm:$0xff]  ;;  %v1088_v8 = vld [vmem:[#allocation6 + $0x1538] sm:$0xff] }
 0x14c   : > { %2034 = vmatpush.msra.mxu0 %v447_v26  ;;  %2057 = vmatpush.msra.mxu1 %v703_v54  ;;  %v927_v0 = vld [vmem:[#allocation6 + $0x1030] sm:$0xff]  ;;  %v1344_v9 = vld [vmem:[#allocation6 + $0x1d38] sm:$0xff]  ;;  %v5094_v26 = vpop.f32.mrf.mxu0  ;;  %v5096_v54 = vpop.f32.mrf.mxu1 }
 0x14d   : > { %2080 = vmatpush.msra.mxu2 %v959_v55  ;;  %2103 = vmatpush.msra.mxu3 %v1215_v27  ;;  %v1183_v1 = vld [vmem:[#allocation6 + $0x1830] sm:$0xff]  ;;  %v560_v10 = vld [vmem:[#allocation6 + $0x4b8] sm:$0xff] }
 0x14e   : > { %2035 = vmatpush.msra.mxu0 %v431_v28  ;;  %2058 = vmatpush.msra.mxu1 %v687_v29  ;;  %v816_v11 = vld [vmem:[#allocation6 + $0xcb8] sm:$0xff] }
 0x14f   : > { %2081 = vmatpush.msra.mxu2 %v943_v32  ;;  %2104 = vmatpush.msra.mxu3 %v1199_v33  ;;  %v1072_v12 = vld [vmem:[#allocation6 + $0x14b8] sm:$0xff] }
 0x150   : > { %2036 = vmatpush.msra.mxu0 %v415_v36  ;;  %2059 = vmatpush.msra.mxu1 %v671_v37  ;;  %v1328_v13 = vld [vmem:[#allocation6 + $0x1cb8] sm:$0xff] }
 0x151   : > { %2082 = vmatpush.msra.mxu2 %v927_v0  ;;  %2105 = vmatpush.msra.mxu3 %v1183_v1  ;;  %v544_v14 = vld [vmem:[#allocation6 + $0x438] sm:$0xff] }
 0x152   : > { %1945 = vmatmul.f32.vlgmr.msrb.gmra.mxu0 %v5050_v30  ;;  %1968 = vmatmul.f32.vlgmr.msrb.gmra.mxu1 %v5053_v31  ;;  %v800_v15 = vld [vmem:[#allocation6 + $0xc38] sm:$0xff] }
 0x153   : > { %1991 = vmatmul.f32.vlgmr.msrb.gmra.mxu2 %v5056_v34  ;;  %2014 = vmatmul.f32.vlgmr.msrb.gmra.mxu3 %v5059_v35  ;;  %v1056_v18 = vld [vmem:[#allocation6 + $0x1438] sm:$0xff] }
 0x154   : > { %2113 = vmatpush.msrb.mxu0 %v656_v3  ;;  %2136 = vmatpush.msrb.mxu1 %v912_v39  ;;  %v1312_v19 = vld [vmem:[#allocation6 + $0x1c38] sm:$0xff] }
 0x155   : > { %2159 = vmatpush.msrb.mxu2 %v1168_v40  ;;  %2182 = vmatpush.msrb.mxu3 %v1424_v41  ;;  %v528_v20 = vld [vmem:[#allocation6 + $0x3b8] sm:$0xff]  ;;  %v5098_v40 = vpop.f32.mrf.mxu2  ;;  %v5100_v41 = vpop.f32.mrf.mxu3 }
 0x156   : > { %2114 = vmatpush.msrb.mxu0 %v640_v42  ;;  %2137 = vmatpush.msrb.mxu1 %v896_v43  ;;  %v784_v21 = vld [vmem:[#allocation6 + $0xbb8] sm:$0xff] }
 0x157   : > { %2160 = vmatpush.msrb.mxu2 %v1152_v44  ;;  %2183 = vmatpush.msrb.mxu3 %v1408_v45  ;;  %v1040_v24 = vld [vmem:[#allocation6 + $0x13b8] sm:$0xff] }
 0x158   : > { %2115 = vmatpush.msrb.mxu0 %v624_v46  ;;  %2138 = vmatpush.msrb.mxu1 %v880_v47  ;;  %v1296_v25 = vld [vmem:[#allocation6 + $0x1bb8] sm:$0xff] }
 0x159   : > { %2161 = vmatpush.msrb.mxu2 %v1136_v48  ;;  %2184 = vmatpush.msrb.mxu3 %v1392_v49  ;;  %v512_v55 = vld [vmem:[#allocation6 + $0x338] sm:$0xff]  ;;  %v5102_v44 = vpop.f32.mrf.mxu0  ;;  %v5104_v45 = vpop.f32.mrf.mxu1 }
 0x15a   : > { %2116 = vmatpush.msrb.mxu0 %v608_v50  ;;  %2139 = vmatpush.msrb.mxu1 %v864_v51  ;;  %v768_v27 = vld [vmem:[#allocation6 + $0xb38] sm:$0xff] }
 0x15b   : > { %2162 = vmatpush.msrb.mxu2 %v1120_v58  ;;  %2185 = vmatpush.msrb.mxu3 %v1376_v59  ;;  %v1024_v28 = vld [vmem:[#allocation6 + $0x1338] sm:$0xff] }
 0x15c   : > { %2117 = vmatpush.msrb.mxu0 %v592_v62  ;;  %2140 = vmatpush.msrb.mxu1 %v848_v63  ;;  %v1280_v29 = vld [vmem:[#allocation6 + $0x1b38] sm:$0xff] }
 0x15d   : > { %2163 = vmatpush.msrb.mxu2 %v1104_v4  ;;  %2186 = vmatpush.msrb.mxu3 %v1360_v5  ;;  %v496_v32 = vld [vmem:[#allocation6 + $0x2b8] sm:$0xff] }
 0x15e   : > { %2118 = vmatpush.msrb.mxu0 %v576_v6  ;;  %2141 = vmatpush.msrb.mxu1 %v832_v7  ;;  %v752_v33 = vld [vmem:[#allocation6 + $0xab8] sm:$0xff] }
 0x15f   : > { %2164 = vmatpush.msrb.mxu2 %v1088_v8  ;;  %2187 = vmatpush.msrb.mxu3 %v1344_v9  ;;  %v1008_v36 = vld [vmem:[#allocation6 + $0x12b8] sm:$0xff] }
 0x160   : > { %2119 = vmatpush.msrb.mxu0 %v560_v10  ;;  %2142 = vmatpush.msrb.mxu1 %v816_v11  ;;  %v1264_v37 = vld [vmem:[#allocation6 + $0x1ab8] sm:$0xff]  ;;  %v5110_v6 = vpop.f32.mrf.mxu2  ;;  %v5112_v9 = vpop.f32.mrf.mxu3  ;;  %v657_v10 = vld [vmem:[#allocation6 + $0x7c0] sm:$0xff] }
 0x161   : > { %2165 = vmatpush.msrb.mxu2 %v1072_v12  ;;  %2188 = vmatpush.msrb.mxu3 %v1328_v13  ;;  %v480_v0 = vld [vmem:[#allocation6 + $0x238] sm:$0xff]  ;;  %v913_v11 = vld [vmem:[#allocation6 + $0xfc0] sm:$0xff] }
 0x162   : > { %2120 = vmatpush.msrb.mxu0 %v544_v14  ;;  %2143 = vmatpush.msrb.mxu1 %v800_v15  ;;  %v736_v1 = vld [vmem:[#allocation6 + $0xa38] sm:$0xff]  ;;  %v1169_v14 = vld [vmem:[#allocation6 + $0x17c0] sm:$0xff] }
 0x163   : > { %2166 = vmatpush.msrb.mxu2 %v1056_v18  ;;  %2189 = vmatpush.msrb.mxu3 %v1312_v19  ;;  %v992_v3 = vld [vmem:[#allocation6 + $0x1238] sm:$0xff]  ;;  %v5114_v12 = vpop.f32.mrf.mxu0  ;;  %v5116_v13 = vpop.f32.mrf.mxu1  ;;  %v1425_v15 = vld [vmem:[#allocation6 + $0x1fc0] sm:$0xff] }
 0x164   : > { %2121 = vmatpush.msrb.mxu0 %v528_v20  ;;  %2144 = vmatpush.msrb.mxu1 %v784_v21  ;;  %v1248_v39 = vld [vmem:[#allocation6 + $0x1a38] sm:$0xff]  ;;  %v641_v18 = vld [vmem:[#allocation6 + $0x740] sm:$0xff] }
 0x165   : > { %2167 = vmatpush.msrb.mxu2 %v1040_v24  ;;  %2190 = vmatpush.msrb.mxu3 %v1296_v25  ;;  %v464_v42 = vld [vmem:[#allocation6 + $0x1b8] sm:$0xff]  ;;  %v897_v19 = vld [vmem:[#allocation6 + $0xf40] sm:$0xff] }
 0x166   : > { %2122 = vmatpush.msrb.mxu0 %v512_v55  ;;  %2145 = vmatpush.msrb.mxu1 %v768_v27  ;;  %v720_v43 = vld [vmem:[#allocation6 + $0x9b8] sm:$0xff]  ;;  %v1153_v20 = vld [vmem:[#allocation6 + $0x1740] sm:$0xff] }
 0x167   : > { %2168 = vmatpush.msrb.mxu2 %v1024_v28  ;;  %2191 = vmatpush.msrb.mxu3 %v1280_v29  ;;  %v976_v46 = vld [vmem:[#allocation6 + $0x11b8] sm:$0xff]  ;;  %v1409_v21 = vld [vmem:[#allocation6 + $0x1f40] sm:$0xff] }
 0x168   : > { %2123 = vmatpush.msrb.mxu0 %v496_v32  ;;  %2146 = vmatpush.msrb.mxu1 %v752_v33  ;;  %v1232_v47 = vld [vmem:[#allocation6 + $0x19b8] sm:$0xff]  ;;  %v625_v24 = vld [vmem:[#allocation6 + $0x6c0] sm:$0xff] }
 0x169   : > { %2169 = vmatpush.msrb.mxu2 %v1008_v36  ;;  %2192 = vmatpush.msrb.mxu3 %v1264_v37  ;;  %v448_v48 = vld [vmem:[#allocation6 + $0x138] sm:$0xff]  ;;  %v881_v25 = vld [vmem:[#allocation6 + $0xec0] sm:$0xff] }
 0x16a   : > { %2124 = vmatpush.msrb.mxu0 %v480_v0  ;;  %2147 = vmatpush.msrb.mxu1 %v736_v1  ;;  %v704_v49 = vld [vmem:[#allocation6 + $0x938] sm:$0xff]  ;;  %v1137_v55 = vld [vmem:[#allocation6 + $0x16c0] sm:$0xff]  ;;  %v5122_v36 = vpop.f32.mrf.mxu2  ;;  %v5124_v37 = vpop.f32.mrf.mxu3 }
 0x16b   : > { %2170 = vmatpush.msrb.mxu2 %v992_v3  ;;  %2193 = vmatpush.msrb.mxu3 %v1248_v39  ;;  %v960_v50 = vld [vmem:[#allocation6 + $0x1138] sm:$0xff]  ;;  %v1393_v27 = vld [vmem:[#allocation6 + $0x1ec0] sm:$0xff] }
 0x16c   : > { %1948 = vmatmul.f32.gmra.mxu0 %v5062_v22  ;;  %1971 = vmatmul.f32.gmra.mxu1 %v5065_v23  ;;  %v1216_v51 = vld [vmem:[#allocation6 + $0x1938] sm:$0xff]  ;;  %v609_v28 = vld [vmem:[#allocation6 + $0x640] sm:$0xff] }
 0x16d   : > { %1994 = vmatmul.f32.gmra.mxu2 %v5068_v52  ;;  %2017 = vmatmul.f32.gmra.mxu3 %v5071_v53  ;;  %v432_v58 = vld [vmem:[#allocation6 + $0xb8] sm:$0xff]  ;;  %v865_v29 = vld [vmem:[#allocation6 + $0xe40] sm:$0xff] }
 0x16e   : > { %2125 = vmatpush.msrb.mxu0 %v464_v42  ;;  %2148 = vmatpush.msrb.mxu1 %v720_v43  ;;  %v688_v59 = vld [vmem:[#allocation6 + $0x8b8] sm:$0xff]  ;;  %v1121_v32 = vld [vmem:[#allocation6 + $0x1640] sm:$0xff] }
 0x16f   : > { %2171 = vmatpush.msrb.mxu2 %v976_v46  ;;  %2194 = vmatpush.msrb.mxu3 %v1232_v47  ;;  %v944_v62 = vld [vmem:[#allocation6 + $0x10b8] sm:$0xff]  ;;  %v1377_v33 = vld [vmem:[#allocation6 + $0x1e40] sm:$0xff] }
 0x170   : > { %2126 = vmatpush.msrb.mxu0 %v448_v48  ;;  %2149 = vmatpush.msrb.mxu1 %v704_v49  ;;  %v1200_v63 = vld [vmem:[#allocation6 + $0x18b8] sm:$0xff]  ;;  %v593_v0 = vld [vmem:[#allocation6 + $0x5c0] sm:$0xff] }
 0x171   : > { %2172 = vmatpush.msrb.mxu2 %v960_v50  ;;  %2195 = vmatpush.msrb.mxu3 %v1216_v51  ;;  %v416_v4 = vld [vmem:[#allocation6 + $0x38] sm:$0xff]  ;;  %v849_v1 = vld [vmem:[#allocation6 + $0xdc0] sm:$0xff] }
 0x172   : > { %v672_v5 = vld [vmem:[#allocation6 + $0x838] sm:$0xff]  ;;  %2127 = vmatpush.msrb.mxu0 %v432_v58  ;;  %2150 = vmatpush.msrb.mxu1 %v688_v59  ;;  %v1105_v42 = vld [vmem:[#allocation6 + $0x15c0] sm:$0xff] }
 0x173   : > { %v928_v7 = vld [vmem:[#allocation6 + $0x1038] sm:$0xff]  ;;  %2173 = vmatpush.msrb.mxu2 %v944_v62  ;;  %2196 = vmatpush.msrb.mxu3 %v1200_v63  ;;  %v1361_v43 = vld [vmem:[#allocation6 + $0x1dc0] sm:$0xff] }
 0x174   : > { %v1184_v8 = vld [vmem:[#allocation6 + $0x1838] sm:$0xff]  ;;  %2128 = vmatpush.msrb.mxu0 %v416_v4  ;;  %2151 = vmatpush.msrb.mxu1 %v672_v5  ;;  %v577_v46 = vld [vmem:[#allocation6 + $0x540] sm:$0xff] }
 0x175   : > { %2174 = vmatpush.msrb.mxu2 %v928_v7  ;;  %2197 = vmatpush.msrb.mxu3 %v1184_v8  ;;  %v833_v47 = vld [vmem:[#allocation6 + $0xd40] sm:$0xff] }
 0x176   : > { %2037 = vmatmul.f32.vlgmr.msra.gmra.mxu0 %v5050_v30  ;;  %2060 = vmatmul.f32.vlgmr.msra.gmra.mxu1 %v5053_v31  ;;  %v1089_v48 = vld [vmem:[#allocation6 + $0x1540] sm:$0xff] }
 0x177   : > { %2083 = vmatmul.f32.vlgmr.msra.gmra.mxu2 %v5056_v34  ;;  %2106 = vmatmul.f32.vlgmr.msra.gmra.mxu3 %v5059_v35  ;;  %v1345_v49 = vld [vmem:[#allocation6 + $0x1d40] sm:$0xff] }
 0x178   : > { %2205 = vmatpush.msra.mxu0 %v657_v10  ;;  %2228 = vmatpush.msra.mxu1 %v913_v11  ;;  %v561_v50 = vld [vmem:[#allocation6 + $0x4c0] sm:$0xff] }
 0x179   : > { %2251 = vmatpush.msra.mxu2 %v1169_v14  ;;  %2274 = vmatpush.msra.mxu3 %v1425_v15  ;;  %v817_v51 = vld [vmem:[#allocation6 + $0xcc0] sm:$0xff] }
 0x17a   : > { %2206 = vmatpush.msra.mxu0 %v641_v18  ;;  %2229 = vmatpush.msra.mxu1 %v897_v19  ;;  %v1073_v58 = vld [vmem:[#allocation6 + $0x14c0] sm:$0xff] }
 0x17b   : > { %2252 = vmatpush.msra.mxu2 %v1153_v20  ;;  %2275 = vmatpush.msra.mxu3 %v1409_v21  ;;  %v1329_v59 = vld [vmem:[#allocation6 + $0x1cc0] sm:$0xff] }
 0x17c   : > { %2207 = vmatpush.msra.mxu0 %v625_v24  ;;  %2230 = vmatpush.msra.mxu1 %v881_v25  ;;  %v5130_v62 = vld [vmem:[#allocation8] sm:$0xff] }
 0x17d   : > { %2253 = vmatpush.msra.mxu2 %v1137_v55  ;;  %2276 = vmatpush.msra.mxu3 %v1393_v27  ;;  %v5126_v3 = vpop.f32.mrf.mxu0  ;;  %v5128_v39 = vpop.f32.mrf.mxu1  ;;  %v545_v63 = vld [vmem:[#allocation6 + $0x440] sm:$0xff]  ;;  %v1440_v11 = vperm.slane %v5130_v62, 3  ;;  %v546_v62 = vld [vmem:[#allocation6 + $0x448] sm:$0xff] }
 0x17e   : > { %2208 = vmatpush.msra.mxu0 %v609_v28  ;;  %2231 = vmatpush.msra.mxu1 %v865_v29  ;;  %v801_v4 = vld [vmem:[#allocation6 + $0xc40] sm:$0xff] }
 0x17f   : > { %2254 = vmatpush.msra.mxu2 %v1121_v32  ;;  %2277 = vmatpush.msra.mxu3 %v1377_v33  ;;  %v1057_v5 = vld [vmem:[#allocation6 + $0x1440] sm:$0xff] }
 0x180   : > { %2209 = vmatpush.msra.mxu0 %v593_v0  ;;  %2232 = vmatpush.msra.mxu1 %v849_v1  ;;  %v1313_v7 = vld [vmem:[#allocation6 + $0x1c40] sm:$0xff] }
 0x181   : > { %2255 = vmatpush.msra.mxu2 %v1105_v42  ;;  %2278 = vmatpush.msra.mxu3 %v1361_v43  ;;  %v529_v14 = vld [vmem:[#allocation6 + $0x3c0] sm:$0xff] }
 0x182   : > { %2210 = vmatpush.msra.mxu0 %v577_v46  ;;  %2233 = vmatpush.msra.mxu1 %v833_v47  ;;  %v785_v15 = vld [vmem:[#allocation6 + $0xbc0] sm:$0xff] }
 0x183   : > { %2256 = vmatpush.msra.mxu2 %v1089_v48  ;;  %2279 = vmatpush.msra.mxu3 %v1345_v49  ;;  %v1041_v18 = vld [vmem:[#allocation6 + $0x13c0] sm:$0xff] }
 0x184   : > { %2211 = vmatpush.msra.mxu0 %v561_v50  ;;  %2234 = vmatpush.msra.mxu1 %v817_v51  ;;  %v5132_v8 = vpop.f32.mrf.mxu2  ;;  %v5134_v10 = vpop.f32.mrf.mxu3  ;;  %v1297_v19 = vld [vmem:[#allocation6 + $0x1bc0] sm:$0xff] }
 0x185   : > { %2257 = vmatpush.msra.mxu2 %v1073_v58  ;;  %2280 = vmatpush.msra.mxu3 %v1329_v59  ;;  %v513_v20 = vld [vmem:[#allocation6 + $0x340] sm:$0xff] }
 0x186   : > { %2212 = vmatpush.msra.mxu0 %v545_v63  ;;  %2235 = vmatpush.msra.mxu1 %v801_v4  ;;  %v769_v21 = vld [vmem:[#allocation6 + $0xb40] sm:$0xff] }
 0x187   : > { %2258 = vmatpush.msra.mxu2 %v1057_v5  ;;  %2281 = vmatpush.msra.mxu3 %v1313_v7  ;;  %v1762_v24 = vpop.f32.mrf.mxu0  ;;  %v1785_v25 = vpop.f32.mrf.mxu1  ;;  %v1025_v55 = vld [vmem:[#allocation6 + $0x1340] sm:$0xff] }
 0x188   : > { %2213 = vmatpush.msra.mxu0 %v529_v14  ;;  %2236 = vmatpush.msra.mxu1 %v785_v15  ;;  %v1281_v27 = vld [vmem:[#allocation6 + $0x1b40] sm:$0xff]  ;;  %v1763_v28 = vadd.f32 %v1762_v24, %v1440_v11 }
 0x189   : > { %2259 = vmatpush.msra.mxu2 %v1041_v18  ;;  %2282 = vmatpush.msra.mxu3 %v1297_v19  ;;  %v497_v29 = vld [vmem:[#allocation6 + $0x2c0] sm:$0xff] }
 0x18a   : > { %v753_v32 = vld [vmem:[#allocation6 + $0xac0] sm:$0xff]  ;;  %2214 = vmatpush.msra.mxu0 %v513_v20  ;;  %2237 = vmatpush.msra.mxu1 %v769_v21  ;;  %v1786_v1 = vadd.f32 %v1785_v25, %v1763_v28  ;;  %v658_v28 = vld [vmem:[#allocation6 + $0x7c8] sm:$0xff] }
 0x18b   : > { %v1009_v33 = vld [vmem:[#allocation6 + $0x12c0] sm:$0xff]  ;;  %2260 = vmatpush.msra.mxu2 %v1025_v55  ;;  %2283 = vmatpush.msra.mxu3 %v1281_v27 }
 0x18c   : > { %v1265_v0 = vld [vmem:[#allocation6 + $0x1ac0] sm:$0xff]  ;;  %2215 = vmatpush.msra.mxu0 %v497_v29  ;;  %2238 = vmatpush.msra.mxu1 %v753_v32  ;;  %v914_v29 = vld [vmem:[#allocation6 + $0xfc8] sm:$0xff] }
 0x18d   : > { %v481_v42 = vld [vmem:[#allocation6 + $0x240] sm:$0xff]  ;;  %2261 = vmatpush.msra.mxu2 %v1009_v33  ;;  %2284 = vmatpush.msra.mxu3 %v1265_v0  ;;  %v1170_v32 = vld [vmem:[#allocation6 + $0x17c8] sm:$0xff] }
 0x18e   : > { %v737_v43 = vld [vmem:[#allocation6 + $0xa40] sm:$0xff]  ;;  %2216 = vmatpush.msra.mxu0 %v481_v42  ;;  %v1808_v48 = vpop.f32.mrf.mxu2  ;;  %v1831_v49 = vpop.f32.mrf.mxu3  ;;  %2063 = vmatmul.f32.gmra.mxu1 %v5065_v23  ;;  %v1426_v33 = vld [vmem:[#allocation6 + $0x1fc8] sm:$0xff] }
 0x18f   : > { %v993_v46 = vld [vmem:[#allocation6 + $0x1240] sm:$0xff]  ;;  %2239 = vmatpush.msra.mxu1 %v737_v43  ;;  %v1809_v58 = vadd.f32 %v1808_v48, %v1786_v1  ;;  %2040 = vmatmul.f32.gmra.mxu0 %v5062_v22  ;;  %v642_v0 = vld [vmem:[#allocation6 + $0x748] sm:$0xff] }
 0x190   : > { %v1249_v47 = vld [vmem:[#allocation6 + $0x1a40] sm:$0xff]  ;;  %2262 = vmatpush.msra.mxu2 %v993_v46  ;;  %2109 = vmatmul.f32.gmra.mxu3 %v5071_v53  ;;  %v898_v1 = vld [vmem:[#allocation6 + $0xf48] sm:$0xff] }
 0x191   : > { %2285 = vmatpush.msra.mxu3 %v1249_v47  ;;  %v465_v50 = vld [vmem:[#allocation6 + $0x1c0] sm:$0xff]  ;;  %2086 = vmatmul.f32.gmra.mxu2 %v5068_v52  ;;  %v5143_v7 = vadd.f32 %v1831_v49, %v1809_v58  ;;  %v1154_v42 = vld [vmem:[#allocation6 + $0x1748] sm:$0xff] }
 0x192   : > { %v721_v51 = vld [vmem:[#allocation6 + $0x9c0] sm:$0xff]  ;;  %2217 = vmatpush.msra.mxu0 %v465_v50  ;;  %v1410_v43 = vld [vmem:[#allocation6 + $0x1f48] sm:$0xff] }
 0x193   : > { %v977_v59 = vld [vmem:[#allocation6 + $0x11c0] sm:$0xff]  ;;  %2240 = vmatpush.msra.mxu1 %v721_v51  ;;  %v626_v46 = vld [vmem:[#allocation6 + $0x6c8] sm:$0xff] }
 0x194   : > { %v1233_v63 = vld [vmem:[#allocation6 + $0x19c0] sm:$0xff]  ;;  %2263 = vmatpush.msra.mxu2 %v977_v59  ;;  %v882_v47 = vld [vmem:[#allocation6 + $0xec8] sm:$0xff] }
 0x195   : > { %v449_v4 = vld [vmem:[#allocation6 + $0x140] sm:$0xff]  ;;  %2286 = vmatpush.msra.mxu3 %v1233_v63  ;;  %v610_v48 = vld [vmem:[#allocation6 + $0x648] sm:$0xff] }
 0x196   : > { %v705_v5 = vld [vmem:[#allocation6 + $0x940] sm:$0xff]  ;;  %2218 = vmatpush.msra.mxu0 %v449_v4  ;;  %2152 = vmatmul.f32.vlgmr.msrb.gmra.mxu1 %v5053_v31  ;;  %v1394_v31 = vld [vmem:[#allocation6 + $0x1ec8] sm:$0xff] }
 0x197   : > { %v961_v14 = vld [vmem:[#allocation6 + $0x1140] sm:$0xff]  ;;  %2241 = vmatpush.msra.mxu1 %v705_v5  ;;  %2129 = vmatmul.f32.vlgmr.msrb.gmra.mxu0 %v5050_v30  ;;  %v1138_v30 = vld [vmem:[#allocation6 + $0x16c8] sm:$0xff] }
 0x198   : > { %v1217_v15 = vld [vmem:[#allocation6 + $0x1940] sm:$0xff]  ;;  %2264 = vmatpush.msra.mxu2 %v961_v14  ;;  %2198 = vmatmul.f32.vlgmr.msrb.gmra.mxu3 %v5059_v35  ;;  %v1122_v35 = vld [vmem:[#allocation6 + $0x1648] sm:$0xff] }
 0x199   : > { %v433_v18 = vld [vmem:[#allocation6 + $0xc0] sm:$0xff]  ;;  %2287 = vmatpush.msra.mxu3 %v1217_v15  ;;  %2175 = vmatmul.f32.vlgmr.msrb.gmra.mxu2 %v5056_v34  ;;  %v866_v34 = vld [vmem:[#allocation6 + $0xe48] sm:$0xff] }
 0x19a   : > { %v689_v19 = vld [vmem:[#allocation6 + $0x8c0] sm:$0xff]  ;;  %2219 = vmatpush.msra.mxu0 %v433_v18  ;;  %v1378_v49 = vld [vmem:[#allocation6 + $0x1e48] sm:$0xff] }
 0x19b   : > { %v945_v20 = vld [vmem:[#allocation6 + $0x10c0] sm:$0xff]  ;;  %2242 = vmatpush.msra.mxu1 %v689_v19  ;;  %v594_v50 = vld [vmem:[#allocation6 + $0x5c8] sm:$0xff] }
 0x19c   : > { %v1201_v21 = vld [vmem:[#allocation6 + $0x18c0] sm:$0xff]  ;;  %2265 = vmatpush.msra.mxu2 %v945_v20  ;;  %v850_v51 = vld [vmem:[#allocation6 + $0xdc8] sm:$0xff] }
 0x19d   : > { %v417_v24 = vld [vmem:[#allocation6 + $0x40] sm:$0xff]  ;;  %2288 = vmatpush.msra.mxu3 %v1201_v21  ;;  %v1106_v63 = vld [vmem:[#allocation6 + $0x15c8] sm:$0xff] }
 0x19e   : > { %v673_v25 = vld [vmem:[#allocation6 + $0x840] sm:$0xff]  ;;  %2220 = vmatpush.msra.mxu0 %v417_v24  ;;  %v1362_v4 = vld [vmem:[#allocation6 + $0x1dc8] sm:$0xff]  ;;  %2155 = vmatmul.f32.gmra.mxu1 %v5065_v23 }
 0x19f   : > { %v929_v55 = vld [vmem:[#allocation6 + $0x1040] sm:$0xff]  ;;  %2243 = vmatpush.msra.mxu1 %v673_v25  ;;  %v578_v14 = vld [vmem:[#allocation6 + $0x548] sm:$0xff]  ;;  %2132 = vmatmul.f32.gmra.mxu0 %v5062_v22 }
 0x1a0   : > { %v1185_v27 = vld [vmem:[#allocation6 + $0x1840] sm:$0xff]  ;;  %2266 = vmatpush.msra.mxu2 %v929_v55  ;;  %2297 = vmatpush.msrb.mxu0 %v658_v28  ;;  %v834_v15 = vld [vmem:[#allocation6 + $0xd48] sm:$0xff] }
 0x1a1   : > { %2289 = vmatpush.msra.mxu3 %v1185_v27  ;;  %2320 = vmatpush.msrb.mxu1 %v914_v29  ;;  %v1765_v58 = vpop.f32.mrf.mxu0  ;;  %v1788_v59 = vpop.f32.mrf.mxu1  ;;  %v1090_v18 = vld [vmem:[#allocation6 + $0x1548] sm:$0xff] }
 0x1a2   : > { %2343 = vmatpush.msrb.mxu2 %v1170_v32  ;;  %2298 = vmatpush.msrb.mxu0 %v642_v0  ;;  %v1766_v5 = vadd.f32 %v1765_v58, %v1440_v11  ;;  %v1346_v19 = vld [vmem:[#allocation6 + $0x1d48] sm:$0xff] }
 0x1a3   : > { %2366 = vmatpush.msrb.mxu3 %v1426_v33  ;;  %2321 = vmatpush.msrb.mxu1 %v898_v1  ;;  %v562_v21 = vld [vmem:[#allocation6 + $0x4c8] sm:$0xff] }
 0x1a4   : > { %2344 = vmatpush.msrb.mxu2 %v1154_v42  ;;  %2299 = vmatpush.msrb.mxu0 %v626_v46  ;;  %v1789_v20 = vadd.f32 %v1788_v59, %v1766_v5  ;;  %v818_v24 = vld [vmem:[#allocation6 + $0xcc8] sm:$0xff] }
 0x1a5   : > { %2367 = vmatpush.msrb.mxu3 %v1410_v43  ;;  %2322 = vmatpush.msrb.mxu1 %v882_v47  ;;  %v1074_v25 = vld [vmem:[#allocation6 + $0x14c8] sm:$0xff] }
 0x1a6   : > { %2345 = vmatpush.msrb.mxu2 %v1138_v30  ;;  %2300 = vmatpush.msrb.mxu0 %v610_v48  ;;  %v1330_v55 = vld [vmem:[#allocation6 + $0x1cc8] sm:$0xff] }
 0x1a7   : > { %2368 = vmatpush.msrb.mxu3 %v1394_v31  ;;  %2323 = vmatpush.msrb.mxu1 %v866_v34  ;;  %v802_v11 = vld [vmem:[#allocation6 + $0xc48] sm:$0xff] }
 0x1a8   : > { %2346 = vmatpush.msrb.mxu2 %v1122_v35  ;;  %2301 = vmatpush.msrb.mxu0 %v594_v50  ;;  %v1058_v27 = vld [vmem:[#allocation6 + $0x1448] sm:$0xff]  ;;  %v1811_v29 = vpop.f32.mrf.mxu2  ;;  %v1834_v32 = vpop.f32.mrf.mxu3 }
 0x1a9   : > { %2369 = vmatpush.msrb.mxu3 %v1378_v49  ;;  %2324 = vmatpush.msrb.mxu1 %v850_v51  ;;  %v1314_v28 = vld [vmem:[#allocation6 + $0x1c48] sm:$0xff]  ;;  %v1812_v1 = vadd.f32 %v1811_v29, %v1789_v20 }
 0x1aa   : > { %2347 = vmatpush.msrb.mxu2 %v1106_v63  ;;  %2302 = vmatpush.msrb.mxu0 %v578_v14  ;;  %v530_v33 = vld [vmem:[#allocation6 + $0x3c8] sm:$0xff] }
 0x1ab   : > { %2370 = vmatpush.msrb.mxu3 %v1362_v4  ;;  %2325 = vmatpush.msrb.mxu1 %v834_v15  ;;  %v786_v0 = vld [vmem:[#allocation6 + $0xbc8] sm:$0xff]  ;;  %v5151_v30 = vadd.f32 %v1834_v32, %v1812_v1  ;;  %v1171_v32 = vld [vmem:[#allocation6 + $0x17d0] sm:$0xff]  ;;  %v5166_v1 = vld [vmem:[#allocation3 + $0x18] sm:$0xff] }
 0x1ac   : > { %2348 = vmatpush.msrb.mxu2 %v1090_v18  ;;  %2303 = vmatpush.msrb.mxu0 %v562_v21  ;;  %v1042_v42 = vld [vmem:[#allocation6 + $0x13c8] sm:$0xff] }
 0x1ad   : > { %2371 = vmatpush.msrb.mxu3 %v1346_v19  ;;  %2326 = vmatpush.msrb.mxu1 %v818_v24  ;;  %v1298_v43 = vld [vmem:[#allocation6 + $0x1bc8] sm:$0xff] }
 0x1ae   : > { %2349 = vmatpush.msrb.mxu2 %v1074_v25  ;;  %2304 = vmatpush.msrb.mxu0 %v546_v62  ;;  %v514_v46 = vld [vmem:[#allocation6 + $0x348] sm:$0xff] }
 0x1af   : > { %2372 = vmatpush.msrb.mxu3 %v1330_v55  ;;  %2327 = vmatpush.msrb.mxu1 %v802_v11  ;;  %v770_v47 = vld [vmem:[#allocation6 + $0xb48] sm:$0xff]  ;;  %v659_v11 = vld [vmem:[#allocation6 + $0x7d0] sm:$0xff] }
 0x1b0   : > { %2350 = vmatpush.msrb.mxu2 %v1058_v27  ;;  %2305 = vmatpush.msrb.mxu0 %v530_v33  ;;  %v1026_v31 = vld [vmem:[#allocation6 + $0x1348] sm:$0xff]  ;;  %v915_v27 = vld [vmem:[#allocation6 + $0xfd0] sm:$0xff] }
 0x1b1   : > { %2373 = vmatpush.msrb.mxu3 %v1314_v28  ;;  %2328 = vmatpush.msrb.mxu1 %v786_v0  ;;  %v1282_v48 = vld [vmem:[#allocation6 + $0x1b48] sm:$0xff]  ;;  %v5157_v28 = vld [vmem:[#allocation3] sm:$0xff]  ;;  %v1427_v33 = vld [vmem:[#allocation6 + $0x1fd0] sm:$0xff] }
 0x1b2   : > { %2351 = vmatpush.msrb.mxu2 %v1042_v42  ;;  %v498_v34 = vld [vmem:[#allocation6 + $0x2c8] sm:$0xff]  ;;  %2306 = vmatpush.msrb.mxu0 %v514_v46  ;;  %v5163_v0 = vld [vmem:[#allocation3 + $0x10] sm:$0xff] }
 0x1b3   : > { %2374 = vmatpush.msrb.mxu3 %v1298_v43  ;;  %v754_v35 = vld [vmem:[#allocation6 + $0xac8] sm:$0xff]  ;;  %2329 = vmatpush.msrb.mxu1 %v770_v47  ;;  %v643_v42 = vld [vmem:[#allocation6 + $0x750] sm:$0xff] }
 0x1b4   : > { %v1010_v49 = vld [vmem:[#allocation6 + $0x12c8] sm:$0xff]  ;;  %2352 = vmatpush.msrb.mxu2 %v1026_v31  ;;  %2307 = vmatpush.msrb.mxu0 %v498_v34  ;;  %v899_v43 = vld [vmem:[#allocation6 + $0xf50] sm:$0xff] }
 0x1b5   : > { %v1266_v50 = vld [vmem:[#allocation6 + $0x1ac8] sm:$0xff]  ;;  %2375 = vmatpush.msrb.mxu3 %v1282_v48  ;;  %2330 = vmatpush.msrb.mxu1 %v754_v35  ;;  %v1155_v46 = vld [vmem:[#allocation6 + $0x1750] sm:$0xff] }
 0x1b6   : > { %v482_v51 = vld [vmem:[#allocation6 + $0x248] sm:$0xff]  ;;  %2353 = vmatpush.msrb.mxu2 %v1010_v49  ;;  %2201 = vmatmul.f32.gmra.mxu3 %v5071_v53  ;;  %v1411_v47 = vld [vmem:[#allocation6 + $0x1f50] sm:$0xff] }
 0x1b7   : > { %v738_v58 = vld [vmem:[#allocation6 + $0xa48] sm:$0xff]  ;;  %2376 = vmatpush.msrb.mxu3 %v1266_v50  ;;  %2308 = vmatpush.msrb.mxu0 %v482_v51  ;;  %v627_v31 = vld [vmem:[#allocation6 + $0x6d0] sm:$0xff] }
 0x1b8   : > { %v994_v59 = vld [vmem:[#allocation6 + $0x1248] sm:$0xff]  ;;  %2331 = vmatpush.msrb.mxu1 %v738_v58  ;;  %2178 = vmatmul.f32.gmra.mxu2 %v5068_v52  ;;  %v883_v48 = vld [vmem:[#allocation6 + $0xed0] sm:$0xff] }
 0x1b9   : > { %v1250_v63 = vld [vmem:[#allocation6 + $0x1a48] sm:$0xff]  ;;  %2354 = vmatpush.msrb.mxu2 %v994_v59  ;;  %2221 = vmatmul.f32.vlgmr.msra.gmra.mxu0 %v5157_v28  ;;  %v1139_v34 = vld [vmem:[#allocation6 + $0x16d0] sm:$0xff] }
 0x1ba   : > { %2377 = vmatpush.msrb.mxu3 %v1250_v63  ;;  %v466_v4 = vld [vmem:[#allocation6 + $0x1c8] sm:$0xff]  ;;  %v1395_v35 = vld [vmem:[#allocation6 + $0x1ed0] sm:$0xff] }
 0x1bb   : > { %v722_v5 = vld [vmem:[#allocation6 + $0x9c8] sm:$0xff]  ;;  %2309 = vmatpush.msrb.mxu0 %v466_v4  ;;  %v611_v49 = vld [vmem:[#allocation6 + $0x650] sm:$0xff] }
 0x1bc   : > { %v978_v14 = vld [vmem:[#allocation6 + $0x11c8] sm:$0xff]  ;;  %2332 = vmatpush.msrb.mxu1 %v722_v5  ;;  %v867_v50 = vld [vmem:[#allocation6 + $0xe50] sm:$0xff] }
 0x1bd   : > { %v1234_v15 = vld [vmem:[#allocation6 + $0x19c8] sm:$0xff]  ;;  %2355 = vmatpush.msrb.mxu2 %v978_v14  ;;  %v1123_v51 = vld [vmem:[#allocation6 + $0x1650] sm:$0xff] }
 0x1be   : > { %v450_v18 = vld [vmem:[#allocation6 + $0x148] sm:$0xff]  ;;  %2378 = vmatpush.msrb.mxu3 %v1234_v15  ;;  %v1379_v58 = vld [vmem:[#allocation6 + $0x1e50] sm:$0xff] }
 0x1bf   : > { %v706_v19 = vld [vmem:[#allocation6 + $0x948] sm:$0xff]  ;;  %2310 = vmatpush.msrb.mxu0 %v450_v18  ;;  %2290 = vmatmul.f32.vlgmr.msra.gmra.mxu3 %v5166_v1  ;;  %v595_v59 = vld [vmem:[#allocation6 + $0x5d0] sm:$0xff] }
 0x1c0   : > { %v962_v20 = vld [vmem:[#allocation6 + $0x1148] sm:$0xff]  ;;  %2333 = vmatpush.msrb.mxu1 %v706_v19  ;;  %2267 = vmatmul.f32.vlgmr.msra.gmra.mxu2 %v5163_v0  ;;  %v851_v63 = vld [vmem:[#allocation6 + $0xdd0] sm:$0xff] }
 0x1c1   : > { %v1218_v21 = vld [vmem:[#allocation6 + $0x1948] sm:$0xff]  ;;  %2356 = vmatpush.msrb.mxu2 %v962_v20  ;;  %v1107_v4 = vld [vmem:[#allocation6 + $0x15d0] sm:$0xff] }
 0x1c2   : > { %v434_v24 = vld [vmem:[#allocation6 + $0xc8] sm:$0xff]  ;;  %2379 = vmatpush.msrb.mxu3 %v1218_v21  ;;  %v1363_v5 = vld [vmem:[#allocation6 + $0x1dd0] sm:$0xff] }
 0x1c3   : > { %v690_v25 = vld [vmem:[#allocation6 + $0x8c8] sm:$0xff]  ;;  %2311 = vmatpush.msrb.mxu0 %v434_v24  ;;  %v579_v14 = vld [vmem:[#allocation6 + $0x550] sm:$0xff] }
 0x1c4   : > { %v946_v22 = vld [vmem:[#allocation6 + $0x10c8] sm:$0xff]  ;;  %2334 = vmatpush.msrb.mxu1 %v690_v25  ;;  %v835_v15 = vld [vmem:[#allocation6 + $0xd50] sm:$0xff] }
 0x1c5   : > { %v1202_v23 = vld [vmem:[#allocation6 + $0x18c8] sm:$0xff]  ;;  %2357 = vmatpush.msrb.mxu2 %v946_v22  ;;  %v1091_v18 = vld [vmem:[#allocation6 + $0x1550] sm:$0xff] }
 0x1c6   : > { %v418_v55 = vld [vmem:[#allocation6 + $0x48] sm:$0xff]  ;;  %2380 = vmatpush.msrb.mxu3 %v1202_v23  ;;  %v1347_v19 = vld [vmem:[#allocation6 + $0x1d50] sm:$0xff] }
 0x1c7   : > { %v674_v52 = vld [vmem:[#allocation6 + $0x848] sm:$0xff]  ;;  %2312 = vmatpush.msrb.mxu0 %v418_v55  ;;  %v563_v20 = vld [vmem:[#allocation6 + $0x4d0] sm:$0xff] }
 0x1c8   : > { %v930_v53 = vld [vmem:[#allocation6 + $0x1048] sm:$0xff]  ;;  %2335 = vmatpush.msrb.mxu1 %v674_v52  ;;  %v819_v21 = vld [vmem:[#allocation6 + $0xcd0] sm:$0xff] }
 0x1c9   : > { %v1186_v62 = vld [vmem:[#allocation6 + $0x1848] sm:$0xff]  ;;  %2358 = vmatpush.msrb.mxu2 %v930_v53  ;;  %2389 = vmatpush.msra.mxu0 %v659_v11  ;;  %v1075_v24 = vld [vmem:[#allocation6 + $0x14d0] sm:$0xff] }
 0x1ca   : > { %2381 = vmatpush.msrb.mxu3 %v1186_v62  ;;  %v5160_v29 = vld [vmem:[#allocation3 + $0x8] sm:$0xff]  ;;  %v1331_v25 = vld [vmem:[#allocation6 + $0x1cd0] sm:$0xff] }
 0x1cb   : > { %2244 = vmatmul.f32.vlgmr.msra.gmra.mxu1 %v5160_v29  ;;  %2435 = vmatpush.msra.mxu2 %v1171_v32  ;;  %v547_v22 = vld [vmem:[#allocation6 + $0x450] sm:$0xff] }
 0x1cc   : > { %2412 = vmatpush.msra.mxu1 %v915_v27  ;;  %2458 = vmatpush.msra.mxu3 %v1427_v33  ;;  %v803_v23 = vld [vmem:[#allocation6 + $0xc50] sm:$0xff] }
 0x1cd   : > { %2390 = vmatpush.msra.mxu0 %v643_v42  ;;  %2436 = vmatpush.msra.mxu2 %v1155_v46  ;;  %v1059_v55 = vld [vmem:[#allocation6 + $0x1450] sm:$0xff] }
 0x1ce   : > { %2413 = vmatpush.msra.mxu1 %v899_v43  ;;  %2459 = vmatpush.msra.mxu3 %v1411_v47  ;;  %v1315_v52 = vld [vmem:[#allocation6 + $0x1c50] sm:$0xff] }
 0x1cf   : > { %2391 = vmatpush.msra.mxu0 %v627_v31  ;;  %2437 = vmatpush.msra.mxu2 %v1139_v34  ;;  %v531_v53 = vld [vmem:[#allocation6 + $0x3d0] sm:$0xff] }
 0x1d0   : > { %2414 = vmatpush.msra.mxu1 %v883_v48  ;;  %2460 = vmatpush.msra.mxu3 %v1395_v35  ;;  %v787_v62 = vld [vmem:[#allocation6 + $0xbd0] sm:$0xff] }
 0x1d1   : > { %2392 = vmatpush.msra.mxu0 %v611_v49  ;;  %2438 = vmatpush.msra.mxu2 %v1123_v51  ;;  %v1043_v11 = vld [vmem:[#allocation6 + $0x13d0] sm:$0xff] }
 0x1d2   : > { %2415 = vmatpush.msra.mxu1 %v867_v50  ;;  %2461 = vmatpush.msra.mxu3 %v1379_v58  ;;  %v1299_v27 = vld [vmem:[#allocation6 + $0x1bd0] sm:$0xff] }
 0x1d3   : > { %2393 = vmatpush.msra.mxu0 %v595_v59  ;;  %2439 = vmatpush.msra.mxu2 %v1107_v4  ;;  %v515_v32 = vld [vmem:[#allocation6 + $0x350] sm:$0xff]  ;;  %v5169_v59 = vld [vmem:[#allocation3 + $0x20] sm:$0xff] }
 0x1d4   : > { %2416 = vmatpush.msra.mxu1 %v851_v63  ;;  %2462 = vmatpush.msra.mxu3 %v1363_v5  ;;  %v771_v33 = vld [vmem:[#allocation6 + $0xb50] sm:$0xff]  ;;  %v5172_v63 = vld [vmem:[#allocation3 + $0x28] sm:$0xff] }
 0x1d5   : > { %2394 = vmatpush.msra.mxu0 %v579_v14  ;;  %2440 = vmatpush.msra.mxu2 %v1091_v18  ;;  %v1027_v42 = vld [vmem:[#allocation6 + $0x1350] sm:$0xff] }
 0x1d6   : > { %2417 = vmatpush.msra.mxu1 %v835_v15  ;;  %2463 = vmatpush.msra.mxu3 %v1347_v19  ;;  %v1283_v43 = vld [vmem:[#allocation6 + $0x1b50] sm:$0xff]  ;;  %v5178_v15 = vld [vmem:[#allocation3 + $0x38] sm:$0xff] }
 0x1d7   : > { %2395 = vmatpush.msra.mxu0 %v563_v20  ;;  %2441 = vmatpush.msra.mxu2 %v1075_v24  ;;  %v499_v46 = vld [vmem:[#allocation6 + $0x2d0] sm:$0xff] }
 0x1d8   : > { %2418 = vmatpush.msra.mxu1 %v819_v21  ;;  %2464 = vmatpush.msra.mxu3 %v1331_v25  ;;  %v755_v47 = vld [vmem:[#allocation6 + $0xad0] sm:$0xff] }
 0x1d9   : > { %2396 = vmatpush.msra.mxu0 %v547_v22  ;;  %2442 = vmatpush.msra.mxu2 %v1059_v55  ;;  %v1011_v31 = vld [vmem:[#allocation6 + $0x12d0] sm:$0xff] }
 0x1da   : > { %2419 = vmatpush.msra.mxu1 %v803_v23  ;;  %2465 = vmatpush.msra.mxu3 %v1315_v52  ;;  %v1267_v48 = vld [vmem:[#allocation6 + $0x1ad0] sm:$0xff] }
 0x1db   : > { %2397 = vmatpush.msra.mxu0 %v531_v53  ;;  %2443 = vmatpush.msra.mxu2 %v1043_v11  ;;  %v483_v34 = vld [vmem:[#allocation6 + $0x250] sm:$0xff]  ;;  %v660_v11 = vld [vmem:[#allocation6 + $0x7d8] sm:$0xff] }
 0x1dc   : > { %2420 = vmatpush.msra.mxu1 %v787_v62  ;;  %2466 = vmatpush.msra.mxu3 %v1299_v27  ;;  %v739_v35 = vld [vmem:[#allocation6 + $0xa50] sm:$0xff]  ;;  %v916_v27 = vld [vmem:[#allocation6 + $0xfd8] sm:$0xff] }
 0x1dd   : > { %2398 = vmatpush.msra.mxu0 %v515_v32  ;;  %2444 = vmatpush.msra.mxu2 %v1027_v42  ;;  %v995_v49 = vld [vmem:[#allocation6 + $0x1250] sm:$0xff]  ;;  %v1172_v32 = vld [vmem:[#allocation6 + $0x17d8] sm:$0xff] }
 0x1de   : > { %2421 = vmatpush.msra.mxu1 %v771_v33  ;;  %2467 = vmatpush.msra.mxu3 %v1283_v43  ;;  %v1251_v50 = vld [vmem:[#allocation6 + $0x1a50] sm:$0xff]  ;;  %v1428_v33 = vld [vmem:[#allocation6 + $0x1fd8] sm:$0xff] }
 0x1df   : > { %2399 = vmatpush.msra.mxu0 %v499_v46  ;;  %2445 = vmatpush.msra.mxu2 %v1011_v31  ;;  %v467_v51 = vld [vmem:[#allocation6 + $0x1d0] sm:$0xff]  ;;  %v644_v42 = vld [vmem:[#allocation6 + $0x758] sm:$0xff] }
 0x1e0   : > { %2422 = vmatpush.msra.mxu1 %v755_v47  ;;  %2468 = vmatpush.msra.mxu3 %v1267_v48  ;;  %v723_v58 = vld [vmem:[#allocation6 + $0x9d0] sm:$0xff]  ;;  %v900_v43 = vld [vmem:[#allocation6 + $0xf58] sm:$0xff] }
 0x1e1   : > { %2400 = vmatpush.msra.mxu0 %v483_v34  ;;  %2446 = vmatpush.msra.mxu2 %v995_v49  ;;  %v979_v4 = vld [vmem:[#allocation6 + $0x11d0] sm:$0xff]  ;;  %v1156_v46 = vld [vmem:[#allocation6 + $0x1758] sm:$0xff] }
 0x1e2   : > { %2423 = vmatpush.msra.mxu1 %v739_v35  ;;  %2469 = vmatpush.msra.mxu3 %v1251_v50  ;;  %v1235_v5 = vld [vmem:[#allocation6 + $0x19d0] sm:$0xff]  ;;  %v1412_v47 = vld [vmem:[#allocation6 + $0x1f58] sm:$0xff] }
 0x1e3   : > { %2224 = vmatmul.f32.gmra.mxu0 %v5169_v59  ;;  %2247 = vmatmul.f32.gmra.mxu1 %v5172_v63  ;;  %v5175_v14 = vld [vmem:[#allocation3 + $0x30] sm:$0xff]  ;;  %v628_v31 = vld [vmem:[#allocation6 + $0x6d8] sm:$0xff] }
 0x1e4   : > { %2270 = vmatmul.f32.gmra.mxu2 %v5175_v14  ;;  %2293 = vmatmul.f32.gmra.mxu3 %v5178_v15  ;;  %v451_v18 = vld [vmem:[#allocation6 + $0x150] sm:$0xff]  ;;  %v884_v48 = vld [vmem:[#allocation6 + $0xed8] sm:$0xff] }
 0x1e5   : > { %v707_v19 = vld [vmem:[#allocation6 + $0x950] sm:$0xff]  ;;  %2401 = vmatpush.msra.mxu0 %v467_v51  ;;  %2424 = vmatpush.msra.mxu1 %v723_v58  ;;  %v1140_v34 = vld [vmem:[#allocation6 + $0x16d8] sm:$0xff] }
 0x1e6   : > { %v963_v20 = vld [vmem:[#allocation6 + $0x1150] sm:$0xff]  ;;  %2447 = vmatpush.msra.mxu2 %v979_v4  ;;  %2470 = vmatpush.msra.mxu3 %v1235_v5  ;;  %v1396_v35 = vld [vmem:[#allocation6 + $0x1ed8] sm:$0xff] }
 0x1e7   : > { %v1219_v21 = vld [vmem:[#allocation6 + $0x1950] sm:$0xff]  ;;  %2402 = vmatpush.msra.mxu0 %v451_v18  ;;  %2425 = vmatpush.msra.mxu1 %v707_v19  ;;  %v612_v49 = vld [vmem:[#allocation6 + $0x658] sm:$0xff] }
 0x1e8   : > { %v435_v24 = vld [vmem:[#allocation6 + $0xd0] sm:$0xff]  ;;  %2448 = vmatpush.msra.mxu2 %v963_v20  ;;  %2471 = vmatpush.msra.mxu3 %v1219_v21  ;;  %v868_v50 = vld [vmem:[#allocation6 + $0xe58] sm:$0xff] }
 0x1e9   : > { %v691_v25 = vld [vmem:[#allocation6 + $0x8d0] sm:$0xff]  ;;  %2403 = vmatpush.msra.mxu0 %v435_v24  ;;  %v1124_v51 = vld [vmem:[#allocation6 + $0x1658] sm:$0xff] }
 0x1ea   : > { %v947_v22 = vld [vmem:[#allocation6 + $0x10d0] sm:$0xff]  ;;  %2426 = vmatpush.msra.mxu1 %v691_v25  ;;  %v1380_v58 = vld [vmem:[#allocation6 + $0x1e58] sm:$0xff] }
 0x1eb   : > { %v1203_v23 = vld [vmem:[#allocation6 + $0x18d0] sm:$0xff]  ;;  %2449 = vmatpush.msra.mxu2 %v947_v22  ;;  %2313 = vmatmul.f32.vlgmr.msrb.gmra.mxu0 %v5157_v28  ;;  %v596_v4 = vld [vmem:[#allocation6 + $0x5d8] sm:$0xff] }
 0x1ec   : > { %v419_v55 = vld [vmem:[#allocation6 + $0x50] sm:$0xff]  ;;  %2472 = vmatpush.msra.mxu3 %v1203_v23  ;;  %2336 = vmatmul.f32.vlgmr.msrb.gmra.mxu1 %v5160_v29  ;;  %v852_v5 = vld [vmem:[#allocation6 + $0xdd8] sm:$0xff] }
 0x1ed   : > { %v675_v52 = vld [vmem:[#allocation6 + $0x850] sm:$0xff]  ;;  %2404 = vmatpush.msra.mxu0 %v419_v55  ;;  %2359 = vmatmul.f32.vlgmr.msrb.gmra.mxu2 %v5163_v0  ;;  %v1108_v18 = vld [vmem:[#allocation6 + $0x15d8] sm:$0xff] }
 0x1ee   : > { %v931_v53 = vld [vmem:[#allocation6 + $0x1050] sm:$0xff]  ;;  %2427 = vmatpush.msra.mxu1 %v675_v52  ;;  %2382 = vmatmul.f32.vlgmr.msrb.gmra.mxu3 %v5166_v1  ;;  %v1364_v19 = vld [vmem:[#allocation6 + $0x1dd8] sm:$0xff] }
 0x1ef   : > { %v1187_v62 = vld [vmem:[#allocation6 + $0x1850] sm:$0xff]  ;;  %2450 = vmatpush.msra.mxu2 %v931_v53  ;;  %2481 = vmatpush.msrb.mxu0 %v660_v11  ;;  %v580_v20 = vld [vmem:[#allocation6 + $0x558] sm:$0xff] }
 0x1f0   : > { %2473 = vmatpush.msra.mxu3 %v1187_v62  ;;  %2504 = vmatpush.msrb.mxu1 %v916_v27  ;;  %v836_v21 = vld [vmem:[#allocation6 + $0xd58] sm:$0xff] }
 0x1f1   : > { %2527 = vmatpush.msrb.mxu2 %v1172_v32  ;;  %2482 = vmatpush.msrb.mxu0 %v644_v42  ;;  %v1092_v24 = vld [vmem:[#allocation6 + $0x1558] sm:$0xff] }
 0x1f2   : > { %2550 = vmatpush.msrb.mxu3 %v1428_v33  ;;  %2505 = vmatpush.msrb.mxu1 %v900_v43  ;;  %v1348_v25 = vld [vmem:[#allocation6 + $0x1d58] sm:$0xff] }
 0x1f3   : > { %2528 = vmatpush.msrb.mxu2 %v1156_v46  ;;  %2483 = vmatpush.msrb.mxu0 %v628_v31  ;;  %v564_v22 = vld [vmem:[#allocation6 + $0x4d8] sm:$0xff] }
 0x1f4   : > { %2551 = vmatpush.msrb.mxu3 %v1412_v47  ;;  %2506 = vmatpush.msrb.mxu1 %v884_v48  ;;  %v820_v23 = vld [vmem:[#allocation6 + $0xcd8] sm:$0xff] }
 0x1f5   : > { %2529 = vmatpush.msrb.mxu2 %v1140_v34  ;;  %2484 = vmatpush.msrb.mxu0 %v612_v49  ;;  %v1076_v55 = vld [vmem:[#allocation6 + $0x14d8] sm:$0xff] }
 0x1f6   : > { %2552 = vmatpush.msrb.mxu3 %v1396_v35  ;;  %2507 = vmatpush.msrb.mxu1 %v868_v50  ;;  %v1332_v52 = vld [vmem:[#allocation6 + $0x1cd8] sm:$0xff] }
 0x1f7   : > { %2530 = vmatpush.msrb.mxu2 %v1124_v51  ;;  %2485 = vmatpush.msrb.mxu0 %v596_v4  ;;  %v548_v53 = vld [vmem:[#allocation6 + $0x458] sm:$0xff] }
 0x1f8   : > { %2553 = vmatpush.msrb.mxu3 %v1380_v58  ;;  %2508 = vmatpush.msrb.mxu1 %v852_v5  ;;  %v804_v62 = vld [vmem:[#allocation6 + $0xc58] sm:$0xff] }
 0x1f9   : > { %2531 = vmatpush.msrb.mxu2 %v1108_v18  ;;  %2486 = vmatpush.msrb.mxu0 %v580_v20  ;;  %v1060_v11 = vld [vmem:[#allocation6 + $0x1458] sm:$0xff] }
 0x1fa   : > { %2554 = vmatpush.msrb.mxu3 %v1364_v19  ;;  %2509 = vmatpush.msrb.mxu1 %v836_v21  ;;  %v1316_v27 = vld [vmem:[#allocation6 + $0x1c58] sm:$0xff] }
 0x1fb   : > { %2532 = vmatpush.msrb.mxu2 %v1092_v24  ;;  %2487 = vmatpush.msrb.mxu0 %v564_v22  ;;  %v532_v32 = vld [vmem:[#allocation6 + $0x3d8] sm:$0xff] }
 0x1fc   : > { %2555 = vmatpush.msrb.mxu3 %v1348_v25  ;;  %2510 = vmatpush.msrb.mxu1 %v820_v23  ;;  %v788_v33 = vld [vmem:[#allocation6 + $0xbd8] sm:$0xff] }
 0x1fd   : > { %2533 = vmatpush.msrb.mxu2 %v1076_v55  ;;  %2488 = vmatpush.msrb.mxu0 %v548_v53  ;;  %v1044_v42 = vld [vmem:[#allocation6 + $0x13d8] sm:$0xff] }
 0x1fe   : > { %2556 = vmatpush.msrb.mxu3 %v1332_v52  ;;  %2511 = vmatpush.msrb.mxu1 %v804_v62  ;;  %v1300_v43 = vld [vmem:[#allocation6 + $0x1bd8] sm:$0xff] }
 0x1ff   : > { %2534 = vmatpush.msrb.mxu2 %v1060_v11  ;;  %v516_v46 = vld [vmem:[#allocation6 + $0x358] sm:$0xff]  ;;  %2489 = vmatpush.msrb.mxu0 %v532_v32 }
 0x200   : > { %2557 = vmatpush.msrb.mxu3 %v1316_v27  ;;  %v772_v47 = vld [vmem:[#allocation6 + $0xb58] sm:$0xff]  ;;  %2512 = vmatpush.msrb.mxu1 %v788_v33 }
 0x201   : > { %v1028_v31 = vld [vmem:[#allocation6 + $0x1358] sm:$0xff]  ;;  %2535 = vmatpush.msrb.mxu2 %v1044_v42  ;;  %2490 = vmatpush.msrb.mxu0 %v516_v46  ;;  %v661_v42 = vld [vmem:[#allocation6 + $0x7e0] sm:$0xff] }
 0x202   : > { %v1284_v48 = vld [vmem:[#allocation6 + $0x1b58] sm:$0xff]  ;;  %2558 = vmatpush.msrb.mxu3 %v1300_v43  ;;  %2513 = vmatpush.msrb.mxu1 %v772_v47  ;;  %v917_v43 = vld [vmem:[#allocation6 + $0xfe0] sm:$0xff] }
 0x203   : > { %v500_v34 = vld [vmem:[#allocation6 + $0x2d8] sm:$0xff]  ;;  %2536 = vmatpush.msrb.mxu2 %v1028_v31  ;;  %2316 = vmatmul.f32.gmra.mxu0 %v5169_v59  ;;  %v1173_v46 = vld [vmem:[#allocation6 + $0x17e0] sm:$0xff] }
 0x204   : > { %v756_v35 = vld [vmem:[#allocation6 + $0xad8] sm:$0xff]  ;;  %2559 = vmatpush.msrb.mxu3 %v1284_v48  ;;  %2491 = vmatpush.msrb.mxu0 %v500_v34  ;;  %v1429_v47 = vld [vmem:[#allocation6 + $0x1fe0] sm:$0xff] }
 0x205   : > { %v1012_v49 = vld [vmem:[#allocation6 + $0x12d8] sm:$0xff]  ;;  %2514 = vmatpush.msrb.mxu1 %v756_v35  ;;  %2362 = vmatmul.f32.gmra.mxu2 %v5175_v14  ;;  %v645_v31 = vld [vmem:[#allocation6 + $0x760] sm:$0xff] }
 0x206   : > { %v1268_v50 = vld [vmem:[#allocation6 + $0x1ad8] sm:$0xff]  ;;  %2537 = vmatpush.msrb.mxu2 %v1012_v49  ;;  %2339 = vmatmul.f32.gmra.mxu1 %v5172_v63  ;;  %v901_v48 = vld [vmem:[#allocation6 + $0xf60] sm:$0xff] }
 0x207   : > { %v484_v51 = vld [vmem:[#allocation6 + $0x258] sm:$0xff]  ;;  %2560 = vmatpush.msrb.mxu3 %v1268_v50  ;;  %v1157_v34 = vld [vmem:[#allocation6 + $0x1760] sm:$0xff] }
 0x208   : > { %v740_v58 = vld [vmem:[#allocation6 + $0xa58] sm:$0xff]  ;;  %2492 = vmatpush.msrb.mxu0 %v484_v51  ;;  %2385 = vmatmul.f32.gmra.mxu3 %v5178_v15  ;;  %v1413_v35 = vld [vmem:[#allocation6 + $0x1f60] sm:$0xff] }
 0x209   : > { %v996_v4 = vld [vmem:[#allocation6 + $0x1258] sm:$0xff]  ;;  %2515 = vmatpush.msrb.mxu1 %v740_v58  ;;  %v629_v49 = vld [vmem:[#allocation6 + $0x6e0] sm:$0xff] }
 0x20a   : > { %v1252_v5 = vld [vmem:[#allocation6 + $0x1a58] sm:$0xff]  ;;  %2538 = vmatpush.msrb.mxu2 %v996_v4  ;;  %v885_v50 = vld [vmem:[#allocation6 + $0xee0] sm:$0xff] }
 0x20b   : > { %2561 = vmatpush.msrb.mxu3 %v1252_v5  ;;  %v468_v18 = vld [vmem:[#allocation6 + $0x1d8] sm:$0xff]  ;;  %2405 = vmatmul.f32.vlgmr.msra.gmra.mxu0 %v5157_v28  ;;  %v1141_v51 = vld [vmem:[#allocation6 + $0x16e0] sm:$0xff] }
 0x20c   : > { %v724_v19 = vld [vmem:[#allocation6 + $0x9d8] sm:$0xff]  ;;  %2493 = vmatpush.msrb.mxu0 %v468_v18  ;;  %v1397_v58 = vld [vmem:[#allocation6 + $0x1ee0] sm:$0xff] }
 0x20d   : > { %v980_v20 = vld [vmem:[#allocation6 + $0x11d8] sm:$0xff]  ;;  %2516 = vmatpush.msrb.mxu1 %v724_v19  ;;  %2451 = vmatmul.f32.vlgmr.msra.gmra.mxu2 %v5163_v0  ;;  %v613_v4 = vld [vmem:[#allocation6 + $0x660] sm:$0xff] }
 0x20e   : > { %v1236_v21 = vld [vmem:[#allocation6 + $0x19d8] sm:$0xff]  ;;  %2539 = vmatpush.msrb.mxu2 %v980_v20  ;;  %2428 = vmatmul.f32.vlgmr.msra.gmra.mxu1 %v5160_v29  ;;  %v869_v5 = vld [vmem:[#allocation6 + $0xe60] sm:$0xff] }
 0x20f   : > { %v452_v24 = vld [vmem:[#allocation6 + $0x158] sm:$0xff]  ;;  %2562 = vmatpush.msrb.mxu3 %v1236_v21  ;;  %v1125_v18 = vld [vmem:[#allocation6 + $0x1660] sm:$0xff] }
 0x210   : > { %v708_v25 = vld [vmem:[#allocation6 + $0x958] sm:$0xff]  ;;  %2494 = vmatpush.msrb.mxu0 %v452_v24  ;;  %2474 = vmatmul.f32.vlgmr.msra.gmra.mxu3 %v5166_v1  ;;  %v1381_v19 = vld [vmem:[#allocation6 + $0x1e60] sm:$0xff] }
 0x211   : > { %v964_v22 = vld [vmem:[#allocation6 + $0x1158] sm:$0xff]  ;;  %2517 = vmatpush.msrb.mxu1 %v708_v25  ;;  %v597_v20 = vld [vmem:[#allocation6 + $0x5e0] sm:$0xff] }
 0x212   : > { %v1220_v23 = vld [vmem:[#allocation6 + $0x1958] sm:$0xff]  ;;  %2540 = vmatpush.msrb.mxu2 %v964_v22  ;;  %v853_v21 = vld [vmem:[#allocation6 + $0xde0] sm:$0xff] }
 0x213   : > { %v436_v55 = vld [vmem:[#allocation6 + $0xd8] sm:$0xff]  ;;  %2563 = vmatpush.msrb.mxu3 %v1220_v23  ;;  %v1109_v24 = vld [vmem:[#allocation6 + $0x15e0] sm:$0xff]  ;;  %2408 = vmatmul.f32.gmra.mxu0 %v5169_v59 }
 0x214   : > { %v692_v52 = vld [vmem:[#allocation6 + $0x8d8] sm:$0xff]  ;;  %2495 = vmatpush.msrb.mxu0 %v436_v55  ;;  %v1365_v25 = vld [vmem:[#allocation6 + $0x1de0] sm:$0xff] }
 0x215   : > { %v948_v53 = vld [vmem:[#allocation6 + $0x10d8] sm:$0xff]  ;;  %2518 = vmatpush.msrb.mxu1 %v692_v52  ;;  %v581_v22 = vld [vmem:[#allocation6 + $0x560] sm:$0xff]  ;;  %2454 = vmatmul.f32.gmra.mxu2 %v5175_v14 }
 0x216   : > { %v1204_v62 = vld [vmem:[#allocation6 + $0x18d8] sm:$0xff]  ;;  %2541 = vmatpush.msrb.mxu2 %v948_v53  ;;  %v837_v23 = vld [vmem:[#allocation6 + $0xd60] sm:$0xff]  ;;  %2431 = vmatmul.f32.gmra.mxu1 %v5172_v63 }
 0x217   : > { %v420_v11 = vld [vmem:[#allocation6 + $0x58] sm:$0xff]  ;;  %2564 = vmatpush.msrb.mxu3 %v1204_v62  ;;  %v1093_v55 = vld [vmem:[#allocation6 + $0x1560] sm:$0xff] }
 0x218   : > { %v676_v27 = vld [vmem:[#allocation6 + $0x858] sm:$0xff]  ;;  %2496 = vmatpush.msrb.mxu0 %v420_v11  ;;  %v1349_v52 = vld [vmem:[#allocation6 + $0x1d60] sm:$0xff]  ;;  %2477 = vmatmul.f32.gmra.mxu3 %v5178_v15 }
 0x219   : > { %v932_v32 = vld [vmem:[#allocation6 + $0x1058] sm:$0xff]  ;;  %2519 = vmatpush.msrb.mxu1 %v676_v27  ;;  %v565_v53 = vld [vmem:[#allocation6 + $0x4e0] sm:$0xff] }
 0x21a   : > { %v1188_v33 = vld [vmem:[#allocation6 + $0x1858] sm:$0xff]  ;;  %2542 = vmatpush.msrb.mxu2 %v932_v32  ;;  %2573 = vmatpush.msra.mxu0 %v661_v42  ;;  %v821_v62 = vld [vmem:[#allocation6 + $0xce0] sm:$0xff] }
 0x21b   : > { %2565 = vmatpush.msrb.mxu3 %v1188_v33  ;;  %2596 = vmatpush.msra.mxu1 %v917_v43  ;;  %v1077_v11 = vld [vmem:[#allocation6 + $0x14e0] sm:$0xff] }
 0x21c   : > { %2619 = vmatpush.msra.mxu2 %v1173_v46  ;;  %2574 = vmatpush.msra.mxu0 %v645_v31  ;;  %v1333_v27 = vld [vmem:[#allocation6 + $0x1ce0] sm:$0xff] }
 0x21d   : > { %2642 = vmatpush.msra.mxu3 %v1429_v47  ;;  %2597 = vmatpush.msra.mxu1 %v901_v48  ;;  %v549_v32 = vld [vmem:[#allocation6 + $0x460] sm:$0xff] }
 0x21e   : > { %2620 = vmatpush.msra.mxu2 %v1157_v34  ;;  %2575 = vmatpush.msra.mxu0 %v629_v49  ;;  %v805_v33 = vld [vmem:[#allocation6 + $0xc60] sm:$0xff] }
 0x21f   : > { %2643 = vmatpush.msra.mxu3 %v1413_v35  ;;  %2598 = vmatpush.msra.mxu1 %v885_v50  ;;  %v1061_v42 = vld [vmem:[#allocation6 + $0x1460] sm:$0xff] }
 0x220   : > { %2621 = vmatpush.msra.mxu2 %v1141_v51  ;;  %2576 = vmatpush.msra.mxu0 %v613_v4  ;;  %v1317_v43 = vld [vmem:[#allocation6 + $0x1c60] sm:$0xff] }
 0x221   : > { %2644 = vmatpush.msra.mxu3 %v1397_v58  ;;  %2599 = vmatpush.msra.mxu1 %v869_v5  ;;  %v533_v46 = vld [vmem:[#allocation6 + $0x3e0] sm:$0xff] }
 0x222   : > { %2622 = vmatpush.msra.mxu2 %v1125_v18  ;;  %2577 = vmatpush.msra.mxu0 %v597_v20  ;;  %v789_v47 = vld [vmem:[#allocation6 + $0xbe0] sm:$0xff] }
 0x223   : > { %2645 = vmatpush.msra.mxu3 %v1381_v19  ;;  %2600 = vmatpush.msra.mxu1 %v853_v21  ;;  %v1045_v31 = vld [vmem:[#allocation6 + $0x13e0] sm:$0xff] }
 0x224   : > { %2623 = vmatpush.msra.mxu2 %v1109_v24  ;;  %2578 = vmatpush.msra.mxu0 %v581_v22  ;;  %v1301_v48 = vld [vmem:[#allocation6 + $0x1be0] sm:$0xff] }
 0x225   : > { %2646 = vmatpush.msra.mxu3 %v1365_v25  ;;  %2601 = vmatpush.msra.mxu1 %v837_v23  ;;  %v517_v34 = vld [vmem:[#allocation6 + $0x360] sm:$0xff] }
 0x226   : > { %2624 = vmatpush.msra.mxu2 %v1093_v55  ;;  %2579 = vmatpush.msra.mxu0 %v565_v53  ;;  %v773_v35 = vld [vmem:[#allocation6 + $0xb60] sm:$0xff] }
 0x227   : > { %2647 = vmatpush.msra.mxu3 %v1349_v52  ;;  %2602 = vmatpush.msra.mxu1 %v821_v62  ;;  %v1029_v49 = vld [vmem:[#allocation6 + $0x1360] sm:$0xff] }
 0x228   : > { %2625 = vmatpush.msra.mxu2 %v1077_v11  ;;  %2580 = vmatpush.msra.mxu0 %v549_v32  ;;  %v1285_v50 = vld [vmem:[#allocation6 + $0x1b60] sm:$0xff] }
 0x229   : > { %2648 = vmatpush.msra.mxu3 %v1333_v27  ;;  %2603 = vmatpush.msra.mxu1 %v805_v33  ;;  %v501_v51 = vld [vmem:[#allocation6 + $0x2e0] sm:$0xff] }
 0x22a   : > { %2626 = vmatpush.msra.mxu2 %v1061_v42  ;;  %2581 = vmatpush.msra.mxu0 %v533_v46  ;;  %v757_v58 = vld [vmem:[#allocation6 + $0xae0] sm:$0xff] }
 0x22b   : > { %2649 = vmatpush.msra.mxu3 %v1317_v43  ;;  %2604 = vmatpush.msra.mxu1 %v789_v47  ;;  %v1013_v4 = vld [vmem:[#allocation6 + $0x12e0] sm:$0xff] }
 0x22c   : > { %2627 = vmatpush.msra.mxu2 %v1045_v31  ;;  %2582 = vmatpush.msra.mxu0 %v517_v34  ;;  %v1269_v5 = vld [vmem:[#allocation6 + $0x1ae0] sm:$0xff]  ;;  %v662_v31 = vld [vmem:[#allocation6 + $0x7e8] sm:$0xff] }
 0x22d   : > { %2650 = vmatpush.msra.mxu3 %v1301_v48  ;;  %2605 = vmatpush.msra.mxu1 %v773_v35  ;;  %v485_v18 = vld [vmem:[#allocation6 + $0x260] sm:$0xff]  ;;  %v918_v48 = vld [vmem:[#allocation6 + $0xfe8] sm:$0xff] }
 0x22e   : > { %2628 = vmatpush.msra.mxu2 %v1029_v49  ;;  %v741_v19 = vld [vmem:[#allocation6 + $0xa60] sm:$0xff]  ;;  %2583 = vmatpush.msra.mxu0 %v501_v51  ;;  %v1174_v34 = vld [vmem:[#allocation6 + $0x17e8] sm:$0xff] }
 0x22f   : > { %2651 = vmatpush.msra.mxu3 %v1285_v50  ;;  %2606 = vmatpush.msra.mxu1 %v757_v58  ;;  %v997_v20 = vld [vmem:[#allocation6 + $0x1260] sm:$0xff]  ;;  %v1430_v35 = vld [vmem:[#allocation6 + $0x1fe8] sm:$0xff] }
 0x230   : > { %v1253_v21 = vld [vmem:[#allocation6 + $0x1a60] sm:$0xff]  ;;  %2629 = vmatpush.msra.mxu2 %v1013_v4  ;;  %2584 = vmatpush.msra.mxu0 %v485_v18  ;;  %v646_v49 = vld [vmem:[#allocation6 + $0x768] sm:$0xff] }
 0x231   : > { %2652 = vmatpush.msra.mxu3 %v1269_v5  ;;  %2607 = vmatpush.msra.mxu1 %v741_v19  ;;  %v469_v24 = vld [vmem:[#allocation6 + $0x1e0] sm:$0xff]  ;;  %v902_v50 = vld [vmem:[#allocation6 + $0xf68] sm:$0xff] }
 0x232   : > { %2630 = vmatpush.msra.mxu2 %v997_v20  ;;  %v725_v25 = vld [vmem:[#allocation6 + $0x9e0] sm:$0xff]  ;;  %2585 = vmatpush.msra.mxu0 %v469_v24  ;;  %v1158_v51 = vld [vmem:[#allocation6 + $0x1768] sm:$0xff] }
 0x233   : > { %2653 = vmatpush.msra.mxu3 %v1253_v21  ;;  %v981_v22 = vld [vmem:[#allocation6 + $0x11e0] sm:$0xff]  ;;  %2608 = vmatpush.msra.mxu1 %v725_v25  ;;  %v1414_v58 = vld [vmem:[#allocation6 + $0x1f68] sm:$0xff] }
 0x234   : > { %v1237_v23 = vld [vmem:[#allocation6 + $0x19e0] sm:$0xff]  ;;  %2631 = vmatpush.msra.mxu2 %v981_v22  ;;  %2497 = vmatmul.f32.vlgmr.msrb.gmra.mxu0 %v5157_v28  ;;  %v630_v4 = vld [vmem:[#allocation6 + $0x6e8] sm:$0xff] }
 0x235   : > { %v453_v55 = vld [vmem:[#allocation6 + $0x160] sm:$0xff]  ;;  %2654 = vmatpush.msra.mxu3 %v1237_v23  ;;  %2520 = vmatmul.f32.vlgmr.msrb.gmra.mxu1 %v5160_v29  ;;  %v886_v5 = vld [vmem:[#allocation6 + $0xee8] sm:$0xff] }
 0x236   : > { %v709_v52 = vld [vmem:[#allocation6 + $0x960] sm:$0xff]  ;;  %2586 = vmatpush.msra.mxu0 %v453_v55  ;;  %2543 = vmatmul.f32.vlgmr.msrb.gmra.mxu2 %v5163_v0  ;;  %v1142_v28 = vld [vmem:[#allocation6 + $0x16e8] sm:$0xff] }
 0x237   : > { %v965_v53 = vld [vmem:[#allocation6 + $0x1160] sm:$0xff]  ;;  %2609 = vmatpush.msra.mxu1 %v709_v52  ;;  %2566 = vmatmul.f32.vlgmr.msrb.gmra.mxu3 %v5166_v1  ;;  %v1398_v29 = vld [vmem:[#allocation6 + $0x1ee8] sm:$0xff] }
 0x238   : > { %v1221_v62 = vld [vmem:[#allocation6 + $0x1960] sm:$0xff]  ;;  %2632 = vmatpush.msra.mxu2 %v965_v53  ;;  %v614_v18 = vld [vmem:[#allocation6 + $0x668] sm:$0xff] }
 0x239   : > { %v437_v11 = vld [vmem:[#allocation6 + $0xe0] sm:$0xff]  ;;  %2655 = vmatpush.msra.mxu3 %v1221_v62  ;;  %v870_v0 = vld [vmem:[#allocation6 + $0xe68] sm:$0xff] }
 0x23a   : > { %v693_v27 = vld [vmem:[#allocation6 + $0x8e0] sm:$0xff]  ;;  %2587 = vmatpush.msra.mxu0 %v437_v11  ;;  %v1126_v1 = vld [vmem:[#allocation6 + $0x1668] sm:$0xff] }
 0x23b   : > { %v949_v32 = vld [vmem:[#allocation6 + $0x10e0] sm:$0xff]  ;;  %2610 = vmatpush.msra.mxu1 %v693_v27  ;;  %v1382_v19 = vld [vmem:[#allocation6 + $0x1e68] sm:$0xff] }
 0x23c   : > { %v1205_v33 = vld [vmem:[#allocation6 + $0x18e0] sm:$0xff]  ;;  %2633 = vmatpush.msra.mxu2 %v949_v32  ;;  %v598_v20 = vld [vmem:[#allocation6 + $0x5e8] sm:$0xff]  ;;  %2500 = vmatmul.f32.gmra.mxu0 %v5169_v59 }
 0x23d   : > { %v421_v42 = vld [vmem:[#allocation6 + $0x60] sm:$0xff]  ;;  %2656 = vmatpush.msra.mxu3 %v1205_v33  ;;  %v854_v21 = vld [vmem:[#allocation6 + $0xde8] sm:$0xff]  ;;  %2523 = vmatmul.f32.gmra.mxu1 %v5172_v63 }
 0x23e   : > { %v677_v43 = vld [vmem:[#allocation6 + $0x860] sm:$0xff]  ;;  %2588 = vmatpush.msra.mxu0 %v421_v42  ;;  %v1110_v24 = vld [vmem:[#allocation6 + $0x15e8] sm:$0xff]  ;;  %2546 = vmatmul.f32.gmra.mxu2 %v5175_v14 }
 0x23f   : > { %v933_v46 = vld [vmem:[#allocation6 + $0x1060] sm:$0xff]  ;;  %2611 = vmatpush.msra.mxu1 %v677_v43  ;;  %v1366_v25 = vld [vmem:[#allocation6 + $0x1de8] sm:$0xff]  ;;  %2569 = vmatmul.f32.gmra.mxu3 %v5178_v15 }
 0x240   : > { %v1189_v47 = vld [vmem:[#allocation6 + $0x1860] sm:$0xff]  ;;  %2634 = vmatpush.msra.mxu2 %v933_v46  ;;  %2665 = vmatpush.msrb.mxu0 %v662_v31  ;;  %v582_v22 = vld [vmem:[#allocation6 + $0x568] sm:$0xff] }
 0x241   : > { %2657 = vmatpush.msra.mxu3 %v1189_v47  ;;  %2688 = vmatpush.msrb.mxu1 %v918_v48  ;;  %v838_v23 = vld [vmem:[#allocation6 + $0xd68] sm:$0xff] }
 0x242   : > { %2711 = vmatpush.msrb.mxu2 %v1174_v34  ;;  %2666 = vmatpush.msrb.mxu0 %v646_v49  ;;  %v1094_v55 = vld [vmem:[#allocation6 + $0x1568] sm:$0xff] }
 0x243   : > { %2734 = vmatpush.msrb.mxu3 %v1430_v35  ;;  %2689 = vmatpush.msrb.mxu1 %v902_v50  ;;  %v1350_v52 = vld [vmem:[#allocation6 + $0x1d68] sm:$0xff] }
 0x244   : > { %2712 = vmatpush.msrb.mxu2 %v1158_v51  ;;  %2667 = vmatpush.msrb.mxu0 %v630_v4  ;;  %v566_v53 = vld [vmem:[#allocation6 + $0x4e8] sm:$0xff] }
 0x245   : > { %2735 = vmatpush.msrb.mxu3 %v1414_v58  ;;  %2690 = vmatpush.msrb.mxu1 %v886_v5  ;;  %v822_v62 = vld [vmem:[#allocation6 + $0xce8] sm:$0xff] }
 0x246   : > { %2713 = vmatpush.msrb.mxu2 %v1142_v28  ;;  %2668 = vmatpush.msrb.mxu0 %v614_v18  ;;  %v1078_v11 = vld [vmem:[#allocation6 + $0x14e8] sm:$0xff] }
 0x247   : > { %2736 = vmatpush.msrb.mxu3 %v1398_v29  ;;  %2691 = vmatpush.msrb.mxu1 %v870_v0  ;;  %v1334_v27 = vld [vmem:[#allocation6 + $0x1ce8] sm:$0xff] }
 0x248   : > { %2714 = vmatpush.msrb.mxu2 %v1126_v1  ;;  %2669 = vmatpush.msrb.mxu0 %v598_v20  ;;  %v550_v32 = vld [vmem:[#allocation6 + $0x468] sm:$0xff] }
 0x249   : > { %2737 = vmatpush.msrb.mxu3 %v1382_v19  ;;  %2692 = vmatpush.msrb.mxu1 %v854_v21  ;;  %v806_v33 = vld [vmem:[#allocation6 + $0xc68] sm:$0xff] }
 0x24a   : > { %2715 = vmatpush.msrb.mxu2 %v1110_v24  ;;  %2670 = vmatpush.msrb.mxu0 %v582_v22  ;;  %v1062_v42 = vld [vmem:[#allocation6 + $0x1468] sm:$0xff] }
 0x24b   : > { %2738 = vmatpush.msrb.mxu3 %v1366_v25  ;;  %2693 = vmatpush.msrb.mxu1 %v838_v23  ;;  %v1318_v43 = vld [vmem:[#allocation6 + $0x1c68] sm:$0xff] }
 0x24c   : > { %2716 = vmatpush.msrb.mxu2 %v1094_v55  ;;  %2671 = vmatpush.msrb.mxu0 %v566_v53  ;;  %v534_v46 = vld [vmem:[#allocation6 + $0x3e8] sm:$0xff] }
 0x24d   : > { %2739 = vmatpush.msrb.mxu3 %v1350_v52  ;;  %2694 = vmatpush.msrb.mxu1 %v822_v62  ;;  %v790_v47 = vld [vmem:[#allocation6 + $0xbe8] sm:$0xff] }
 0x24e   : > { %2717 = vmatpush.msrb.mxu2 %v1078_v11  ;;  %2672 = vmatpush.msrb.mxu0 %v550_v32  ;;  %v1046_v31 = vld [vmem:[#allocation6 + $0x13e8] sm:$0xff]  ;;  %v663_v11 = vld [vmem:[#allocation6 + $0x7f0] sm:$0xff]  ;;  %v5205_v32 = vld [vmem:[#allocation3] sm:$0xff] }
 0x24f   : > { %2740 = vmatpush.msrb.mxu3 %v1334_v27  ;;  %2695 = vmatpush.msrb.mxu1 %v806_v33  ;;  %v1302_v48 = vld [vmem:[#allocation6 + $0x1be8] sm:$0xff]  ;;  %v919_v27 = vld [vmem:[#allocation6 + $0xff0] sm:$0xff] }
 0x250   : > { %2718 = vmatpush.msrb.mxu2 %v1062_v42  ;;  %v518_v34 = vld [vmem:[#allocation6 + $0x368] sm:$0xff]  ;;  %2673 = vmatpush.msrb.mxu0 %v534_v46  ;;  %v1175_v42 = vld [vmem:[#allocation6 + $0x17f0] sm:$0xff] }
 0x251   : > { %2741 = vmatpush.msrb.mxu3 %v1318_v43  ;;  %v774_v35 = vld [vmem:[#allocation6 + $0xb68] sm:$0xff]  ;;  %2696 = vmatpush.msrb.mxu1 %v790_v47  ;;  %v1431_v43 = vld [vmem:[#allocation6 + $0x1ff0] sm:$0xff]  ;;  %v5214_v47 = vld [vmem:[#allocation3 + $0x18] sm:$0xff] }
 0x252   : > { %v1030_v49 = vld [vmem:[#allocation6 + $0x1368] sm:$0xff]  ;;  %2719 = vmatpush.msrb.mxu2 %v1046_v31  ;;  %2674 = vmatpush.msrb.mxu0 %v518_v34  ;;  %v5211_v46 = vld [vmem:[#allocation3 + $0x10] sm:$0xff] }
 0x253   : > { %v1286_v50 = vld [vmem:[#allocation6 + $0x1b68] sm:$0xff]  ;;  %2742 = vmatpush.msrb.mxu3 %v1302_v48  ;;  %2697 = vmatpush.msrb.mxu1 %v774_v35  ;;  %v647_v31 = vld [vmem:[#allocation6 + $0x770] sm:$0xff] }
 0x254   : > { %v502_v51 = vld [vmem:[#allocation6 + $0x2e8] sm:$0xff]  ;;  %2720 = vmatpush.msrb.mxu2 %v1030_v49  ;;  %2589 = vmatmul.f32.vlgmr.msra.gmra.mxu0 %v5205_v32  ;;  %v903_v48 = vld [vmem:[#allocation6 + $0xf70] sm:$0xff] }
 0x255   : > { %v758_v58 = vld [vmem:[#allocation6 + $0xae8] sm:$0xff]  ;;  %2743 = vmatpush.msrb.mxu3 %v1286_v50  ;;  %2675 = vmatpush.msrb.mxu0 %v502_v51  ;;  %v1159_v34 = vld [vmem:[#allocation6 + $0x1770] sm:$0xff] }
 0x256   : > { %v1014_v4 = vld [vmem:[#allocation6 + $0x12e8] sm:$0xff]  ;;  %2698 = vmatpush.msrb.mxu1 %v758_v58  ;;  %2635 = vmatmul.f32.vlgmr.msra.gmra.mxu2 %v5211_v46  ;;  %v1415_v35 = vld [vmem:[#allocation6 + $0x1f70] sm:$0xff] }
 0x257   : > { %v1270_v5 = vld [vmem:[#allocation6 + $0x1ae8] sm:$0xff]  ;;  %2721 = vmatpush.msrb.mxu2 %v1014_v4  ;;  %2658 = vmatmul.f32.vlgmr.msra.gmra.mxu3 %v5214_v47  ;;  %v631_v49 = vld [vmem:[#allocation6 + $0x6f0] sm:$0xff] }
 0x258   : > { %v486_v28 = vld [vmem:[#allocation6 + $0x268] sm:$0xff]  ;;  %2744 = vmatpush.msrb.mxu3 %v1270_v5  ;;  %v887_v50 = vld [vmem:[#allocation6 + $0xef0] sm:$0xff] }
 0x259   : > { %v742_v29 = vld [vmem:[#allocation6 + $0xa68] sm:$0xff]  ;;  %2676 = vmatpush.msrb.mxu0 %v486_v28  ;;  %v1143_v51 = vld [vmem:[#allocation6 + $0x16f0] sm:$0xff] }
 0x25a   : > { %v998_v18 = vld [vmem:[#allocation6 + $0x1268] sm:$0xff]  ;;  %2699 = vmatpush.msrb.mxu1 %v742_v29  ;;  %v1399_v58 = vld [vmem:[#allocation6 + $0x1ef0] sm:$0xff] }
 0x25b   : > { %v1254_v0 = vld [vmem:[#allocation6 + $0x1a68] sm:$0xff]  ;;  %2722 = vmatpush.msrb.mxu2 %v998_v18  ;;  %v615_v4 = vld [vmem:[#allocation6 + $0x670] sm:$0xff] }
 0x25c   : > { %2745 = vmatpush.msrb.mxu3 %v1254_v0  ;;  %v470_v1 = vld [vmem:[#allocation6 + $0x1e8] sm:$0xff]  ;;  %v871_v5 = vld [vmem:[#allocation6 + $0xe70] sm:$0xff] }
 0x25d   : > { %v726_v19 = vld [vmem:[#allocation6 + $0x9e8] sm:$0xff]  ;;  %2677 = vmatpush.msrb.mxu0 %v470_v1  ;;  %v1127_v28 = vld [vmem:[#allocation6 + $0x1670] sm:$0xff] }
 0x25e   : > { %v982_v20 = vld [vmem:[#allocation6 + $0x11e8] sm:$0xff]  ;;  %2700 = vmatpush.msrb.mxu1 %v726_v19  ;;  %v1383_v29 = vld [vmem:[#allocation6 + $0x1e70] sm:$0xff] }
 0x25f   : > { %v1238_v21 = vld [vmem:[#allocation6 + $0x19e8] sm:$0xff]  ;;  %2723 = vmatpush.msrb.mxu2 %v982_v20  ;;  %v599_v18 = vld [vmem:[#allocation6 + $0x5f0] sm:$0xff] }
 0x260   : > { %v454_v24 = vld [vmem:[#allocation6 + $0x168] sm:$0xff]  ;;  %2746 = vmatpush.msrb.mxu3 %v1238_v21  ;;  %v855_v0 = vld [vmem:[#allocation6 + $0xdf0] sm:$0xff] }
 0x261   : > { %v710_v25 = vld [vmem:[#allocation6 + $0x968] sm:$0xff]  ;;  %2678 = vmatpush.msrb.mxu0 %v454_v24  ;;  %v1111_v1 = vld [vmem:[#allocation6 + $0x15f0] sm:$0xff] }
 0x262   : > { %v966_v22 = vld [vmem:[#allocation6 + $0x1168] sm:$0xff]  ;;  %2701 = vmatpush.msrb.mxu1 %v710_v25  ;;  %v1367_v19 = vld [vmem:[#allocation6 + $0x1df0] sm:$0xff] }
 0x263   : > { %v1222_v23 = vld [vmem:[#allocation6 + $0x1968] sm:$0xff]  ;;  %2724 = vmatpush.msrb.mxu2 %v966_v22  ;;  %v583_v20 = vld [vmem:[#allocation6 + $0x570] sm:$0xff]  ;;  %v5217_v22 = vpop.f32.mrf.mxu0 }
 0x264   : > { %v438_v55 = vld [vmem:[#allocation6 + $0xe8] sm:$0xff]  ;;  %2747 = vmatpush.msrb.mxu3 %v1222_v23  ;;  %v839_v21 = vld [vmem:[#allocation6 + $0xd70] sm:$0xff] }
 0x265   : > { %v694_v52 = vld [vmem:[#allocation6 + $0x8e8] sm:$0xff]  ;;  %2679 = vmatpush.msrb.mxu0 %v438_v55  ;;  %v1095_v24 = vld [vmem:[#allocation6 + $0x1570] sm:$0xff] }
 0x266   : > { %v950_v59 = vld [vmem:[#allocation6 + $0x10e8] sm:$0xff]  ;;  %2702 = vmatpush.msrb.mxu1 %v694_v52  ;;  %v1351_v25 = vld [vmem:[#allocation6 + $0x1d70] sm:$0xff] }
 0x267   : > { %v1206_v63 = vld [vmem:[#allocation6 + $0x18e8] sm:$0xff]  ;;  %2725 = vmatpush.msrb.mxu2 %v950_v59  ;;  %v567_v23 = vld [vmem:[#allocation6 + $0x4f0] sm:$0xff] }
 0x268   : > { %v422_v53 = vld [vmem:[#allocation6 + $0x68] sm:$0xff]  ;;  %2748 = vmatpush.msrb.mxu3 %v1206_v63  ;;  %v823_v55 = vld [vmem:[#allocation6 + $0xcf0] sm:$0xff] }
 0x269   : > { %v678_v14 = vld [vmem:[#allocation6 + $0x868] sm:$0xff]  ;;  %2680 = vmatpush.msrb.mxu0 %v422_v53  ;;  %v1079_v52 = vld [vmem:[#allocation6 + $0x14f0] sm:$0xff] }
 0x26a   : > { %v934_v15 = vld [vmem:[#allocation6 + $0x1068] sm:$0xff]  ;;  %2703 = vmatpush.msrb.mxu1 %v678_v14  ;;  %v1335_v59 = vld [vmem:[#allocation6 + $0x1cf0] sm:$0xff] }
 0x26b   : > { %v1190_v62 = vld [vmem:[#allocation6 + $0x1868] sm:$0xff]  ;;  %2726 = vmatpush.msrb.mxu2 %v934_v15  ;;  %2757 = vmatpush.msra.mxu0 %v663_v11  ;;  %v551_v63 = vld [vmem:[#allocation6 + $0x470] sm:$0xff] }
 0x26c   : > { %2749 = vmatpush.msrb.mxu3 %v1190_v62  ;;  %v5208_v33 = vld [vmem:[#allocation3 + $0x8] sm:$0xff]  ;;  %v807_v53 = vld [vmem:[#allocation6 + $0xc70] sm:$0xff]  ;;  %v5219_v62 = vpop.f32.mrf.mxu1 }
 0x26d   : > { %2612 = vmatmul.f32.vlgmr.msra.gmra.mxu1 %v5208_v33  ;;  %2803 = vmatpush.msra.mxu2 %v1175_v42  ;;  %v1063_v14 = vld [vmem:[#allocation6 + $0x1470] sm:$0xff] }
 0x26e   : > { %2780 = vmatpush.msra.mxu1 %v919_v27  ;;  %2826 = vmatpush.msra.mxu3 %v1431_v43  ;;  %v1319_v15 = vld [vmem:[#allocation6 + $0x1c70] sm:$0xff] }
 0x26f   : > { %2758 = vmatpush.msra.mxu0 %v647_v31  ;;  %2804 = vmatpush.msra.mxu2 %v1159_v34  ;;  %v535_v11 = vld [vmem:[#allocation6 + $0x3f0] sm:$0xff] }
 0x270   : > { %2781 = vmatpush.msra.mxu1 %v903_v48  ;;  %2827 = vmatpush.msra.mxu3 %v1415_v35  ;;  %v791_v27 = vld [vmem:[#allocation6 + $0xbf0] sm:$0xff] }
 0x271   : > { %2759 = vmatpush.msra.mxu0 %v631_v49  ;;  %2805 = vmatpush.msra.mxu2 %v1143_v51  ;;  %v1047_v42 = vld [vmem:[#allocation6 + $0x13f0] sm:$0xff]  ;;  %v5221_v49 = vpop.f32.mrf.mxu2 }
 0x272   : > { %2782 = vmatpush.msra.mxu1 %v887_v50  ;;  %2828 = vmatpush.msra.mxu3 %v1399_v58  ;;  %v1303_v43 = vld [vmem:[#allocation6 + $0x1bf0] sm:$0xff]  ;;  %v5223_v50 = vpop.f32.mrf.mxu0 }
 0x273   : > { %2760 = vmatpush.msra.mxu0 %v615_v4  ;;  %2806 = vmatpush.msra.mxu2 %v1127_v28  ;;  %v519_v31 = vld [vmem:[#allocation6 + $0x370] sm:$0xff] }
 0x274   : > { %2783 = vmatpush.msra.mxu1 %v871_v5  ;;  %2829 = vmatpush.msra.mxu3 %v1383_v29  ;;  %v775_v48 = vld [vmem:[#allocation6 + $0xb70] sm:$0xff] }
 0x275   : > { %2761 = vmatpush.msra.mxu0 %v599_v18  ;;  %2807 = vmatpush.msra.mxu2 %v1111_v1  ;;  %v1031_v34 = vld [vmem:[#allocation6 + $0x1370] sm:$0xff]  ;;  %v5227_v1 = vpop.f32.mrf.mxu1 }
 0x276   : > { %2784 = vmatpush.msra.mxu1 %v855_v0  ;;  %2830 = vmatpush.msra.mxu3 %v1367_v19  ;;  %v1287_v35 = vld [vmem:[#allocation6 + $0x1b70] sm:$0xff]  ;;  %v5225_v0 = vpop.f32.mrf.mxu3  ;;  %6483 = vst [vmem:[#allocation23_spill] sm:$0xff] %v5227_v1  ;;  %v3067_v1 = vld [vmem:[%s4996_s9 + $0x2f0] sm:$0xff] }
 0x277   : > { %2762 = vmatpush.msra.mxu0 %v583_v20  ;;  %2808 = vmatpush.msra.mxu2 %v1095_v24  ;;  %v503_v51 = vld [vmem:[#allocation6 + $0x2f0] sm:$0xff] }
 0x278   : > { %2785 = vmatpush.msra.mxu1 %v839_v21  ;;  %2831 = vmatpush.msra.mxu3 %v1351_v25  ;;  %v759_v58 = vld [vmem:[#allocation6 + $0xaf0] sm:$0xff]  ;;  %v5232_v25 = vld [vmem:[#allocation3 + $0x20] sm:$0xff] }
 0x279   : > { %2763 = vmatpush.msra.mxu0 %v567_v23  ;;  %2809 = vmatpush.msra.mxu2 %v1079_v52  ;;  %v1015_v4 = vld [vmem:[#allocation6 + $0x12f0] sm:$0xff]  ;;  %v5235_v52 = vpop.f32.mrf.mxu2 }
 0x27a   : > { %2786 = vmatpush.msra.mxu1 %v823_v55  ;;  %2832 = vmatpush.msra.mxu3 %v1335_v59  ;;  %v1271_v5 = vld [vmem:[#allocation6 + $0x1af0] sm:$0xff]  ;;  %6484 = vst [vmem:[#allocation24_spill] sm:$0xff] %v5235_v52  ;;  %v5237_v59 = vld [vmem:[#allocation3 + $0x28] sm:$0xff]  ;;  %v1256_v52 = vld [vmem:[#allocation6 + $0x1a78] sm:$0xff] }
 0x27b   : > { %2764 = vmatpush.msra.mxu0 %v551_v63  ;;  %2810 = vmatpush.msra.mxu2 %v1063_v14  ;;  %v487_v28 = vld [vmem:[#allocation6 + $0x270] sm:$0xff]  ;;  %v5240_v63 = vld [vmem:[#allocation3 + $0x38] sm:$0xff] }
 0x27c   : > { %2787 = vmatpush.msra.mxu1 %v807_v53  ;;  %2833 = vmatpush.msra.mxu3 %v1319_v15  ;;  %v743_v29 = vld [vmem:[#allocation6 + $0xa70] sm:$0xff] }
 0x27d   : > { %2765 = vmatpush.msra.mxu0 %v535_v11  ;;  %2811 = vmatpush.msra.mxu2 %v1047_v42  ;;  %v999_v18 = vld [vmem:[#allocation6 + $0x1270] sm:$0xff] }
 0x27e   : > { %2788 = vmatpush.msra.mxu1 %v791_v27  ;;  %2834 = vmatpush.msra.mxu3 %v1303_v43  ;;  %v1255_v19 = vld [vmem:[#allocation6 + $0x1a70] sm:$0xff]  ;;  %v5243_v27 = vpop.f32.mrf.mxu0 }
 0x27f   : > { %2766 = vmatpush.msra.mxu0 %v519_v31  ;;  %2812 = vmatpush.msra.mxu2 %v1031_v34  ;;  %v5229_v20 = vld [vmem:[#allocation3 + $0x30] sm:$0xff]  ;;  %v5245_v34 = vpop.f32.mrf.mxu3 }
 0x280   : > { %2789 = vmatpush.msra.mxu1 %v775_v48  ;;  %2835 = vmatpush.msra.mxu3 %v1287_v35  ;;  %v471_v21 = vld [vmem:[#allocation6 + $0x1f0] sm:$0xff]  ;;  %6485 = vst [vmem:[#allocation25_spill] sm:$0xff] %v5245_v34 }
 0x281   : > { %2767 = vmatpush.msra.mxu0 %v503_v51  ;;  %2813 = vmatpush.msra.mxu2 %v1015_v4  ;;  %v727_v24 = vld [vmem:[#allocation6 + $0x9f0] sm:$0xff]  ;;  %v5247_v4 = vpop.f32.mrf.mxu1 }
 0x282   : > { %2790 = vmatpush.msra.mxu1 %v759_v58  ;;  %2836 = vmatpush.msra.mxu3 %v1271_v5  ;;  %v983_v23 = vld [vmem:[#allocation6 + $0x11f0] sm:$0xff] }
 0x283   : > { %2638 = vmatmul.f32.gmra.mxu2 %v5229_v20  ;;  %2768 = vmatpush.msra.mxu0 %v487_v28  ;;  %v1239_v55 = vld [vmem:[#allocation6 + $0x19f0] sm:$0xff]  ;;  %v664_v28 = vld [vmem:[#allocation6 + $0x7f8] sm:$0xff] }
 0x284   : > { %2791 = vmatpush.msra.mxu1 %v743_v29  ;;  %2814 = vmatpush.msra.mxu2 %v999_v18  ;;  %v455_v53 = vld [vmem:[#allocation6 + $0x170] sm:$0xff]  ;;  %v920_v29 = vld [vmem:[#allocation6 + $0xff8] sm:$0xff] }
 0x285   : > { %2837 = vmatpush.msra.mxu3 %v1255_v19  ;;  %2592 = vmatmul.f32.gmra.mxu0 %v5232_v25  ;;  %v711_v14 = vld [vmem:[#allocation6 + $0x970] sm:$0xff]  ;;  %v1176_v18 = vld [vmem:[#allocation6 + $0x17f8] sm:$0xff] }
 0x286   : > { %2615 = vmatmul.f32.gmra.mxu1 %v5237_v59  ;;  %2661 = vmatmul.f32.gmra.mxu3 %v5240_v63  ;;  %v967_v15 = vld [vmem:[#allocation6 + $0x1170] sm:$0xff]  ;;  %v1432_v19 = vld [vmem:[#allocation6 + $0x1ff8] sm:$0xff] }
 0x287   : > { %2769 = vmatpush.msra.mxu0 %v471_v21  ;;  %2792 = vmatpush.msra.mxu1 %v727_v24  ;;  %v1223_v11 = vld [vmem:[#allocation6 + $0x1970] sm:$0xff]  ;;  %v5251_v21 = vpop.f32.mrf.mxu2  ;;  %v5253_v24 = vpop.f32.mrf.mxu0 }
 0x288   : > { %2815 = vmatpush.msra.mxu2 %v983_v23  ;;  %2838 = vmatpush.msra.mxu3 %v1239_v55  ;;  %v439_v42 = vld [vmem:[#allocation6 + $0xf0] sm:$0xff]  ;;  %v648_v23 = vld [vmem:[#allocation6 + $0x778] sm:$0xff] }
 0x289   : > { %v695_v43 = vld [vmem:[#allocation6 + $0x8f0] sm:$0xff]  ;;  %2770 = vmatpush.msra.mxu0 %v455_v53  ;;  %2793 = vmatpush.msra.mxu1 %v711_v14  ;;  %v904_v55 = vld [vmem:[#allocation6 + $0xf78] sm:$0xff] }
 0x28a   : > { %v951_v31 = vld [vmem:[#allocation6 + $0x10f0] sm:$0xff]  ;;  %2816 = vmatpush.msra.mxu2 %v967_v15  ;;  %2839 = vmatpush.msra.mxu3 %v1223_v11  ;;  %v1160_v53 = vld [vmem:[#allocation6 + $0x1778] sm:$0xff] }
 0x28b   : > { %v1207_v48 = vld [vmem:[#allocation6 + $0x18f0] sm:$0xff]  ;;  %2771 = vmatpush.msra.mxu0 %v439_v42  ;;  %2794 = vmatpush.msra.mxu1 %v695_v43  ;;  %v1416_v14 = vld [vmem:[#allocation6 + $0x1f78] sm:$0xff] }
 0x28c   : > { %v423_v35 = vld [vmem:[#allocation6 + $0x70] sm:$0xff]  ;;  %2817 = vmatpush.msra.mxu2 %v951_v31  ;;  %2840 = vmatpush.msra.mxu3 %v1207_v48  ;;  %v632_v15 = vld [vmem:[#allocation6 + $0x6f8] sm:$0xff]  ;;  %v5257_v31 = vpop.f32.mrf.mxu3  ;;  %v5259_v48 = vpop.f32.mrf.mxu1 }
 0x28d   : > { %v679_v51 = vld [vmem:[#allocation6 + $0x870] sm:$0xff]  ;;  %2727 = vmatmul.f32.vlgmr.msrb.gmra.mxu2 %v5211_v46  ;;  %2772 = vmatpush.msra.mxu0 %v423_v35  ;;  %v888_v11 = vld [vmem:[#allocation6 + $0xef8] sm:$0xff]  ;;  %6486 = vst [vmem:[#allocation26_spill] sm:$0xff] %v5259_v48 }
 0x28e   : > { %v935_v58 = vld [vmem:[#allocation6 + $0x1070] sm:$0xff]  ;;  %2795 = vmatpush.msra.mxu1 %v679_v51  ;;  %2681 = vmatmul.f32.vlgmr.msrb.gmra.mxu0 %v5205_v32  ;;  %v1144_v42 = vld [vmem:[#allocation6 + $0x16f8] sm:$0xff] }
 0x28f   : > { %v1191_v5 = vld [vmem:[#allocation6 + $0x1870] sm:$0xff]  ;;  %2818 = vmatpush.msra.mxu2 %v935_v58  ;;  %2704 = vmatmul.f32.vlgmr.msrb.gmra.mxu1 %v5208_v33  ;;  %v1400_v43 = vld [vmem:[#allocation6 + $0x1ef8] sm:$0xff] }
 0x290   : > { %2841 = vmatpush.msra.mxu3 %v1191_v5  ;;  %2849 = vmatpush.msrb.mxu0 %v664_v28  ;;  %v616_v35 = vld [vmem:[#allocation6 + $0x678] sm:$0xff] }
 0x291   : > { %2750 = vmatmul.f32.vlgmr.msrb.gmra.mxu3 %v5214_v47  ;;  %2872 = vmatpush.msrb.mxu1 %v920_v29  ;;  %v872_v51 = vld [vmem:[#allocation6 + $0xe78] sm:$0xff] }
 0x292   : > { %2895 = vmatpush.msrb.mxu2 %v1176_v18  ;;  %2918 = vmatpush.msrb.mxu3 %v1432_v19  ;;  %v1128_v58 = vld [vmem:[#allocation6 + $0x1678] sm:$0xff]  ;;  %v5261_v19 = vpop.f32.mrf.mxu2 }
 0x293   : > { %2850 = vmatpush.msrb.mxu0 %v648_v23  ;;  %2873 = vmatpush.msrb.mxu1 %v904_v55  ;;  %v1384_v5 = vld [vmem:[#allocation6 + $0x1e78] sm:$0xff]  ;;  %6487 = vst [vmem:[#allocation27_spill] sm:$0xff] %v5261_v19 }
 0x294   : > { %2896 = vmatpush.msrb.mxu2 %v1160_v53  ;;  %2919 = vmatpush.msrb.mxu3 %v1416_v14  ;;  %v600_v28 = vld [vmem:[#allocation6 + $0x5f8] sm:$0xff]  ;;  %v5264_v53 = vpop.f32.mrf.mxu0 }
 0x295   : > { %2851 = vmatpush.msrb.mxu0 %v632_v15  ;;  %2874 = vmatpush.msrb.mxu1 %v888_v11  ;;  %v856_v29 = vld [vmem:[#allocation6 + $0xdf8] sm:$0xff] }
 0x296   : > { %2897 = vmatpush.msrb.mxu2 %v1144_v42  ;;  %2920 = vmatpush.msrb.mxu3 %v1400_v43  ;;  %v1112_v18 = vld [vmem:[#allocation6 + $0x15f8] sm:$0xff]  ;;  %v5267_v42 = vpop.f32.mrf.mxu3 }
 0x297   : > { %2852 = vmatpush.msrb.mxu0 %v616_v35  ;;  %2875 = vmatpush.msrb.mxu1 %v872_v51  ;;  %v1368_v23 = vld [vmem:[#allocation6 + $0x1df8] sm:$0xff]  ;;  %6488 = vst [vmem:[#allocation28_spill] sm:$0xff] %v5267_v42 }
 0x298   : > { %2898 = vmatpush.msrb.mxu2 %v1128_v58  ;;  %2921 = vmatpush.msrb.mxu3 %v1384_v5  ;;  %v584_v55 = vld [vmem:[#allocation6 + $0x578] sm:$0xff]  ;;  %v5270_v5 = vpop.f32.mrf.mxu1 }
 0x299   : > { %2730 = vmatmul.f32.gmra.mxu2 %v5229_v20  ;;  %2853 = vmatpush.msrb.mxu0 %v600_v28  ;;  %v840_v14 = vld [vmem:[#allocation6 + $0xd78] sm:$0xff] }
 0x29a   : > { %2876 = vmatpush.msrb.mxu1 %v856_v29  ;;  %2899 = vmatpush.msrb.mxu2 %v1112_v18  ;;  %v1096_v15 = vld [vmem:[#allocation6 + $0x1578] sm:$0xff]  ;;  %v5273_v42 = vpop.f32.mrf.mxu2 }
 0x29b   : > { %2922 = vmatpush.msrb.mxu3 %v1368_v23  ;;  %2684 = vmatmul.f32.gmra.mxu0 %v5232_v25  ;;  %v1352_v11 = vld [vmem:[#allocation6 + $0x1d78] sm:$0xff] }
 0x29c   : > { %2753 = vmatmul.f32.gmra.mxu3 %v5240_v63  ;;  %2854 = vmatpush.msrb.mxu0 %v584_v55  ;;  %v568_v43 = vld [vmem:[#allocation6 + $0x4f8] sm:$0xff]  ;;  %v5275_v34 = vpop.f32.mrf.mxu0 }
 0x29d   : > { %v824_v35 = vld [vmem:[#allocation6 + $0xcf8] sm:$0xff]  ;;  %2877 = vmatpush.msrb.mxu1 %v840_v14  ;;  %2900 = vmatpush.msrb.mxu2 %v1096_v15 }
 0x29e   : > { %v1080_v51 = vld [vmem:[#allocation6 + $0x14f8] sm:$0xff]  ;;  %2923 = vmatpush.msrb.mxu3 %v1352_v11  ;;  %2707 = vmatmul.f32.gmra.mxu1 %v5237_v59 }
 0x29f   : > { %v1336_v58 = vld [vmem:[#allocation6 + $0x1cf8] sm:$0xff]  ;;  %2855 = vmatpush.msrb.mxu0 %v568_v43  ;;  %2878 = vmatpush.msrb.mxu1 %v824_v35 }
 0x2a0   : > { %v552_v28 = vld [vmem:[#allocation6 + $0x478] sm:$0xff]  ;;  %2901 = vmatpush.msrb.mxu2 %v1080_v51  ;;  %2924 = vmatpush.msrb.mxu3 %v1336_v58 }
 0x2a1   : > { %v808_v29 = vld [vmem:[#allocation6 + $0xc78] sm:$0xff]  ;;  %2856 = vmatpush.msrb.mxu0 %v552_v28  ;;  %2819 = vmatmul.f32.vlgmr.msra.gmra.mxu2 %v5211_v46  ;;  %v5279_v28 = vpop.f32.mrf.mxu3 }
 0x2a2   : > { %v1064_v18 = vld [vmem:[#allocation6 + $0x1478] sm:$0xff]  ;;  %2879 = vmatpush.msrb.mxu1 %v808_v29  ;;  %v5281_v29 = vpop.f32.mrf.mxu1  ;;  %v5285_v48 = vpop.f32.mrf.mxu2 }
 0x2a3   : > { %v1320_v23 = vld [vmem:[#allocation6 + $0x1c78] sm:$0xff]  ;;  %2902 = vmatpush.msrb.mxu2 %v1064_v18  ;;  %2773 = vmatmul.f32.vlgmr.msra.gmra.mxu0 %v5205_v32  ;;  %6489 = vst [vmem:[#allocation29_spill] sm:$0xff] %v5281_v29 }
 0x2a4   : > { %v536_v55 = vld [vmem:[#allocation6 + $0x3f8] sm:$0xff]  ;;  %2925 = vmatpush.msrb.mxu3 %v1320_v23  ;;  %6490 = vst [vmem:[#allocation30_spill] sm:$0xff] %v5285_v48  ;;  %v5287_v29 = vpop.f32.mrf.mxu0 }
 0x2a5   : > { %v792_v14 = vld [vmem:[#allocation6 + $0xbf8] sm:$0xff]  ;;  %2857 = vmatpush.msrb.mxu0 %v536_v55  ;;  %2842 = vmatmul.f32.vlgmr.msra.gmra.mxu3 %v5214_v47 }
 0x2a6   : > { %v1048_v15 = vld [vmem:[#allocation6 + $0x13f8] sm:$0xff]  ;;  %2880 = vmatpush.msrb.mxu1 %v792_v14 }
 0x2a7   : > { %v1304_v11 = vld [vmem:[#allocation6 + $0x1bf8] sm:$0xff]  ;;  %2903 = vmatpush.msrb.mxu2 %v1048_v15  ;;  %2796 = vmatmul.f32.vlgmr.msra.gmra.mxu1 %v5208_v33 }
 0x2a8   : > { %v520_v43 = vld [vmem:[#allocation6 + $0x378] sm:$0xff]  ;;  %2926 = vmatpush.msrb.mxu3 %v1304_v11 }
 0x2a9   : > { %v776_v35 = vld [vmem:[#allocation6 + $0xb78] sm:$0xff]  ;;  %2858 = vmatpush.msrb.mxu0 %v520_v43  ;;  %2822 = vmatmul.f32.gmra.mxu2 %v5229_v20 }
 0x2aa   : > { %v1032_v51 = vld [vmem:[#allocation6 + $0x1378] sm:$0xff]  ;;  %2881 = vmatpush.msrb.mxu1 %v776_v35  ;;  %v5297_v48 = vpop.f32.mrf.mxu2 }
 0x2ab   : > { %v1288_v58 = vld [vmem:[#allocation6 + $0x1b78] sm:$0xff]  ;;  %2904 = vmatpush.msrb.mxu2 %v1032_v51  ;;  %2776 = vmatmul.f32.gmra.mxu0 %v5232_v25 }
 0x2ac   : > { %v504_v18 = vld [vmem:[#allocation6 + $0x2f8] sm:$0xff]  ;;  %2927 = vmatpush.msrb.mxu3 %v1288_v58 }
 0x2ad   : > { %v760_v23 = vld [vmem:[#allocation6 + $0xaf8] sm:$0xff]  ;;  %2859 = vmatpush.msrb.mxu0 %v504_v18  ;;  %2845 = vmatmul.f32.gmra.mxu3 %v5240_v63 }
 0x2ae   : > { %v1016_v55 = vld [vmem:[#allocation6 + $0x12f8] sm:$0xff]  ;;  %2882 = vmatpush.msrb.mxu1 %v760_v23  ;;  %v5290_v23 = vpop.f32.mrf.mxu3 }
 0x2af   : > { %v1272_v14 = vld [vmem:[#allocation6 + $0x1af8] sm:$0xff]  ;;  %2905 = vmatpush.msrb.mxu2 %v1016_v55  ;;  %6491 = vst [vmem:[#allocation31_spill] sm:$0xff] %v5290_v23  ;;  %2799 = vmatmul.f32.gmra.mxu1 %v5237_v59 }
 0x2b0   : > { %v488_v15 = vld [vmem:[#allocation6 + $0x278] sm:$0xff]  ;;  %2928 = vmatpush.msrb.mxu3 %v1272_v14 }
 0x2b1   : > { %v744_v11 = vld [vmem:[#allocation6 + $0xa78] sm:$0xff]  ;;  %2860 = vmatpush.msrb.mxu0 %v488_v15 }
 0x2b2   : > { %v1000_v19 = vld [vmem:[#allocation6 + $0x1278] sm:$0xff]  ;;  %2883 = vmatpush.msrb.mxu1 %v744_v11  ;;  %2929 = vmatpush.msrb.mxu3 %v1256_v52  ;;  %v5293_v11 = vpop.f32.mrf.mxu1 }
 0x2b3   : > { %v472_v43 = vld [vmem:[#allocation6 + $0x1f8] sm:$0xff]  ;;  %2906 = vmatpush.msrb.mxu2 %v1000_v19 }
 0x2b4   : > { %v728_v35 = vld [vmem:[#allocation6 + $0x9f8] sm:$0xff]  ;;  %2861 = vmatpush.msrb.mxu0 %v472_v43 }
 0x2b5   : > { %v984_v51 = vld [vmem:[#allocation6 + $0x11f8] sm:$0xff]  ;;  %2884 = vmatpush.msrb.mxu1 %v728_v35 }
 0x2b6   : > { %v1240_v58 = vld [vmem:[#allocation6 + $0x19f8] sm:$0xff]  ;;  %2907 = vmatpush.msrb.mxu2 %v984_v51 }
 0x2b7   : > { %v456_v18 = vld [vmem:[#allocation6 + $0x178] sm:$0xff]  ;;  %2930 = vmatpush.msrb.mxu3 %v1240_v58 }
 0x2b8   : > { %v712_v55 = vld [vmem:[#allocation6 + $0x978] sm:$0xff]  ;;  %2862 = vmatpush.msrb.mxu0 %v456_v18 }
 0x2b9   : > { %v968_v14 = vld [vmem:[#allocation6 + $0x1178] sm:$0xff]  ;;  %2885 = vmatpush.msrb.mxu1 %v712_v55  ;;  %v5299_v55 = vpop.f32.mrf.mxu0 }
 0x2ba   : > { %v1224_v15 = vld [vmem:[#allocation6 + $0x1978] sm:$0xff]  ;;  %2908 = vmatpush.msrb.mxu2 %v968_v14  ;;  %v3003_v14 = vld [vmem:[%s4996_s9 + $0xf0] sm:$0xff] }
 0x2bb   : > { %v440_v52 = vld [vmem:[#allocation6 + $0xf8] sm:$0xff]  ;;  %2931 = vmatpush.msrb.mxu3 %v1224_v15  ;;  %v3035_v15 = vld [vmem:[%s4996_s9 + $0x1f0] sm:$0xff] }
 0x2bc   : > { %v696_v19 = vld [vmem:[#allocation6 + $0x8f8] sm:$0xff]  ;;  %2863 = vmatpush.msrb.mxu0 %v440_v52  ;;  %v3099_v52 = vld [vmem:[%s4996_s9 + $0x3f0] sm:$0xff] }
 0x2bd   : > { %v952_v43 = vld [vmem:[#allocation6 + $0x10f8] sm:$0xff]  ;;  %2886 = vmatpush.msrb.mxu1 %v696_v19  ;;  %v3001_v19 = vld [vmem:[%s4996_s9 + $0xe0] sm:$0xff] }
 0x2be   : > { %v1208_v23 = vld [vmem:[#allocation6 + $0x18f8] sm:$0xff]  ;;  %2909 = vmatpush.msrb.mxu2 %v952_v43  ;;  %v5307_v43 = vpop.f32.mrf.mxu3 }
 0x2bf   : > { %v424_v35 = vld [vmem:[#allocation6 + $0x78] sm:$0xff]  ;;  %2932 = vmatpush.msrb.mxu3 %v1208_v23  ;;  %v5309_v23 = vpop.f32.mrf.mxu1 }
 0x2c0   : > { %v680_v51 = vld [vmem:[#allocation6 + $0x878] sm:$0xff]  ;;  %2864 = vmatpush.msrb.mxu0 %v424_v35  ;;  %v3033_v35 = vld [vmem:[%s4996_s9 + $0x1e0] sm:$0xff] }
 0x2c1   : > { %v936_v58 = vld [vmem:[#allocation6 + $0x1078] sm:$0xff]  ;;  %2887 = vmatpush.msrb.mxu1 %v680_v51  ;;  %v3065_v51 = vld [vmem:[%s4996_s9 + $0x2e0] sm:$0xff]  ;;  %2865 = vmatmul.f32.vlgmr.msrb.gmra.mxu0 %v5205_v32 }
 0x2c2   : > { %v1192_v18 = vld [vmem:[#allocation6 + $0x1878] sm:$0xff]  ;;  %2910 = vmatpush.msrb.mxu2 %v936_v58  ;;  %3485 = vmatpush.msra.mxu0 %v3003_v14  ;;  %v3097_v58 = vld [vmem:[%s4996_s9 + $0x3e0] sm:$0xff]  ;;  %v3063_v14 = vld [vmem:[%s4996_s9 + $0x2d0] sm:$0xff] }
 0x2c3   : > { %2933 = vmatpush.msrb.mxu3 %v1192_v18  ;;  %2911 = vmatmul.f32.vlgmr.msrb.gmra.mxu2 %v5211_v46  ;;  %v2999_v46 = vld [vmem:[%s4996_s9 + $0xd0] sm:$0xff]  ;;  %v2997_v32 = vld [vmem:[%s4996_s9 + $0xc0] sm:$0xff] }
 0x2c4   : > { %3508 = vmatpush.msra.mxu1 %v3035_v15  ;;  %3531 = vmatpush.msra.mxu2 %v3067_v1  ;;  %v3031_v18 = vld [vmem:[%s4996_s9 + $0x1d0] sm:$0xff]  ;;  %v5320_v15 = vpop.f32.mrf.mxu2 }
 0x2c5   : > { %3554 = vmatpush.msra.mxu3 %v3099_v52  ;;  %3486 = vmatpush.msra.mxu0 %v3001_v19  ;;  %v3095_v1 = vld [vmem:[%s4996_s9 + $0x3d0] sm:$0xff]  ;;  %6492 = vst [vmem:[#allocation32_spill] sm:$0xff] %v5320_v15  ;;  %v3029_v52 = vld [vmem:[%s4996_s9 + $0x1c0] sm:$0xff] }
 0x2c6   : > { %2934 = vmatmul.f32.vlgmr.msrb.gmra.mxu3 %v5214_v47  ;;  %3509 = vmatpush.msra.mxu1 %v3033_v35  ;;  %v3061_v47 = vld [vmem:[%s4996_s9 + $0x2c0] sm:$0xff]  ;;  %v5327_v35 = vpop.f32.mrf.mxu0  ;;  %v5332_v15 = vpop.f32.mrf.mxu3 }
 0x2c7   : > { %3532 = vmatpush.msra.mxu2 %v3065_v51  ;;  %3555 = vmatpush.msra.mxu3 %v3097_v58  ;;  %v3093_v19 = vld [vmem:[%s4996_s9 + $0x3c0] sm:$0xff]  ;;  %6493 = vst [vmem:[#allocation33_spill] sm:$0xff] %v5327_v35  ;;  %v2995_v51 = vld [vmem:[%s4996_s9 + $0xb0] sm:$0xff] }
 0x2c8   : > { %2888 = vmatmul.f32.vlgmr.msrb.gmra.mxu1 %v5208_v33  ;;  %3487 = vmatpush.msra.mxu0 %v2999_v46  ;;  %v3027_v58 = vld [vmem:[%s4996_s9 + $0x1b0] sm:$0xff]  ;;  %6494 = vst [vmem:[#allocation34_spill] sm:$0xff] %v5332_v15 }
 0x2c9   : > { %3510 = vmatpush.msra.mxu1 %v3031_v18  ;;  %3533 = vmatpush.msra.mxu2 %v3063_v14  ;;  %v3059_v33 = vld [vmem:[%s4996_s9 + $0x2b0] sm:$0xff]  ;;  %v2993_v18 = vld [vmem:[%s4996_s9 + $0xa0] sm:$0xff]  ;;  %v5337_v14 = vpop.f32.mrf.mxu1 }
 0x2ca   : > { %3556 = vmatpush.msra.mxu3 %v3095_v1  ;;  %3488 = vmatpush.msra.mxu0 %v2997_v32  ;;  %v3091_v46 = vld [vmem:[%s4996_s9 + $0x3b0] sm:$0xff]  ;;  %6495 = vst [vmem:[#allocation35_spill] sm:$0xff] %v5337_v14  ;;  %v3025_v1 = vld [vmem:[%s4996_s9 + $0x1a0] sm:$0xff] }
 0x2cb   : > { %3511 = vmatpush.msra.mxu1 %v3029_v52  ;;  %3534 = vmatpush.msra.mxu2 %v3061_v47  ;;  %v3057_v32 = vld [vmem:[%s4996_s9 + $0x2a0] sm:$0xff]  ;;  %v3023_v47 = vld [vmem:[%s4996_s9 + $0x190] sm:$0xff] }
 0x2cc   : > { %3557 = vmatpush.msra.mxu3 %v3093_v19  ;;  %2914 = vmatmul.f32.gmra.mxu2 %v5229_v20  ;;  %v3089_v52 = vld [vmem:[%s4996_s9 + $0x3a0] sm:$0xff]  ;;  %v2991_v20 = vld [vmem:[%s4996_s9 + $0x90] sm:$0xff] }
 0x2cd   : > { %3489 = vmatpush.msra.mxu0 %v2995_v51  ;;  %3512 = vmatpush.msra.mxu1 %v3027_v58  ;;  %v5346_v19 = vld [vmem:[#allocation8] sm:$0xff]  ;;  %v2989_v51 = vld [vmem:[%s4996_s9 + $0x80] sm:$0xff] }
 0x2ce   : > { %3535 = vmatpush.msra.mxu2 %v3059_v33  ;;  %3558 = vmatpush.msra.mxu3 %v3091_v46  ;;  %v3087_v33 = vld [vmem:[%s4996_s9 + $0x390] sm:$0xff]  ;;  %v5353_v46 = vpop.f32.mrf.mxu2  ;;  %v3021_v14 = vld [vmem:[%s4996_s9 + $0x180] sm:$0xff]  ;;  %v5375_v35 = vpop.f32.mrf.mxu3 }
 0x2cf   : > { %2868 = vmatmul.f32.gmra.mxu0 %v5232_v25  ;;  %2937 = vmatmul.f32.gmra.mxu3 %v5240_v63  ;;  %v3055_v25 = vld [vmem:[%s4996_s9 + $0x290] sm:$0xff]  ;;  %6496 = vst [vmem:[#allocation36_spill] sm:$0xff] %v5353_v46  ;;  %v6498_v46 = vperm.slane %v5346_v19, 0 }
 0x2d0   : > { %3490 = vmatpush.msra.mxu0 %v2993_v18  ;;  %3513 = vmatpush.msra.mxu1 %v3025_v1  ;;  %v5355_v18 = vpop.f32.mrf.mxu0  ;;  %v3053_v1 = vld [vmem:[%s4996_s9 + $0x280] sm:$0xff]  ;;  %v2987_v63 = vld [vmem:[%s4996_s9 + $0x70] sm:$0xff] }
 0x2d1   : > { %3536 = vmatpush.msra.mxu2 %v3057_v32  ;;  %6497 = vst [vmem:[#allocation37_spill] sm:$0xff] %v5355_v18  ;;  %3559 = vmatpush.msra.mxu3 %v3089_v52  ;;  %v3085_v32 = vld [vmem:[%s4996_s9 + $0x380] sm:$0xff]  ;;  %v3019_v58 = vld [vmem:[%s4996_s9 + $0x170] sm:$0xff]  ;;  %v1487_v52 = vadd.f32 %v5074_v38, %v6498_v46  ;;  %v5377_v15 = vpop.f32.mrf.mxu1 }
 0x2d2   : > { %2891 = vmatmul.f32.gmra.mxu1 %v5237_v59  ;;  %3491 = vmatpush.msra.mxu0 %v2991_v20  ;;  %v6499_v59 = vperm.slane %v5346_v19, 1  ;;  %v3051_v20 = vld [vmem:[%s4996_s9 + $0x270] sm:$0xff]  ;;  %v2985_v38 = vld [vmem:[%s4996_s9 + $0x60] sm:$0xff] }
 0x2d3   : > { %3514 = vmatpush.msra.mxu1 %v3023_v47  ;;  %3537 = vmatpush.msra.mxu2 %v3055_v25  ;;  %v3083_v47 = vld [vmem:[%s4996_s9 + $0x370] sm:$0xff]  ;;  %v6500_v25 = vperm.slane %v5346_v19, 2 }
 0x2d4   : > { %3560 = vmatpush.msra.mxu3 %v3087_v33  ;;  %v1579_v18 = vadd.f32 %v5094_v26, %v6499_v59  ;;  %3492 = vmatpush.msra.mxu0 %v2989_v51  ;;  %v3017_v26 = vld [vmem:[%s4996_s9 + $0x160] sm:$0xff]  ;;  %v2983_v46 = vld [vmem:[%s4996_s9 + $0x50] sm:$0xff]  ;;  %v1510_v59 = vadd.f32 %v5076_v2, %v1487_v52 }
 0x2d5   : > { %3515 = vmatpush.msra.mxu1 %v3021_v14  ;;  %v1671_v33 = vadd.f32 %v5114_v12, %v6500_v25  ;;  %3538 = vmatpush.msra.mxu2 %v3053_v1  ;;  %v3049_v14 = vld [vmem:[%s4996_s9 + $0x260] sm:$0xff]  ;;  %v3015_v12 = vld [vmem:[%s4996_s9 + $0x150] sm:$0xff] }
 0x2d6   : > { %3561 = vmatpush.msra.mxu3 %v3085_v32  ;;  %3493 = vmatpush.msra.mxu0 %v2987_v63  ;;  %v3081_v51 = vld [vmem:[%s4996_s9 + $0x360] sm:$0xff]  ;;  %v1602_v1 = vadd.f32 %v5096_v54, %v1579_v18  ;;  %v3047_v32 = vld [vmem:[%s4996_s9 + $0x250] sm:$0xff]  ;;  %v5390_v25 = vpop.f32.mrf.mxu2 }
 0x2d7   : > { %3516 = vmatpush.msra.mxu1 %v3019_v58  ;;  %3539 = vmatpush.msra.mxu2 %v3051_v20  ;;  %v3079_v58 = vld [vmem:[%s4996_s9 + $0x350] sm:$0xff]  ;;  %v1694_v63 = vadd.f32 %v5116_v13, %v1671_v33  ;;  %v2981_v20 = vld [vmem:[%s4996_s9 + $0x40] sm:$0xff]  ;;  %v1533_v33 = vadd.f32 %v5082_v56, %v1510_v59  ;;  %v6501_v56 = vperm.slane %v5346_v19, 0 }
 0x2d8   : > { %3562 = vmatpush.msra.mxu3 %v3083_v47  ;;  %3494 = vmatpush.msra.mxu0 %v2985_v38  ;;  %v3013_v47 = vld [vmem:[%s4996_s9 + $0x140] sm:$0xff]  ;;  %v5396_v18 = vpop.f32.mrf.mxu0  ;;  %v2979_v52 = vld [vmem:[%s4996_s9 + $0x30] sm:$0xff]  ;;  %v1625_v38 = vadd.f32 %v5098_v40, %v1602_v1  ;;  %v6502_v40 = vperm.slane %v5346_v19, 1 }
 0x2d9   : > { %3517 = vmatpush.msra.mxu1 %v3017_v26  ;;  %3540 = vmatpush.msra.mxu2 %v3049_v14  ;;  %v3045_v2 = vld [vmem:[%s4996_s9 + $0x240] sm:$0xff]  ;;  %v3011_v13 = vld [vmem:[%s4996_s9 + $0x130] sm:$0xff]  ;;  %v1490_v59 = vadd.f32 %v5086_v60, %v6501_v56 }
 0x2da   : > { %3563 = vmatpush.msra.mxu3 %v3081_v51  ;;  %3495 = vmatpush.msra.mxu0 %v2983_v46  ;;  %v3077_v54 = vld [vmem:[%s4996_s9 + $0x340] sm:$0xff]  ;;  %v3043_v26 = vld [vmem:[%s4996_s9 + $0x230] sm:$0xff]  ;;  %v1717_v51 = vadd.f32 %v5122_v36, %v1694_v63  ;;  %v5405_v46 = vpop.f32.mrf.mxu3  ;;  %v1582_v1 = vadd.f32 %v5102_v44, %v6502_v40  ;;  %v6503_v63 = vperm.slane %v5346_v19, 2  ;;  %v5425_v44 = vadd.f32 %v5084_v57, %v1533_v33 }
 0x2db   : > { %3518 = vmatpush.msra.mxu1 %v3015_v12  ;;  %3541 = vmatpush.msra.mxu2 %v3047_v32  ;;  %v3075_v14 = vld [vmem:[%s4996_s9 + $0x330] sm:$0xff]  ;;  %v2977_v12 = vld [vmem:[%s4996_s9 + $0x20] sm:$0xff]  ;;  %v1513_v56 = vadd.f32 %v5088_v61, %v1490_v59 }
 0x2dc   : > { %3564 = vmatpush.msra.mxu3 %v3079_v58  ;;  %3496 = vmatpush.msra.mxu0 %v2981_v20  ;;  %v3009_v32 = vld [vmem:[%s4996_s9 + $0x120] sm:$0xff]  ;;  %v1674_v20 = vadd.f32 %v5126_v3, %v6503_v63  ;;  %v2975_v60 = vld [vmem:[%s4996_s9 + $0x10] sm:$0xff]  ;;  %v5433_v3 = vadd.f32 %v5124_v37, %v1717_v51  ;;  %v1605_v57 = vadd.f32 %v5104_v45, %v1582_v1  ;;  %v6446_v61 = vmax.f32 %v5425_v44, 0.0 }
 0x2dd   : > { %3519 = vmatpush.msra.mxu1 %v3013_v47  ;;  %3542 = vmatpush.msra.mxu2 %v3045_v2  ;;  %v3041_v36 = vld [vmem:[%s4996_s9 + $0x220] sm:$0xff]  ;;  %v5420_v47 = vpop.f32.mrf.mxu1  ;;  %v3007_v2 = vld [vmem:[%s4996_s9 + $0x110] sm:$0xff]  ;;  %v1536_v40 = vadd.f32 %v5090_v16, %v1513_v56 }
 0x2de   : > { %3565 = vmatpush.msra.mxu3 %v3077_v54  ;;  %3497 = vmatpush.msra.mxu0 %v2979_v52  ;;  %v3073_v58 = vld [vmem:[%s4996_s9 + $0x320] sm:$0xff]  ;;  %v5428_v54 = vadd.f32 %v5100_v41, %v1625_v38  ;;  %v3039_v52 = vld [vmem:[%s4996_s9 + $0x210] sm:$0xff]  ;;  %v1697_v38 = vadd.f32 %v5128_v39, %v1674_v20  ;;  %v6444_v51 = vmax.f32 %v5433_v3, 0.0  ;;  %v1628_v1 = vadd.f32 %v5110_v6, %v1605_v57 }
 0x2df   : > { %3520 = vmatpush.msra.mxu1 %v3011_v13  ;;  %3543 = vmatpush.msra.mxu2 %v3043_v26  ;;  %v3071_v13 = vld [vmem:[%s4996_s9 + $0x310] sm:$0xff]  ;;  %v2973_v26 = vld [vmem:[%s4996_s9] sm:$0xff] }
 0x2e0   : > { %3566 = vmatpush.msra.mxu3 %v3075_v14  ;;  %3498 = vmatpush.msra.mxu0 %v2977_v12  ;;  %v3005_v14 = vld [vmem:[%s4996_s9 + $0x100] sm:$0xff]  ;;  %v5442_v12 = vpop.f32.mrf.mxu2  ;;  %v5444_v37 = vpop.f32.mrf.mxu0  ;;  %v6445_v45 = vmax.f32 %v5428_v54, 0.0  ;;  %v3131_v39 = vld [vmem:[%s4996_s9 + $0x4f0] sm:$0xff]  ;;  %v1720_v63 = vadd.f32 %v5132_v8, %v1697_v38 }
 0x2e1   : > { %3521 = vmatpush.msra.mxu1 %v3009_v32  ;;  %3544 = vmatpush.msra.mxu2 %v3041_v36  ;;  %v3037_v41 = vld [vmem:[%s4996_s9 + $0x200] sm:$0xff]  ;;  %v6443_v32 = vmax.f32 %v5143_v7, 0.0  ;;  %v3163_v59 = vld [vmem:[%s4996_s9 + $0x5f0] sm:$0xff] }
 0x2e2   : > { %3567 = vmatpush.msra.mxu3 %v3073_v58  ;;  %3499 = vmatpush.msra.mxu0 %v2975_v60  ;;  %v3069_v33 = vld [vmem:[%s4996_s9 + $0x300] sm:$0xff]  ;;  %v3195_v36 = vld [vmem:[%s4996_s9 + $0x6f0] sm:$0xff]  ;;  %v5461_v20 = vpop.f32.mrf.mxu3 }
 0x2e3   : > { %3522 = vmatpush.msra.mxu1 %v3007_v2  ;;  %3545 = vmatpush.msra.mxu2 %v3039_v52  ;;  %v3227_v58 = vld [vmem:[%s4996_s9 + $0x7f0] sm:$0xff]  ;;  %v3129_v16 = vld [vmem:[%s4996_s9 + $0x4e0] sm:$0xff] }
 0x2e4   : > { %3568 = vmatpush.msra.mxu3 %v3071_v13  ;;  %3500 = vmatpush.msra.mxu0 %v2973_v26  ;;  %v3161_v6 = vld [vmem:[%s4996_s9 + $0x5e0] sm:$0xff]  ;;  %v3127_v8 = vld [vmem:[%s4996_s9 + $0x4d0] sm:$0xff]  ;;  %v5476_v26 = vadd.f32 %v5092_v17, %v1536_v40 }
 0x2e5   : > { %3523 = vmatpush.msra.mxu1 %v3005_v14  ;;  %3546 = vmatpush.msra.mxu2 %v3037_v41  ;;  %v5463_v60 = vpop.f32.mrf.mxu1  ;;  %v3193_v2 = vld [vmem:[%s4996_s9 + $0x6e0] sm:$0xff]  ;;  %v3159_v13 = vld [vmem:[%s4996_s9 + $0x5d0] sm:$0xff]  ;;  %v5479_v14 = vadd.f32 %v5112_v9, %v1628_v1  ;;  %v5484_v41 = vadd.f32 %v5134_v10, %v1720_v63 }
 0x2e6   : > { %3569 = vmatpush.msra.mxu3 %v3069_v33  ;;  %3501 = vmatmul.f32.vlgmr.msra.gmra.mxu0 %v6446_v61  ;;  %v3225_v52 = vld [vmem:[%s4996_s9 + $0x7e0] sm:$0xff]  ;;  %v3191_v56 = vld [vmem:[%s4996_s9 + $0x6d0] sm:$0xff]  ;;  %v6442_v10 = vmax.f32 %v5476_v26, 0.0 }
 0x2e7   : > { %3524 = vmatmul.f32.vlgmr.msra.gmra.mxu1 %v6445_v45  ;;  %3547 = vmatmul.f32.vlgmr.msra.gmra.mxu2 %v6444_v51  ;;  %v3223_v57 = vld [vmem:[%s4996_s9 + $0x7d0] sm:$0xff]  ;;  %v3125_v38 = vld [vmem:[%s4996_s9 + $0x4c0] sm:$0xff]  ;;  %v6441_v40 = vmax.f32 %v5479_v14, 0.0  ;;  %v6440_v1 = vmax.f32 %v5484_v41, 0.0 }
 0x2e8   : > { %3570 = vmatmul.f32.vlgmr.msra.gmra.mxu3 %v6443_v32  ;;  %3577 = vmatpush.msrb.mxu0 %v3131_v39  ;;  %v5486_v33 = vpop.f32.mrf.mxu2  ;;  %v3157_v39 = vld [vmem:[%s4996_s9 + $0x5c0] sm:$0xff]  ;;  %v3123_v63 = vld [vmem:[%s4996_s9 + $0x4b0] sm:$0xff] }
 0x2e9   : > { %3600 = vmatpush.msrb.mxu1 %v3163_v59  ;;  %3623 = vmatpush.msrb.mxu2 %v3195_v36  ;;  %v3189_v17 = vld [vmem:[%s4996_s9 + $0x6c0] sm:$0xff]  ;;  %v5492_v59 = vpop.f32.mrf.mxu0  ;;  %v6439_v36 = vmax.f32 %v5151_v30, 0.0  ;;  %v3115_v32 = vld [vmem:[%s4996_s9 + $0x470] sm:$0xff] }
 0x2ea   : > { %3646 = vmatpush.msrb.mxu3 %v3227_v58  ;;  %3578 = vmatpush.msrb.mxu0 %v3129_v16  ;;  %v3221_v9 = vld [vmem:[%s4996_s9 + $0x7c0] sm:$0xff]  ;;  %v5498_v58 = vpop.f32.mrf.mxu3  ;;  %v3155_v16 = vld [vmem:[%s4996_s9 + $0x5b0] sm:$0xff] }
 0x2eb   : > { %3601 = vmatpush.msrb.mxu1 %v3161_v6  ;;  %3624 = vmatpush.msrb.mxu2 %v3193_v2  ;;  %v3187_v6 = vld [vmem:[%s4996_s9 + $0x6b0] sm:$0xff]  ;;  %v3209_v61 = vld [vmem:[%s4996_s9 + $0x760] sm:$0xff] }
 0x2ec   : > { %3647 = vmatpush.msrb.mxu3 %v3225_v52  ;;  %3579 = vmatpush.msrb.mxu0 %v3127_v8  ;;  %v3219_v2 = vld [vmem:[%s4996_s9 + $0x7b0] sm:$0xff]  ;;  %v3121_v8 = vld [vmem:[%s4996_s9 + $0x4a0] sm:$0xff] }
 0x2ed   : > { %3602 = vmatpush.msrb.mxu1 %v3159_v13  ;;  %3625 = vmatpush.msrb.mxu2 %v3191_v56  ;;  %v5508_v52 = vpop.f32.mrf.mxu1  ;;  %v3153_v13 = vld [vmem:[%s4996_s9 + $0x5a0] sm:$0xff]  ;;  %v3147_v51 = vld [vmem:[%s4996_s9 + $0x570] sm:$0xff] }
 0x2ee   : > { %3648 = vmatpush.msrb.mxu3 %v3223_v57  ;;  %3580 = vmatpush.msrb.mxu0 %v3125_v38  ;;  %v3185_v56 = vld [vmem:[%s4996_s9 + $0x6a0] sm:$0xff]  ;;  %v3119_v38 = vld [vmem:[%s4996_s9 + $0x490] sm:$0xff] }
 0x2ef   : > { %3603 = vmatpush.msrb.mxu1 %v3157_v39  ;;  %3626 = vmatpush.msrb.mxu2 %v3189_v17  ;;  %v3217_v57 = vld [vmem:[%s4996_s9 + $0x7a0] sm:$0xff]  ;;  %v3151_v39 = vld [vmem:[%s4996_s9 + $0x590] sm:$0xff]  ;;  %v1441_v17 = vperm.slane %v5346_v19, 4 }
 0x2f0   : > { %3649 = vmatpush.msrb.mxu3 %v3221_v9  ;;  %3504 = vmatmul.f32.gmra.mxu0 %v6442_v10  ;;  %v1442_v9 = vperm.slane %v5346_v19, 5  ;;  %v3149_v10 = vld [vmem:[%s4996_s9 + $0x580] sm:$0xff] }
 0x2f1   : > { %3527 = vmatmul.f32.gmra.mxu1 %v6441_v40  ;;  %3550 = vmatmul.f32.gmra.mxu2 %v6440_v1  ;;  %v5528_v1 = vpop.f32.mrf.mxu0  ;;  %v3117_v40 = vld [vmem:[%s4996_s9 + $0x480] sm:$0xff]  ;;  %v1855_v45 = vadd.f32 %v5217_v22, %v1441_v17 }
 0x2f2   : > { %3573 = vmatmul.f32.gmra.mxu3 %v6439_v36  ;;  %3581 = vmatpush.msrb.mxu0 %v3123_v63  ;;  %v3183_v36 = vld [vmem:[%s4996_s9 + $0x690] sm:$0xff] }
 0x2f3   : > { %3604 = vmatpush.msrb.mxu1 %v3155_v16  ;;  %3627 = vmatpush.msrb.mxu2 %v3187_v6  ;;  %v3215_v63 = vld [vmem:[%s4996_s9 + $0x790] sm:$0xff]  ;;  %v6448_v16 = vperm.slane %v5346_v19, 6  ;;  %v6447_v6 = vperm.slane %v5346_v19, 7 }
 0x2f4   : > { %3650 = vmatpush.msrb.mxu3 %v3219_v2  ;;  %3582 = vmatpush.msrb.mxu0 %v3121_v8  ;;  %v5526_v2 = vpop.f32.mrf.mxu2  ;;  %v3181_v8 = vld [vmem:[%s4996_s9 + $0x680] sm:$0xff] }
 0x2f5   : > { %3605 = vmatpush.msrb.mxu1 %v3153_v13  ;;  %3628 = vmatpush.msrb.mxu2 %v3185_v56  ;;  %v3213_v13 = vld [vmem:[%s4996_s9 + $0x780] sm:$0xff]  ;;  %v1947_v56 = vadd.f32 %v5243_v27, %v1442_v9  ;;  %v2131_v22 = vadd.f32 %v5287_v29, %v6447_v6  ;;  %v3143_v29 = vld [vmem:[%s4996_s9 + $0x550] sm:$0xff]  ;;  %v1878_v6 = vadd.f32 %v5219_v62, %v1855_v45 }
 0x2f6   : > { %3651 = vmatpush.msrb.mxu3 %v3217_v57  ;;  %3583 = vmatpush.msrb.mxu0 %v3119_v38  ;;  %v3179_v57 = vld [vmem:[%s4996_s9 + $0x670] sm:$0xff]  ;;  %v2039_v38 = vadd.f32 %v5264_v53, %v6448_v16  ;;  %v3113_v27 = vld [vmem:[%s4996_s9 + $0x460] sm:$0xff] }
 0x2f7   : > { %3606 = vmatpush.msrb.mxu1 %v3151_v39  ;;  %3629 = vmatpush.msrb.mxu2 %v3183_v36  ;;  %v3211_v36 = vld [vmem:[%s4996_s9 + $0x770] sm:$0xff]  ;;  %v5550_v39 = vpop.f32.mrf.mxu3  ;;  %v3141_v62 = vld [vmem:[%s4996_s9 + $0x540] sm:$0xff] }
 0x2f8   : > { %3652 = vmatpush.msrb.mxu3 %v3215_v63  ;;  %3584 = vmatpush.msrb.mxu0 %v3117_v40  ;;  %v5552_v63 = vpop.f32.mrf.mxu1  ;;  %v3177_v40 = vld [vmem:[%s4996_s9 + $0x660] sm:$0xff]  ;;  %v3111_v53 = vld [vmem:[%s4996_s9 + $0x450] sm:$0xff] }
 0x2f9   : > { %3607 = vmatpush.msrb.mxu1 %v3149_v10  ;;  %3630 = vmatpush.msrb.mxu2 %v3181_v8  ;;  %v3145_v10 = vld [vmem:[%s4996_s9 + $0x560] sm:$0xff]  ;;  %v1970_v8 = vadd.f32 %v5247_v4, %v1947_v56  ;;  %v5572_v56 = vpop.f32.mrf.mxu0 }
 0x2fa   : > { %3653 = vmatpush.msrb.mxu3 %v3213_v13  ;;  %3585 = vmatpush.msrb.mxu0 %v3115_v32  ;;  %v3175_v13 = vld [vmem:[%s4996_s9 + $0x650] sm:$0xff]  ;;  %v3173_v4 = vld [vmem:[%s4996_s9 + $0x640] sm:$0xff] }
 0x2fb   : > { %3608 = vmatpush.msrb.mxu1 %v3147_v51  ;;  %3631 = vmatpush.msrb.mxu2 %v3179_v57  ;;  %v3207_v32 = vld [vmem:[%s4996_s9 + $0x750] sm:$0xff]  ;;  %v2062_v51 = vadd.f32 %v5270_v5, %v2039_v38  ;;  %v2154_v57 = vadd.f32 %v5293_v11, %v2131_v22  ;;  %v3205_v45 = vld [vmem:[%s4996_s9 + $0x740] sm:$0xff]  ;;  %v1901_v38 = vadd.f32 %v5221_v49, %v1878_v6 }
 0x2fc   : > { %3654 = vmatpush.msrb.mxu3 %v3211_v36  ;;  %3586 = vmatpush.msrb.mxu0 %v3113_v27  ;;  %v5566_v16 = vpop.f32.mrf.mxu2  ;;  %v3109_v36 = vld [vmem:[%s4996_s9 + $0x440] sm:$0xff]  ;;  %v3107_v5 = vld [vmem:[%s4996_s9 + $0x430] sm:$0xff]  ;;  %v1950_v6 = vadd.f32 %v5253_v24, %v1442_v9 }
 0x2fd   : > { %3609 = vmatpush.msrb.mxu1 %v3145_v10  ;;  %3632 = vmatpush.msrb.mxu2 %v3177_v40  ;;  %v3139_v11 = vld [vmem:[%s4996_s9 + $0x530] sm:$0xff]  ;;  %v2085_v10 = vadd.f32 %v5273_v42, %v2062_v51  ;;  %v2177_v40 = vadd.f32 %v5297_v48, %v2154_v57  ;;  %v3137_v49 = vld [vmem:[%s4996_s9 + $0x520] sm:$0xff]  ;;  %v5605_v9 = vadd.f32 %v5225_v0, %v1901_v38 }
 0x2fe   : > { %3655 = vmatpush.msrb.mxu3 %v3209_v61  ;;  %3587 = vmatpush.msrb.mxu0 %v3111_v53  ;;  %v1993_v61 = vadd.f32 %v5251_v21, %v1970_v8  ;;  %v3171_v22 = vld [vmem:[%s4996_s9 + $0x630] sm:$0xff]  ;;  %v1858_v21 = vadd.f32 %v5223_v50, %v1441_v17  ;;  %v3169_v48 = vld [vmem:[%s4996_s9 + $0x620] sm:$0xff]  ;;  %v6504_v8 = vperm.slane %v5346_v19, 6 }
 0x2ff   : > { %3610 = vmatpush.msrb.mxu1 %v3143_v29  ;;  %3633 = vmatpush.msrb.mxu2 %v3175_v13  ;;  %v3203_v27 = vld [vmem:[%s4996_s9 + $0x730] sm:$0xff]  ;;  %v5582_v53 = vpop.f32.mrf.mxu3  ;;  %v3105_v29 = vld [vmem:[%s4996_s9 + $0x420] sm:$0xff] }
 0x300   : > { %3656 = vmatpush.msrb.mxu3 %v3207_v32  ;;  %3588 = vmatpush.msrb.mxu0 %v3109_v36  ;;  %v3201_v42 = vld [vmem:[%s4996_s9 + $0x720] sm:$0xff]  ;;  %v2042_v13 = vadd.f32 %v5275_v34, %v6504_v8  ;;  %v6505_v32 = vperm.slane %v5346_v19, 7  ;;  %v5600_v50 = vpop.f32.mrf.mxu1  ;;  %v3103_v24 = vld [vmem:[%s4996_s9 + $0x410] sm:$0xff]  ;;  %v5608_v57 = vadd.f32 %v5257_v31, %v1993_v61  ;;  %v5613_v19 = vadd.f32 %v5279_v28, %v2085_v10 }
 0x301   : > { %3611 = vmatpush.msrb.mxu1 %v3141_v62  ;;  %3634 = vmatpush.msrb.mxu2 %v3173_v4  ;;  %v3135_v17 = vld [vmem:[%s4996_s9 + $0x510] sm:$0xff]  ;;  %v5616_v36 = vadd.f32 %v5307_v43, %v2177_v40  ;;  %v3101_v62 = vld [vmem:[%s4996_s9 + $0x400] sm:$0xff]  ;;  %v6456_v10 = vmax.f32 %v5605_v9, 0.0 }
 0x302   : > { %3657 = vmatpush.msrb.mxu3 %v3205_v45  ;;  %3589 = vmatpush.msrb.mxu0 %v3107_v5  ;;  %v2134_v51 = vadd.f32 %v5299_v55, %v6505_v32  ;;  %v3167_v34 = vld [vmem:[%s4996_s9 + $0x610] sm:$0xff]  ;;  %v3133_v0 = vld [vmem:[%s4996_s9 + $0x500] sm:$0xff]  ;;  %v6455_v40 = vmax.f32 %v5608_v57, 0.0 }
 0x303   : > { %3612 = vmatpush.msrb.mxu1 %v3139_v11  ;;  %3635 = vmatpush.msrb.mxu2 %v3171_v22  ;;  %v3199_v55 = vld [vmem:[%s4996_s9 + $0x710] sm:$0xff]  ;;  %v6506_v4 = vld [vmem:[#allocation23_spill] sm:$0xff]  ;;  %v6507_v5 = vld [vmem:[#allocation26_spill] sm:$0xff] }
 0x304   : > { %3658 = vmatpush.msrb.mxu3 %v3203_v27  ;;  %3590 = vmatpush.msrb.mxu0 %v3105_v29  ;;  %v1881_v45 = vadd.f32 %v6506_v4, %v1858_v21  ;;  %v1973_v31 = vadd.f32 %v6507_v5, %v1950_v6  ;;  %v3165_v11 = vld [vmem:[%s4996_s9 + $0x600] sm:$0xff]  ;;  %v6508_v61 = vld [vmem:[#allocation29_spill] sm:$0xff]  ;;  %v2157_v22 = vadd.f32 %v5309_v23, %v2134_v51  ;;  %v5626_v43 = vpop.f32.mrf.mxu2  ;;  %v5628_v27 = vpop.f32.mrf.mxu0  ;;  %v6454_v29 = vmax.f32 %v5613_v19, 0.0  ;;  %v6509_v6 = vld [vmem:[#allocation24_spill] sm:$0xff] }
 0x305   : > { %3613 = vmatpush.msrb.mxu1 %v3137_v49  ;;  %3636 = vmatpush.msrb.mxu2 %v3169_v48  ;;  %v3197_v38 = vld [vmem:[%s4996_s9 + $0x700] sm:$0xff]  ;;  %v2065_v28 = vadd.f32 %v6508_v61, %v2042_v13  ;;  %v6453_v49 = vmax.f32 %v5616_v36, 0.0  ;;  %v3259_v23 = vld [vmem:[%s4996_s9 + $0x8f0] sm:$0xff] }
 0x306   : > { %3659 = vmatpush.msrb.mxu3 %v3201_v42  ;;  %3591 = vmatpush.msrb.mxu0 %v3103_v24  ;;  %v3291_v21 = vld [vmem:[%s4996_s9 + $0x9f0] sm:$0xff]  ;;  %v1904_v48 = vadd.f32 %v6509_v6, %v1881_v45  ;;  %v6510_v42 = vld [vmem:[#allocation27_spill] sm:$0xff]  ;;  %v6511_v51 = vld [vmem:[#allocation30_spill] sm:$0xff] }
 0x307   : > { %3614 = vmatpush.msrb.mxu1 %v3135_v17  ;;  %3637 = vmatpush.msrb.mxu2 %v3167_v34  ;;  %v1996_v8 = vadd.f32 %v6510_v42, %v1973_v31  ;;  %v3323_v13 = vld [vmem:[%s4996_s9 + $0xaf0] sm:$0xff]  ;;  %v2088_v24 = vadd.f32 %v6511_v51, %v2065_v28  ;;  %v3289_v4 = vld [vmem:[%s4996_s9 + $0x9e0] sm:$0xff] }
 0x308   : > { %3660 = vmatpush.msrb.mxu3 %v3199_v55  ;;  %3592 = vmatpush.msrb.mxu0 %v3101_v62  ;;  %v3355_v32 = vld [vmem:[%s4996_s9 + $0xbf0] sm:$0xff]  ;;  %v5646_v55 = vpop.f32.mrf.mxu3  ;;  %v5648_v62 = vpop.f32.mrf.mxu1  ;;  %v3321_v45 = vld [vmem:[%s4996_s9 + $0xae0] sm:$0xff] }
 0x309   : > { %3615 = vmatpush.msrb.mxu1 %v3133_v0  ;;  %3638 = vmatpush.msrb.mxu2 %v3165_v11  ;;  %v6512_v17 = vld [vmem:[#allocation32_spill] sm:$0xff]  ;;  %v3257_v0 = vld [vmem:[%s4996_s9 + $0x8e0] sm:$0xff] }
 0x30a   : > { %3661 = vmatpush.msrb.mxu3 %v3197_v38  ;;  %3593 = vmatmul.f32.vlgmr.msrb.gmra.mxu0 %v6456_v10  ;;  %v2180_v34 = vadd.f32 %v6512_v17, %v2157_v22  ;;  %v3353_v5 = vld [vmem:[%s4996_s9 + $0xbe0] sm:$0xff]  ;;  %v3255_v31 = vld [vmem:[%s4996_s9 + $0x8d0] sm:$0xff] }
 0x30b   : > { %3616 = vmatmul.f32.vlgmr.msrb.gmra.mxu1 %v6455_v40  ;;  %3639 = vmatmul.f32.vlgmr.msrb.gmra.mxu2 %v6454_v29  ;;  %v3287_v11 = vld [vmem:[%s4996_s9 + $0x9d0] sm:$0xff]  ;;  %v6516_v6 = vld [vmem:[#allocation31_spill] sm:$0xff] }
 0x30c   : > { %3662 = vmatmul.f32.vlgmr.msrb.gmra.mxu3 %v6453_v49  ;;  %3669 = vmatpush.msra.mxu0 %v3259_v23  ;;  %v6513_v38 = vld [vmem:[#allocation25_spill] sm:$0xff]  ;;  %v6514_v28 = vld [vmem:[#allocation28_spill] sm:$0xff]  ;;  %v5669_v42 = vadd.f32 %v6516_v6, %v2088_v24  ;;  %v3285_v17 = vld [vmem:[%s4996_s9 + $0x9c0] sm:$0xff] }
 0x30d   : > { %3692 = vmatpush.msra.mxu1 %v3291_v21  ;;  %3715 = vmatpush.msra.mxu2 %v3323_v13  ;;  %v5661_v61 = vadd.f32 %v6513_v38, %v1904_v48  ;;  %v5664_v22 = vadd.f32 %v6514_v28, %v1996_v8  ;;  %v3319_v23 = vld [vmem:[%s4996_s9 + $0xad0] sm:$0xff]  ;;  %v6518_v13 = vld [vmem:[#allocation34_spill] sm:$0xff] }
 0x30e   : > { %3738 = vmatpush.msra.mxu3 %v3355_v32  ;;  %3670 = vmatpush.msra.mxu0 %v3257_v0  ;;  %v3351_v21 = vld [vmem:[%s4996_s9 + $0xbd0] sm:$0xff]  ;;  %6517 = vst [vmem:[#allocation26_spill] sm:$0xff] %v5669_v42  ;;  %v5672_v51 = vadd.f32 %v6518_v13, %v2180_v34  ;;  %v5674_v32 = vpop.f32.mrf.mxu2  ;;  %v3253_v48 = vld [vmem:[%s4996_s9 + $0x8c0] sm:$0xff] }
 0x30f   : > { %6515 = vst [vmem:[#allocation23_spill] sm:$0xff] %v5664_v22  ;;  %3693 = vmatpush.msra.mxu1 %v3289_v4  ;;  %3716 = vmatpush.msra.mxu2 %v3321_v45  ;;  %v3317_v8 = vld [vmem:[%s4996_s9 + $0xac0] sm:$0xff]  ;;  %v5680_v4 = vpop.f32.mrf.mxu0  ;;  %v6450_v24 = vmax.f32 %v5661_v61, 0.0  ;;  %v6449_v34 = vmax.f32 %v5664_v22, 0.0  ;;  %v6451_v45 = vmax.f32 %v5669_v42, 0.0  ;;  %v3283_v38 = vld [vmem:[%s4996_s9 + $0x9b0] sm:$0xff] }
 0x310   : > { %6519 = vst [vmem:[#allocation29_spill] sm:$0xff] %v5672_v51  ;;  %3739 = vmatpush.msra.mxu3 %v3353_v5  ;;  %3671 = vmatpush.msra.mxu0 %v3255_v31  ;;  %v3349_v0 = vld [vmem:[%s4996_s9 + $0xbc0] sm:$0xff]  ;;  %v6452_v5 = vmax.f32 %v5672_v51, 0.0  ;;  %v5686_v31 = vpop.f32.mrf.mxu3  ;;  %v3315_v28 = vld [vmem:[%s4996_s9 + $0xab0] sm:$0xff]  ;;  %v5698_v6 = vpop.f32.mrf.mxu1 }
 0x311   : > { %3694 = vmatpush.msra.mxu1 %v3287_v11  ;;  %3717 = vmatpush.msra.mxu2 %v3319_v23  ;;  %v3251_v11 = vld [vmem:[%s4996_s9 + $0x8b0] sm:$0xff]  ;;  %v3249_v13 = vld [vmem:[%s4996_s9 + $0x8a0] sm:$0xff] }
 0x312   : > { %3740 = vmatpush.msra.mxu3 %v3351_v21  ;;  %3672 = vmatpush.msra.mxu0 %v3253_v48  ;;  %v3347_v23 = vld [vmem:[%s4996_s9 + $0xbb0] sm:$0xff]  ;;  %v5696_v21 = vld [vmem:[#allocation8 + $0x8] sm:$0xff]  ;;  %v3281_v48 = vld [vmem:[%s4996_s9 + $0x9a0] sm:$0xff] }
 0x313   : > { %3695 = vmatpush.msra.mxu1 %v3285_v17  ;;  %3718 = vmatpush.msra.mxu2 %v3317_v8  ;;  %v3313_v17 = vld [vmem:[%s4996_s9 + $0xaa0] sm:$0xff]  ;;  %v3243_v10 = vld [vmem:[%s4996_s9 + $0x870] sm:$0xff]  ;;  %v6522_v51 = vperm.slane %v5696_v21, 3 }
 0x314   : > { %3741 = vmatpush.msra.mxu3 %v3349_v0  ;;  %3596 = vmatmul.f32.gmra.mxu0 %v6450_v24  ;;  %v3345_v8 = vld [vmem:[%s4996_s9 + $0xba0] sm:$0xff]  ;;  %v3247_v0 = vld [vmem:[%s4996_s9 + $0x890] sm:$0xff]  ;;  %v6458_v24 = vperm.slane %v5696_v21, 0 }
 0x315   : > { %3619 = vmatmul.f32.gmra.mxu1 %v6449_v34  ;;  %3642 = vmatmul.f32.gmra.mxu2 %v6451_v45  ;;  %v3279_v34 = vld [vmem:[%s4996_s9 + $0x990] sm:$0xff]  ;;  %v6459_v45 = vperm.slane %v5696_v21, 1  ;;  %v3277_v29 = vld [vmem:[%s4996_s9 + $0x980] sm:$0xff] }
 0x316   : > { %3665 = vmatmul.f32.gmra.mxu3 %v6452_v5  ;;  %3673 = vmatpush.msra.mxu0 %v3251_v11  ;;  %v3311_v5 = vld [vmem:[%s4996_s9 + $0xa90] sm:$0xff]  ;;  %v5716_v49 = vpop.f32.mrf.mxu2  ;;  %v3337_v42 = vld [vmem:[%s4996_s9 + $0xb60] sm:$0xff] }
 0x317   : > { %3696 = vmatpush.msra.mxu1 %v3283_v38  ;;  %3719 = vmatpush.msra.mxu2 %v3315_v28  ;;  %v3343_v11 = vld [vmem:[%s4996_s9 + $0xb90] sm:$0xff]  ;;  %v5720_v40 = vpop.f32.mrf.mxu0  ;;  %v2315_v38 = vadd.f32 %v5396_v18, %v6459_v45  ;;  %v3241_v18 = vld [vmem:[%s4996_s9 + $0x860] sm:$0xff] }
 0x318   : > { %3742 = vmatpush.msra.mxu3 %v3347_v23  ;;  %3674 = vmatpush.msra.mxu0 %v3249_v13  ;;  %v3245_v23 = vld [vmem:[%s4996_s9 + $0x880] sm:$0xff]  ;;  %v3275_v28 = vld [vmem:[%s4996_s9 + $0x970] sm:$0xff] }
 0x319   : > { %3697 = vmatpush.msra.mxu1 %v3281_v48  ;;  %3720 = vmatpush.msra.mxu2 %v3313_v17  ;;  %v3309_v13 = vld [vmem:[%s4996_s9 + $0xa80] sm:$0xff]  ;;  %v6520_v17 = vld [vmem:[#allocation33_spill] sm:$0xff] }
 0x31a   : > { %3743 = vmatpush.msra.mxu3 %v3345_v8  ;;  %3675 = vmatpush.msra.mxu0 %v3247_v0  ;;  %v3341_v48 = vld [vmem:[%s4996_s9 + $0xb80] sm:$0xff]  ;;  %v2223_v8 = vadd.f32 %v6520_v17, %v6458_v24  ;;  %v3339_v0 = vld [vmem:[%s4996_s9 + $0xb70] sm:$0xff]  ;;  %v2499_v17 = vadd.f32 %v5572_v56, %v6522_v51  ;;  %v5740_v24 = vpop.f32.mrf.mxu3 }
 0x31b   : > { %3698 = vmatpush.msra.mxu1 %v3279_v34  ;;  %3721 = vmatpush.msra.mxu2 %v3311_v5  ;;  %v3307_v34 = vld [vmem:[%s4996_s9 + $0xa70] sm:$0xff]  ;;  %v6521_v5 = vperm.slane %v5696_v21, 2  ;;  %v3305_v45 = vld [vmem:[%s4996_s9 + $0xa60] sm:$0xff] }
 0x31c   : > { %3744 = vmatpush.msra.mxu3 %v3343_v11  ;;  %3676 = vmatpush.msra.mxu0 %v3245_v23  ;;  %v5744_v23 = vpop.f32.mrf.mxu1  ;;  %v3271_v56 = vld [vmem:[%s4996_s9 + $0x950] sm:$0xff]  ;;  %v6523_v51 = vld [vmem:[#allocation35_spill] sm:$0xff]  ;;  %v2522_v22 = vadd.f32 %v5600_v50, %v2499_v17 }
 0x31d   : > { %3699 = vmatpush.msra.mxu1 %v3277_v29  ;;  %v2407_v11 = vadd.f32 %v5492_v59, %v6521_v5  ;;  %3722 = vmatpush.msra.mxu2 %v3309_v13  ;;  %v3273_v29 = vld [vmem:[%s4996_s9 + $0x960] sm:$0xff]  ;;  %v3239_v59 = vld [vmem:[%s4996_s9 + $0x850] sm:$0xff]  ;;  %v2246_v13 = vadd.f32 %v6523_v51, %v2223_v8 }
 0x31e   : > { %3745 = vmatpush.msra.mxu3 %v3341_v48  ;;  %3677 = vmatpush.msra.mxu0 %v3243_v10  ;;  %v2338_v48 = vadd.f32 %v5420_v47, %v2315_v38  ;;  %v3303_v5 = vld [vmem:[%s4996_s9 + $0xa50] sm:$0xff]  ;;  %v5758_v8 = vpop.f32.mrf.mxu2  ;;  %v3301_v47 = vld [vmem:[%s4996_s9 + $0xa40] sm:$0xff] }
 0x31f   : > { %3700 = vmatpush.msra.mxu1 %v3275_v28  ;;  %3723 = vmatpush.msra.mxu2 %v3307_v34  ;;  %v3335_v10 = vld [vmem:[%s4996_s9 + $0xb50] sm:$0xff]  ;;  %v2430_v28 = vadd.f32 %v5508_v52, %v2407_v11  ;;  %v3237_v34 = vld [vmem:[%s4996_s9 + $0x840] sm:$0xff]  ;;  %v5764_v11 = vpop.f32.mrf.mxu0 }
 0x320   : > { %3746 = vmatpush.msra.mxu3 %v3339_v0  ;;  %3678 = vmatpush.msra.mxu0 %v3241_v18  ;;  %v3269_v0 = vld [vmem:[%s4996_s9 + $0x940] sm:$0xff]  ;;  %v3235_v18 = vld [vmem:[%s4996_s9 + $0x830] sm:$0xff] }
 0x321   : > { %3701 = vmatpush.msra.mxu1 %v3273_v29  ;;  %3724 = vmatpush.msra.mxu2 %v3305_v45  ;;  %v3333_v38 = vld [vmem:[%s4996_s9 + $0xb40] sm:$0xff]  ;;  %v3267_v52 = vld [vmem:[%s4996_s9 + $0x930] sm:$0xff]  ;;  %v2361_v45 = vadd.f32 %v5442_v12, %v2338_v48  ;;  %v6525_v12 = vperm.slane %v5696_v21, 0 }
 0x322   : > { %3747 = vmatpush.msra.mxu3 %v3337_v42  ;;  %3679 = vmatpush.msra.mxu0 %v3239_v59  ;;  %v6524_v50 = vld [vmem:[#allocation36_spill] sm:$0xff]  ;;  %v2453_v59 = vadd.f32 %v5526_v2, %v2430_v28  ;;  %v3233_v51 = vld [vmem:[%s4996_s9 + $0x820] sm:$0xff] }
 0x323   : > { %3702 = vmatpush.msra.mxu1 %v3271_v56  ;;  %3725 = vmatpush.msra.mxu2 %v3303_v5  ;;  %v2269_v42 = vadd.f32 %v6524_v50, %v2246_v13  ;;  %v3299_v17 = vld [vmem:[%s4996_s9 + $0xa30] sm:$0xff]  ;;  %v2545_v56 = vadd.f32 %v5626_v43, %v2522_v22  ;;  %v3265_v5 = vld [vmem:[%s4996_s9 + $0x920] sm:$0xff]  ;;  %v6528_v22 = vperm.slane %v5696_v21, 2 }
 0x324   : > { %3748 = vmatpush.msra.mxu3 %v3335_v10  ;;  %3680 = vmatpush.msra.mxu0 %v3237_v34  ;;  %v3331_v29 = vld [vmem:[%s4996_s9 + $0xb30] sm:$0xff]  ;;  %v5774_v10 = vpop.f32.mrf.mxu3  ;;  %v6527_v34 = vperm.slane %v5696_v21, 1  ;;  %v3297_v2 = vld [vmem:[%s4996_s9 + $0xa20] sm:$0xff] }
 0x325   : > { %3703 = vmatpush.msra.mxu1 %v3269_v0  ;;  %3726 = vmatpush.msra.mxu2 %v3301_v47  ;;  %v6526_v13 = vld [vmem:[#allocation37_spill] sm:$0xff]  ;;  %v3329_v43 = vld [vmem:[%s4996_s9 + $0xb20] sm:$0xff]  ;;  %v2410_v28 = vadd.f32 %v5528_v1, %v6528_v22  ;;  %v6529_v47 = vperm.slane %v5696_v21, 3 }
 0x326   : > { %3749 = vmatpush.msra.mxu3 %v3333_v38  ;;  %v2226_v48 = vadd.f32 %v6526_v13, %v6525_v12  ;;  %v2318_v0 = vadd.f32 %v5444_v37, %v6527_v34  ;;  %3681 = vmatpush.msra.mxu0 %v3235_v18  ;;  %v3231_v50 = vld [vmem:[%s4996_s9 + $0x810] sm:$0xff]  ;;  %v5792_v12 = vpop.f32.mrf.mxu1  ;;  %v5795_v18 = vadd.f32 %v5375_v35, %v2269_v42  ;;  %v3229_v13 = vld [vmem:[%s4996_s9 + $0x800] sm:$0xff] }
 0x327   : > { %3704 = vmatpush.msra.mxu1 %v3267_v52  ;;  %v2502_v38 = vadd.f32 %v5628_v27, %v6529_v47  ;;  %3727 = vmatpush.msra.mxu2 %v3299_v17  ;;  %v3263_v37 = vld [vmem:[%s4996_s9 + $0x910] sm:$0xff]  ;;  %v5798_v52 = vadd.f32 %v5461_v20, %v2361_v45  ;;  %v5803_v17 = vadd.f32 %v5550_v39, %v2453_v59  ;;  %v3261_v35 = vld [vmem:[%s4996_s9 + $0x900] sm:$0xff] }
 0x328   : > { %3750 = vmatpush.msra.mxu3 %v3331_v29  ;;  %3682 = vmatpush.msra.mxu0 %v3233_v51  ;;  %v3295_v1 = vld [vmem:[%s4996_s9 + $0xa10] sm:$0xff]  ;;  %v5806_v29 = vadd.f32 %v5646_v55, %v2545_v56  ;;  %v2249_v42 = vadd.f32 %v5377_v15, %v2226_v48  ;;  %v2341_v20 = vadd.f32 %v5463_v60, %v2318_v0  ;;  %v3293_v45 = vld [vmem:[%s4996_s9 + $0xa00] sm:$0xff]  ;;  %v5816_v55 = vpop.f32.mrf.mxu2  ;;  %v2949_v56 = vmax.f32 %v5795_v18, 0.0  ;;  %v5824_v48 = vpop.f32.mrf.mxu0  ;;  %v3418_v18 = vld [vmem:[%s4996_s9 + $0xde8] sm:$0xff] }
 0x329   : > { %3705 = vmatpush.msra.mxu1 %v3265_v5  ;;  %v3327_v27 = vld [vmem:[%s4996_s9 + $0xb10] sm:$0xff]  ;;  %3728 = vmatpush.msra.mxu2 %v3297_v2  ;;  %v3325_v51 = vld [vmem:[%s4996_s9 + $0xb00] sm:$0xff]  ;;  %v2433_v39 = vadd.f32 %v5552_v63, %v2410_v28  ;;  %v2525_v59 = vadd.f32 %v5648_v62, %v2502_v38  ;;  %v2950_v15 = vmax.f32 %v5798_v52, 0.0  ;;  %v2951_v60 = vmax.f32 %v5803_v17, 0.0  ;;  %v3450_v52 = vld [vmem:[%s4996_s9 + $0xee8] sm:$0xff] }
 0x32a   : > { %3751 = vmatpush.msra.mxu3 %v3329_v43  ;;  %3683 = vmatpush.msra.mxu0 %v3231_v50  ;;  %v2952_v5 = vmax.f32 %v5806_v29, 0.0  ;;  %v3387_v63 = vld [vmem:[%s4996_s9 + $0xcf0] sm:$0xff]  ;;  %v2272_v34 = vadd.f32 %v5390_v25, %v2249_v42  ;;  %v2364_v0 = vadd.f32 %v5486_v33, %v2341_v20  ;;  %v3385_v25 = vld [vmem:[%s4996_s9 + $0xce0] sm:$0xff]  ;;  %v3384_v17 = vld [vmem:[%s4996_s9 + $0xcd8] sm:$0xff] }
 0x32b   : > { %3706 = vmatpush.msra.mxu1 %v3263_v37  ;;  %3729 = vmatpush.msra.mxu2 %v3295_v1  ;;  %v3419_v62 = vld [vmem:[%s4996_s9 + $0xdf0] sm:$0xff]  ;;  %v2456_v22 = vadd.f32 %v5566_v16, %v2433_v39  ;;  %v2548_v28 = vadd.f32 %v5674_v32, %v2525_v59  ;;  %v3417_v33 = vld [vmem:[%s4996_s9 + $0xde0] sm:$0xff]  ;;  %v3416_v29 = vld [vmem:[%s4996_s9 + $0xdd8] sm:$0xff] }
 0x32c   : > { %3752 = vmatpush.msra.mxu3 %v3327_v27  ;;  %3684 = vmatpush.msra.mxu0 %v3229_v13  ;;  %v3451_v2 = vld [vmem:[%s4996_s9 + $0xef0] sm:$0xff]  ;;  %v5842_v47 = vpop.f32.mrf.mxu3  ;;  %v3449_v38 = vld [vmem:[%s4996_s9 + $0xee0] sm:$0xff]  ;;  %v5851_v1 = vadd.f32 %v5405_v46, %v2272_v34  ;;  %v5854_v27 = vadd.f32 %v5498_v58, %v2364_v0 }
 0x32d   : > { %3707 = vmatpush.msra.mxu1 %v3261_v35  ;;  %3730 = vmatpush.msra.mxu2 %v3293_v45  ;;  %v3483_v43 = vld [vmem:[%s4996_s9 + $0xff0] sm:$0xff]  ;;  %v3481_v50 = vld [vmem:[%s4996_s9 + $0xfe0] sm:$0xff]  ;;  %v5859_v42 = vadd.f32 %v5582_v53, %v2456_v22  ;;  %v5862_v20 = vadd.f32 %v5686_v31, %v2548_v28 }
 0x32e   : > { %3753 = vmatpush.msra.mxu3 %v3325_v51  ;;  %3685 = vmatmul.f32.vlgmr.msra.gmra.mxu0 %v2949_v56  ;;  %v3383_v16 = vld [vmem:[%s4996_s9 + $0xcd0] sm:$0xff]  ;;  %v5848_v37 = vpop.f32.mrf.mxu1  ;;  %v3381_v45 = vld [vmem:[%s4996_s9 + $0xcc0] sm:$0xff]  ;;  %v6465_v53 = vmax.f32 %v5851_v1, 0.0  ;;  %v6464_v31 = vmax.f32 %v5854_v27, 0.0 }
 0x32f   : > { %3708 = vmatmul.f32.vlgmr.msra.gmra.mxu1 %v2950_v15  ;;  %3731 = vmatmul.f32.vlgmr.msra.gmra.mxu2 %v2951_v60  ;;  %v3415_v32 = vld [vmem:[%s4996_s9 + $0xdd0] sm:$0xff]  ;;  %v3413_v51 = vld [vmem:[%s4996_s9 + $0xdc0] sm:$0xff]  ;;  %v6463_v59 = vmax.f32 %v5859_v42, 0.0 }
 0x330   : > { %3754 = vmatmul.f32.vlgmr.msra.gmra.mxu3 %v2952_v5  ;;  %3761 = vmatpush.msrb.mxu0 %v3387_v63  ;;  %v3447_v13 = vld [vmem:[%s4996_s9 + $0xed0] sm:$0xff]  ;;  %v3445_v46 = vld [vmem:[%s4996_s9 + $0xec0] sm:$0xff]  ;;  %v5868_v39 = vpop.f32.mrf.mxu2  ;;  %v6462_v63 = vmax.f32 %v5862_v20, 0.0  ;;  %v2774_v0 = vpop.f32.mrf.mxu0 }
 0x331   : > { %3784 = vmatpush.msrb.mxu1 %v3419_v62  ;;  %3807 = vmatpush.msrb.mxu2 %v3451_v2  ;;  %v3479_v35 = vld [vmem:[%s4996_s9 + $0xfd0] sm:$0xff]  ;;  %v3477_v58 = vld [vmem:[%s4996_s9 + $0xfc0] sm:$0xff] }
 0x332   : > { %3830 = vmatpush.msrb.mxu3 %v3483_v43  ;;  %3762 = vmatpush.msrb.mxu0 %v3385_v25  ;;  %v3379_v62 = vld [vmem:[%s4996_s9 + $0xcb0] sm:$0xff]  ;;  %v3377_v22 = vld [vmem:[%s4996_s9 + $0xca0] sm:$0xff] }
 0x333   : > { %3785 = vmatpush.msrb.mxu1 %v3417_v33  ;;  %3808 = vmatpush.msrb.mxu2 %v3449_v38  ;;  %v3411_v34 = vld [vmem:[%s4996_s9 + $0xdb0] sm:$0xff]  ;;  %v3409_v28 = vld [vmem:[%s4996_s9 + $0xda0] sm:$0xff] }
 0x334   : > { %3831 = vmatpush.msrb.mxu3 %v3481_v50  ;;  %3763 = vmatpush.msrb.mxu0 %v3383_v16  ;;  %v3443_v2 = vld [vmem:[%s4996_s9 + $0xeb0] sm:$0xff]  ;;  %v5888_v25 = vpop.f32.mrf.mxu3  ;;  %v3441_v33 = vld [vmem:[%s4996_s9 + $0xea0] sm:$0xff] }
 0x335   : > { %3786 = vmatpush.msrb.mxu1 %v3415_v32  ;;  %3809 = vmatpush.msrb.mxu2 %v3447_v13  ;;  %v3475_v43 = vld [vmem:[%s4996_s9 + $0xfb0] sm:$0xff]  ;;  %v3473_v38 = vld [vmem:[%s4996_s9 + $0xfa0] sm:$0xff]  ;;  %v1451_v32 = vperm.slane %v5696_v21, 6 }
 0x336   : > { %3832 = vmatpush.msrb.mxu3 %v3479_v35  ;;  %3764 = vmatpush.msrb.mxu0 %v3381_v45  ;;  %v3375_v50 = vld [vmem:[%s4996_s9 + $0xc90] sm:$0xff]  ;;  %v2797_v13 = vpop.f32.mrf.mxu1  ;;  %v1449_v35 = vperm.slane %v5696_v21, 4  ;;  %v1450_v45 = vperm.slane %v5696_v21, 5 }
 0x337   : > { %3787 = vmatpush.msrb.mxu1 %v3413_v51  ;;  %3810 = vmatpush.msrb.mxu2 %v3445_v46  ;;  %v3407_v16 = vld [vmem:[%s4996_s9 + $0xd90] sm:$0xff] }
 0x338   : > { %3833 = vmatpush.msrb.mxu3 %v3477_v58  ;;  %3688 = vmatmul.f32.gmra.mxu0 %v6465_v53  ;;  %v3439_v51 = vld [vmem:[%s4996_s9 + $0xe90] sm:$0xff]  ;;  %v3373_v58 = vld [vmem:[%s4996_s9 + $0xc80] sm:$0xff] }
 0x339   : > { %3711 = vmatmul.f32.gmra.mxu1 %v6464_v31  ;;  %3734 = vmatmul.f32.gmra.mxu2 %v6463_v59  ;;  %v3471_v46 = vld [vmem:[%s4996_s9 + $0xf90] sm:$0xff]  ;;  %v3465_v59 = vld [vmem:[%s4996_s9 + $0xf60] sm:$0xff] }
 0x33a   : > { %3757 = vmatmul.f32.gmra.mxu3 %v6462_v63  ;;  %3765 = vmatpush.msrb.mxu0 %v3379_v62  ;;  %v3405_v62 = vld [vmem:[%s4996_s9 + $0xd80] sm:$0xff]  ;;  %v3403_v63 = vld [vmem:[%s4996_s9 + $0xd70] sm:$0xff] }
 0x33b   : > { %3788 = vmatpush.msrb.mxu1 %v3411_v34  ;;  %3811 = vmatpush.msrb.mxu2 %v3443_v2  ;;  %v3437_v34 = vld [vmem:[%s4996_s9 + $0xe80] sm:$0xff] }
 0x33c   : > { %3834 = vmatpush.msrb.mxu3 %v3475_v43  ;;  %3766 = vmatpush.msrb.mxu0 %v3377_v22  ;;  %v3469_v2 = vld [vmem:[%s4996_s9 + $0xf80] sm:$0xff]  ;;  %v3371_v43 = vld [vmem:[%s4996_s9 + $0xc70] sm:$0xff]  ;;  %v2775_v22 = vadd.f32 %v2774_v0, %v1451_v32 }
 0x33d   : > { %3789 = vmatpush.msrb.mxu1 %v3409_v28  ;;  %3812 = vmatpush.msrb.mxu2 %v3441_v33  ;;  %v2820_v28 = vpop.f32.mrf.mxu2  ;;  %v2591_v33 = vadd.f32 %v5680_v4, %v1449_v35  ;;  %v3401_v0 = vld [vmem:[%s4996_s9 + $0xd60] sm:$0xff] }
 0x33e   : > { %3835 = vmatpush.msrb.mxu3 %v3473_v38  ;;  %3767 = vmatpush.msrb.mxu0 %v3375_v50  ;;  %v2683_v38 = vadd.f32 %v5764_v11, %v1450_v45  ;;  %v3435_v50 = vld [vmem:[%s4996_s9 + $0xe70] sm:$0xff]  ;;  %v3433_v4 = vld [vmem:[%s4996_s9 + $0xe60] sm:$0xff]  ;;  %v2798_v11 = vadd.f32 %v2797_v13, %v2775_v22  ;;  %v2800_v22 = vpop.f32.mrf.mxu1 }
 0x33f   : > { %3790 = vmatpush.msrb.mxu1 %v3407_v16  ;;  %3813 = vmatpush.msrb.mxu2 %v3439_v51  ;;  %v3467_v16 = vld [vmem:[%s4996_s9 + $0xf70] sm:$0xff]  ;;  %v3369_v51 = vld [vmem:[%s4996_s9 + $0xc60] sm:$0xff] }
 0x340   : > { %3836 = vmatpush.msrb.mxu3 %v3471_v46  ;;  %3768 = vmatpush.msrb.mxu0 %v3373_v58  ;;  %v2777_v46 = vpop.f32.mrf.mxu0  ;;  %v3367_v58 = vld [vmem:[%s4996_s9 + $0xc50] sm:$0xff]  ;;  %v2706_v31 = vadd.f32 %v5792_v12, %v2683_v38  ;;  %v3397_v13 = vld [vmem:[%s4996_s9 + $0xd40] sm:$0xff] }
 0x341   : > { %3791 = vmatpush.msrb.mxu1 %v3405_v62  ;;  %3814 = vmatpush.msrb.mxu2 %v3437_v34  ;;  %v3399_v62 = vld [vmem:[%s4996_s9 + $0xd50] sm:$0xff]  ;;  %v2843_v34 = vpop.f32.mrf.mxu3  ;;  %v3461_v53 = vld [vmem:[%s4996_s9 + $0xf40] sm:$0xff] }
 0x342   : > { %3837 = vmatpush.msrb.mxu3 %v3469_v2  ;;  %3769 = vmatpush.msrb.mxu0 %v3371_v43  ;;  %v2614_v2 = vadd.f32 %v5698_v6, %v2591_v33  ;;  %v3463_v43 = vld [vmem:[%s4996_s9 + $0xf50] sm:$0xff]  ;;  %v2821_v6 = vadd.f32 %v2820_v28, %v2798_v11  ;;  %v2594_v28 = vadd.f32 %v5720_v40, %v1449_v35  ;;  %v3393_v11 = vld [vmem:[%s4996_s9 + $0xd20] sm:$0xff]  ;;  %v1452_v35 = vperm.slane %v5696_v21, 7  ;;  %v3060_v21 = vld [vmem:[%s4996_s9 + $0x2b8] sm:$0xff] }
 0x343   : > { %3792 = vmatpush.msrb.mxu1 %v3403_v63  ;;  %3815 = vmatpush.msrb.mxu2 %v3435_v50  ;;  %v3431_v63 = vld [vmem:[%s4996_s9 + $0xe50] sm:$0xff]  ;;  %v3365_v50 = vld [vmem:[%s4996_s9 + $0xc40] sm:$0xff] }
 0x344   : > { %3838 = vmatpush.msrb.mxu3 %v3467_v16  ;;  %3770 = vmatpush.msrb.mxu0 %v3369_v51  ;;  %v3429_v16 = vld [vmem:[%s4996_s9 + $0xe40] sm:$0xff]  ;;  %v3363_v12 = vld [vmem:[%s4996_s9 + $0xc30] sm:$0xff]  ;;  %v2637_v38 = vadd.f32 %v5716_v49, %v2614_v2 }
 0x345   : > { %3793 = vmatpush.msrb.mxu1 %v3401_v0  ;;  %3816 = vmatpush.msrb.mxu2 %v3433_v4  ;;  %v3395_v33 = vld [vmem:[%s4996_s9 + $0xd30] sm:$0xff]  ;;  %v2778_v4 = vadd.f32 %v2777_v46, %v1451_v32  ;;  %v3361_v49 = vld [vmem:[%s4996_s9 + $0xc20] sm:$0xff]  ;;  %v5947_v46 = vadd.f32 %v2843_v34, %v2821_v6 }
 0x346   : > { %3839 = vmatpush.msrb.mxu3 %v3465_v59  ;;  %3771 = vmatpush.msrb.mxu0 %v3367_v58  ;;  %v2729_v59 = vadd.f32 %v5816_v55, %v2706_v31  ;;  %v3427_v51 = vld [vmem:[%s4996_s9 + $0xe30] sm:$0xff]  ;;  %v2823_v58 = vpop.f32.mrf.mxu2  ;;  %v2686_v55 = vadd.f32 %v5824_v48, %v1450_v45  ;;  %v3425_v31 = vld [vmem:[%s4996_s9 + $0xe20] sm:$0xff]  ;;  %v5953_v2 = vadd.f32 %v5740_v24, %v2637_v38 }
 0x347   : > { %3794 = vmatpush.msrb.mxu1 %v3399_v62  ;;  %3817 = vmatpush.msrb.mxu2 %v3431_v63  ;;  %v3459_v0 = vld [vmem:[%s4996_s9 + $0xf30] sm:$0xff]  ;;  %v3457_v32 = vld [vmem:[%s4996_s9 + $0xf20] sm:$0xff]  ;;  %v2801_v45 = vadd.f32 %v2800_v22, %v2778_v4  ;;  %v2955_v22 = vmax.f32 %v5947_v46, 0.0  ;;  %v3068_v4 = vld [vmem:[%s4996_s9 + $0x2f8] sm:$0xff] }
 0x348   : > { %3840 = vmatpush.msrb.mxu3 %v3463_v43  ;;  %3772 = vmatpush.msrb.mxu0 %v3365_v50  ;;  %v3359_v40 = vld [vmem:[%s4996_s9 + $0xc10] sm:$0xff]  ;;  %v2866_v62 = vpop.f32.mrf.mxu0  ;;  %v5956_v48 = vadd.f32 %v5842_v47, %v2729_v59  ;;  %v2617_v43 = vadd.f32 %v5744_v23, %v2594_v28  ;;  %v3357_v50 = vld [vmem:[%s4996_s9 + $0xc00] sm:$0xff]  ;;  %v2709_v24 = vadd.f32 %v5848_v37, %v2686_v55  ;;  %v3004_v59 = vld [vmem:[%s4996_s9 + $0xf8] sm:$0xff] }
 0x349   : > { %3795 = vmatpush.msrb.mxu1 %v3397_v13  ;;  %3818 = vmatpush.msrb.mxu2 %v3429_v16  ;;  %v3423_v34 = vld [vmem:[%s4996_s9 + $0xe10] sm:$0xff]  ;;  %v3389_v13 = vld [vmem:[%s4996_s9 + $0xd00] sm:$0xff]  ;;  %v2846_v16 = vpop.f32.mrf.mxu3  ;;  %v2867_v23 = vadd.f32 %v2866_v62, %v1452_v35  ;;  %v2824_v38 = vadd.f32 %v2823_v58, %v2801_v45  ;;  %v3066_v58 = vld [vmem:[%s4996_s9 + $0x2e8] sm:$0xff] }
 0x34a   : > { %3841 = vmatpush.msrb.mxu3 %v3461_v53  ;;  %3773 = vmatpush.msrb.mxu0 %v3363_v12  ;;  %v3391_v53 = vld [vmem:[%s4996_s9 + $0xd10] sm:$0xff]  ;;  %v3421_v47 = vld [vmem:[%s4996_s9 + $0xe00] sm:$0xff]  ;;  %v2889_v12 = vpop.f32.mrf.mxu1  ;;  %v2954_v37 = vmax.f32 %v5956_v48, 0.0  ;;  %v2732_v28 = vadd.f32 %v5868_v39, %v2709_v24  ;;  %v3032_v62 = vld [vmem:[%s4996_s9 + $0x1d8] sm:$0xff] }
 0x34b   : > { %3796 = vmatpush.msrb.mxu1 %v3395_v33  ;;  %3819 = vmatpush.msrb.mxu2 %v3427_v51  ;;  %v3455_v63 = vld [vmem:[%s4996_s9 + $0xf10] sm:$0xff]  ;;  %v3453_v6 = vld [vmem:[%s4996_s9 + $0xf00] sm:$0xff]  ;;  %v2953_v33 = vmax.f32 %v5953_v2, 0.0  ;;  %v2640_v51 = vadd.f32 %v5758_v8, %v2617_v43  ;;  %v3034_v8 = vld [vmem:[%s4996_s9 + $0x1e8] sm:$0xff]  ;;  %v2890_v55 = vadd.f32 %v2889_v12, %v2867_v23  ;;  %v5986_v39 = vadd.f32 %v2846_v16, %v2824_v38 }
 0x34c   : > { %3842 = vmatpush.msrb.mxu3 %v3459_v0  ;;  %3774 = vmatpush.msrb.mxu0 %v3361_v49  ;;  %v3036_v0 = vld [vmem:[%s4996_s9 + $0x1f8] sm:$0xff]  ;;  %v3062_v16 = vld [vmem:[%s4996_s9 + $0x2c8] sm:$0xff] }
 0x34d   : > { %3797 = vmatpush.msrb.mxu1 %v3393_v11  ;;  %3820 = vmatpush.msrb.mxu2 %v3425_v31  ;;  %v3100_v49 = vld [vmem:[%s4996_s9 + $0x3f8] sm:$0xff]  ;;  %v3002_v11 = vld [vmem:[%s4996_s9 + $0xe8] sm:$0xff] }
 0x34e   : > { %3843 = vmatpush.msrb.mxu3 %v3457_v32  ;;  %3775 = vmatpush.msrb.mxu0 %v3359_v40  ;;  %v2912_v31 = vpop.f32.mrf.mxu2  ;;  %v3098_v32 = vld [vmem:[%s4996_s9 + $0x3e8] sm:$0xff]  ;;  %v3000_v40 = vld [vmem:[%s4996_s9 + $0xd8] sm:$0xff] }
 0x34f   : > { %3798 = vmatpush.msrb.mxu1 %v3391_v53  ;;  %3821 = vmatpush.msrb.mxu2 %v3423_v34  ;;  %v5991_v53 = vadd.f32 %v5774_v10, %v2640_v51  ;;  %v3064_v45 = vld [vmem:[%s4996_s9 + $0x2d8] sm:$0xff]  ;;  %v2913_v10 = vadd.f32 %v2912_v31, %v2890_v55 }
 0x350   : > { %3844 = vmatpush.msrb.mxu3 %v3455_v63  ;;  %3776 = vmatpush.msrb.mxu0 %v3357_v50  ;;  %v2869_v34 = vpop.f32.mrf.mxu0  ;;  %v5996_v63 = vadd.f32 %v5888_v25, %v2732_v28  ;;  %v3096_v43 = vld [vmem:[%s4996_s9 + $0x3d8] sm:$0xff]  ;;  %v2998_v50 = vld [vmem:[%s4996_s9 + $0xc8] sm:$0xff] }
 0x351   : > { %3799 = vmatpush.msrb.mxu1 %v3389_v13  ;;  %3822 = vmatpush.msrb.mxu2 %v3421_v47  ;;  %v3030_v13 = vld [vmem:[%s4996_s9 + $0x1c8] sm:$0xff]  ;;  %v2935_v24 = vpop.f32.mrf.mxu3  ;;  %v2971_v47 = vmax.f32 %v5986_v39, 0.0  ;;  %v2969_v23 = vmax.f32 %v5991_v53, 0.0  ;;  %v3028_v51 = vld [vmem:[%s4996_s9 + $0x1b8] sm:$0xff] }
 0x352   : > { %3845 = vmatpush.msrb.mxu3 %v3453_v6  ;;  %3777 = vmatmul.f32.vlgmr.msrb.gmra.mxu0 %v2953_v33  ;;  %v3094_v25 = vld [vmem:[%s4996_s9 + $0x3c8] sm:$0xff]  ;;  %v2870_v6 = vadd.f32 %v2869_v34, %v1452_v35  ;;  %v2892_v12 = vpop.f32.mrf.mxu1  ;;  %v2970_v38 = vmax.f32 %v5996_v63, 0.0  ;;  %v3092_v35 = vld [vmem:[%s4996_s9 + $0x3b8] sm:$0xff] }
 0x353   : > { %3800 = vmatmul.f32.vlgmr.msrb.gmra.mxu1 %v2954_v37  ;;  %3823 = vmatmul.f32.vlgmr.msrb.gmra.mxu2 %v2955_v22  ;;  %v3026_v28 = vld [vmem:[%s4996_s9 + $0x1a8] sm:$0xff]  ;;  %v2992_v55 = vld [vmem:[%s4996_s9 + $0x98] sm:$0xff] }
 0x354   : > { %3853 = vmatpush.msra.mxu0 %v3004_v59  ;;  %3876 = vmatpush.msra.mxu1 %v3036_v0  ;;  %v2996_v59 = vld [vmem:[%s4996_s9 + $0xb8] sm:$0xff]  ;;  %v6014_v0 = vadd.f32 %v2935_v24, %v2913_v10 }
 0x355   : > { %3899 = vmatpush.msra.mxu2 %v3068_v4  ;;  %3922 = vmatpush.msra.mxu3 %v3100_v49  ;;  %v2994_v4 = vld [vmem:[%s4996_s9 + $0xa8] sm:$0xff]  ;;  %v2893_v49 = vadd.f32 %v2892_v12, %v2870_v6  ;;  %v3024_v31 = vld [vmem:[%s4996_s9 + $0x198] sm:$0xff] }
 0x356   : > { %3854 = vmatpush.msra.mxu0 %v3002_v11  ;;  %3877 = vmatpush.msra.mxu1 %v3034_v8  ;;  %v3058_v11 = vld [vmem:[%s4996_s9 + $0x2a8] sm:$0xff]  ;;  %v2988_v10 = vld [vmem:[%s4996_s9 + $0x78] sm:$0xff] }
 0x357   : > { %3900 = vmatpush.msra.mxu2 %v3066_v58  ;;  %3923 = vmatpush.msra.mxu3 %v3098_v32  ;;  %v3090_v8 = vld [vmem:[%s4996_s9 + $0x3a8] sm:$0xff]  ;;  %v2915_v58 = vpop.f32.mrf.mxu2  ;;  %v2956_v32 = vmax.f32 %v6014_v0, 0.0  ;;  %v3020_v24 = vld [vmem:[%s4996_s9 + $0x178] sm:$0xff] }
 0x358   : > { %3855 = vmatpush.msra.mxu0 %v3000_v40  ;;  %3878 = vmatpush.msra.mxu1 %v3032_v62  ;;  %v3056_v40 = vld [vmem:[%s4996_s9 + $0x298] sm:$0xff]  ;;  %v2916_v34 = vadd.f32 %v2915_v58, %v2893_v49  ;;  %v2982_v58 = vld [vmem:[%s4996_s9 + $0x48] sm:$0xff] }
 0x359   : > { %3901 = vmatpush.msra.mxu2 %v3064_v45  ;;  %3924 = vmatpush.msra.mxu3 %v3096_v43  ;;  %v3088_v62 = vld [vmem:[%s4996_s9 + $0x398] sm:$0xff]  ;;  %v2990_v45 = vld [vmem:[%s4996_s9 + $0x88] sm:$0xff] }
 0x35a   : > { %3856 = vmatpush.msra.mxu0 %v2998_v50  ;;  %3879 = vmatpush.msra.mxu1 %v3030_v13  ;;  %v3022_v43 = vld [vmem:[%s4996_s9 + $0x188] sm:$0xff]  ;;  %v2938_v13 = vpop.f32.mrf.mxu3  ;;  %v3084_v6 = vld [vmem:[%s4996_s9 + $0x378] sm:$0xff] }
 0x35b   : > { %3902 = vmatpush.msra.mxu2 %v3062_v16  ;;  %3925 = vmatpush.msra.mxu3 %v3094_v25  ;;  %v3054_v50 = vld [vmem:[%s4996_s9 + $0x288] sm:$0xff]  ;;  %v3052_v25 = vld [vmem:[%s4996_s9 + $0x278] sm:$0xff]  ;;  %v6039_v12 = vadd.f32 %v2938_v13, %v2916_v34 }
 0x35c   : > { %3780 = vmatmul.f32.gmra.mxu0 %v2969_v23  ;;  %3803 = vmatmul.f32.gmra.mxu1 %v2970_v38  ;;  %v3086_v16 = vld [vmem:[%s4996_s9 + $0x388] sm:$0xff]  ;;  %v3048_v49 = vld [vmem:[%s4996_s9 + $0x258] sm:$0xff] }
 0x35d   : > { %3826 = vmatmul.f32.gmra.mxu2 %v2971_v47  ;;  %3857 = vmatpush.msra.mxu0 %v2996_v59  ;;  %v2986_v59 = vld [vmem:[%s4996_s9 + $0x68] sm:$0xff]  ;;  %v3044_v34 = vld [vmem:[%s4996_s9 + $0x238] sm:$0xff] }
 0x35e   : > { %3880 = vmatpush.msra.mxu1 %v3028_v51  ;;  %3903 = vmatpush.msra.mxu2 %v3060_v21  ;;  %v3018_v51 = vld [vmem:[%s4996_s9 + $0x168] sm:$0xff] }
 0x35f   : > { %3926 = vmatpush.msra.mxu3 %v3092_v35  ;;  %3858 = vmatpush.msra.mxu0 %v2994_v4  ;;  %v3050_v21 = vld [vmem:[%s4996_s9 + $0x268] sm:$0xff]  ;;  %v2984_v4 = vld [vmem:[%s4996_s9 + $0x58] sm:$0xff] }
 0x360   : > { %3881 = vmatpush.msra.mxu1 %v3026_v28  ;;  %3904 = vmatpush.msra.mxu2 %v3058_v11  ;;  %v3082_v35 = vld [vmem:[%s4996_s9 + $0x368] sm:$0xff]  ;;  %v3016_v28 = vld [vmem:[%s4996_s9 + $0x158] sm:$0xff]  ;;  %v2972_v11 = vmax.f32 %v6039_v12, 0.0 }
 0x361   : > { %3927 = vmatpush.msra.mxu3 %v3090_v8  ;;  %3859 = vmatpush.msra.mxu0 %v2992_v55  ;;  %v3080_v8 = vld [vmem:[%s4996_s9 + $0x358] sm:$0xff]  ;;  %v3014_v55 = vld [vmem:[%s4996_s9 + $0x148] sm:$0xff] }
 0x362   : > { %3882 = vmatpush.msra.mxu1 %v3024_v31  ;;  %3905 = vmatpush.msra.mxu2 %v3056_v40  ;;  %v3046_v31 = vld [vmem:[%s4996_s9 + $0x248] sm:$0xff] }
 0x363   : > { %3928 = vmatpush.msra.mxu3 %v3088_v62  ;;  %3860 = vmatpush.msra.mxu0 %v2990_v45  ;;  %v3078_v40 = vld [vmem:[%s4996_s9 + $0x348] sm:$0xff]  ;;  %v2980_v62 = vld [vmem:[%s4996_s9 + $0x38] sm:$0xff] }
 0x364   : > { %3846 = vmatmul.f32.vlgmr.msrb.gmra.mxu3 %v2956_v32  ;;  %3883 = vmatpush.msra.mxu1 %v3022_v43  ;;  %v3012_v45 = vld [vmem:[%s4996_s9 + $0x138] sm:$0xff]  ;;  %v3010_v13 = vld [vmem:[%s4996_s9 + $0x128] sm:$0xff] }
 0x365   : > { %3906 = vmatpush.msra.mxu2 %v3054_v50  ;;  %3929 = vmatpush.msra.mxu3 %v3086_v16  ;;  %v3076_v43 = vld [vmem:[%s4996_s9 + $0x338] sm:$0xff]  ;;  %v2978_v50 = vld [vmem:[%s4996_s9 + $0x28] sm:$0xff] }
 0x366   : > { %3861 = vmatpush.msra.mxu0 %v2988_v10  ;;  %3884 = vmatpush.msra.mxu1 %v3020_v24  ;;  %v3042_v16 = vld [vmem:[%s4996_s9 + $0x228] sm:$0xff]  ;;  %v2976_v24 = vld [vmem:[%s4996_s9 + $0x18] sm:$0xff] }
 0x367   : > { %3907 = vmatpush.msra.mxu2 %v3052_v25  ;;  %3930 = vmatpush.msra.mxu3 %v3084_v6  ;;  %v3074_v10 = vld [vmem:[%s4996_s9 + $0x328] sm:$0xff]  ;;  %v3008_v25 = vld [vmem:[%s4996_s9 + $0x118] sm:$0xff] }
 0x368   : > { %3862 = vmatpush.msra.mxu0 %v2986_v59  ;;  %3885 = vmatpush.msra.mxu1 %v3018_v51  ;;  %v3040_v6 = vld [vmem:[%s4996_s9 + $0x218] sm:$0xff]  ;;  %v2974_v51 = vld [vmem:[%s4996_s9 + $0x8] sm:$0xff] }
 0x369   : > { %3908 = vmatpush.msra.mxu2 %v3050_v21  ;;  %3931 = vmatpush.msra.mxu3 %v3082_v35  ;;  %v3072_v59 = vld [vmem:[%s4996_s9 + $0x318] sm:$0xff]  ;;  %v3006_v21 = vld [vmem:[%s4996_s9 + $0x108] sm:$0xff] }
 0x36a   : > { %3863 = vmatpush.msra.mxu0 %v2984_v4  ;;  %3886 = vmatpush.msra.mxu1 %v3016_v28  ;;  %v3038_v35 = vld [vmem:[%s4996_s9 + $0x208] sm:$0xff]  ;;  %v3132_v28 = vld [vmem:[%s4996_s9 + $0x4f8] sm:$0xff] }
 0x36b   : > { %3909 = vmatpush.msra.mxu2 %v3048_v49  ;;  %3932 = vmatpush.msra.mxu3 %v3080_v8  ;;  %v3070_v4 = vld [vmem:[%s4996_s9 + $0x308] sm:$0xff]  ;;  %v3164_v49 = vld [vmem:[%s4996_s9 + $0x5f8] sm:$0xff]  ;;  %v6530_v8 = vmax.f32 %v5425_v44, 0.0 }
 0x36c   : > { %3864 = vmatpush.msra.mxu0 %v2982_v58  ;;  %3849 = vmatmul.f32.gmra.mxu3 %v2972_v11  ;;  %v6531_v58 = vmax.f32 %v5428_v54, 0.0  ;;  %v3194_v44 = vld [vmem:[%s4996_s9 + $0x6e8] sm:$0xff] }
 0x36d   : > { %3887 = vmatpush.msra.mxu1 %v3014_v55  ;;  %3910 = vmatpush.msra.mxu2 %v3046_v31  ;;  %v3196_v55 = vld [vmem:[%s4996_s9 + $0x6f8] sm:$0xff]  ;;  %v3226_v54 = vld [vmem:[%s4996_s9 + $0x7e8] sm:$0xff] }
 0x36e   : > { %3933 = vmatpush.msra.mxu3 %v3078_v40  ;;  %3865 = vmatpush.msra.mxu0 %v2980_v62  ;;  %v3228_v31 = vld [vmem:[%s4996_s9 + $0x7f8] sm:$0xff]  ;;  %v6532_v40 = vmax.f32 %v5433_v3, 0.0  ;;  %v6533_v62 = vmax.f32 %v5143_v7, 0.0 }
 0x36f   : > { %3888 = vmatpush.msra.mxu1 %v3012_v45  ;;  %3911 = vmatpush.msra.mxu2 %v3044_v34  ;;  %v3130_v45 = vld [vmem:[%s4996_s9 + $0x4e8] sm:$0xff]  ;;  %v3192_v3 = vld [vmem:[%s4996_s9 + $0x6d8] sm:$0xff] }
 0x370   : > { %3934 = vmatpush.msra.mxu3 %v3076_v43  ;;  %3866 = vmatpush.msra.mxu0 %v2978_v50  ;;  %v3162_v34 = vld [vmem:[%s4996_s9 + $0x5e8] sm:$0xff]  ;;  %v3128_v43 = vld [vmem:[%s4996_s9 + $0x4d8] sm:$0xff] }
 0x371   : > { %3889 = vmatpush.msra.mxu1 %v3010_v13  ;;  %3912 = vmatpush.msra.mxu2 %v3042_v16  ;;  %v3160_v50 = vld [vmem:[%s4996_s9 + $0x5d8] sm:$0xff]  ;;  %v3126_v13 = vld [vmem:[%s4996_s9 + $0x4c8] sm:$0xff] }
 0x372   : > { %3935 = vmatpush.msra.mxu3 %v3074_v10  ;;  %3867 = vmatpush.msra.mxu0 %v2976_v24  ;;  %v3224_v7 = vld [vmem:[%s4996_s9 + $0x7d8] sm:$0xff]  ;;  %v3158_v16 = vld [vmem:[%s4996_s9 + $0x5c8] sm:$0xff] }
 0x373   : > { %3890 = vmatpush.msra.mxu1 %v3008_v25  ;;  %3913 = vmatpush.msra.mxu2 %v3040_v6  ;;  %v3190_v10 = vld [vmem:[%s4996_s9 + $0x6c8] sm:$0xff]  ;;  %v3124_v25 = vld [vmem:[%s4996_s9 + $0x4b8] sm:$0xff] }
 0x374   : > { %3936 = vmatpush.msra.mxu3 %v3072_v59  ;;  %3868 = vmatpush.msra.mxu0 %v2974_v51  ;;  %v3222_v24 = vld [vmem:[%s4996_s9 + $0x7c8] sm:$0xff]  ;;  %v3156_v6 = vld [vmem:[%s4996_s9 + $0x5b8] sm:$0xff]  ;;  %v6534_v59 = vmax.f32 %v5476_v26, 0.0  ;;  %v6535_v51 = vmax.f32 %v5479_v14, 0.0 }
 0x375   : > { %3891 = vmatpush.msra.mxu1 %v3006_v21  ;;  %3914 = vmatpush.msra.mxu2 %v3038_v35  ;;  %v3188_v21 = vld [vmem:[%s4996_s9 + $0x6b8] sm:$0xff]  ;;  %v3186_v26 = vld [vmem:[%s4996_s9 + $0x6a8] sm:$0xff] }
 0x376   : > { %3937 = vmatpush.msra.mxu3 %v3070_v4  ;;  %3869 = vmatmul.f32.vlgmr.msra.gmra.mxu0 %v6530_v8  ;;  %v3220_v35 = vld [vmem:[%s4996_s9 + $0x7b8] sm:$0xff]  ;;  %v6536_v4 = vmax.f32 %v5484_v41, 0.0  ;;  %v3154_v8 = vld [vmem:[%s4996_s9 + $0x5a8] sm:$0xff] }
 0x377   : > { %3892 = vmatmul.f32.vlgmr.msra.gmra.mxu1 %v6531_v58  ;;  %3915 = vmatmul.f32.vlgmr.msra.gmra.mxu2 %v6532_v40  ;;  %v3218_v14 = vld [vmem:[%s4996_s9 + $0x7a8] sm:$0xff]  ;;  %v3120_v58 = vld [vmem:[%s4996_s9 + $0x498] sm:$0xff] }
 0x378   : > { %3938 = vmatmul.f32.vlgmr.msra.gmra.mxu3 %v6533_v62  ;;  %3945 = vmatpush.msrb.mxu0 %v3132_v28  ;;  %v6537_v28 = vmax.f32 %v5151_v30, 0.0  ;;  %v3152_v41 = vld [vmem:[%s4996_s9 + $0x598] sm:$0xff]  ;;  %v3150_v40 = vld [vmem:[%s4996_s9 + $0x588] sm:$0xff] }
 0x379   : > { %3968 = vmatpush.msrb.mxu1 %v3164_v49  ;;  %3991 = vmatpush.msrb.mxu2 %v3196_v55  ;;  %v3122_v49 = vld [vmem:[%s4996_s9 + $0x4a8] sm:$0xff]  ;;  %v3184_v30 = vld [vmem:[%s4996_s9 + $0x698] sm:$0xff] }
 0x37a   : > { %4014 = vmatpush.msrb.mxu3 %v3228_v31  ;;  %3946 = vmatpush.msrb.mxu0 %v3130_v45  ;;  %v3216_v55 = vld [vmem:[%s4996_s9 + $0x798] sm:$0xff]  ;;  %v3118_v31 = vld [vmem:[%s4996_s9 + $0x488] sm:$0xff] }
 0x37b   : > { %3969 = vmatpush.msrb.mxu1 %v3162_v34  ;;  %3992 = vmatpush.msrb.mxu2 %v3194_v44  ;;  %v3182_v62 = vld [vmem:[%s4996_s9 + $0x688] sm:$0xff]  ;;  %v3116_v34 = vld [vmem:[%s4996_s9 + $0x478] sm:$0xff] }
 0x37c   : > { %4015 = vmatpush.msrb.mxu3 %v3226_v54  ;;  %3947 = vmatpush.msrb.mxu0 %v3128_v43  ;;  %v3214_v45 = vld [vmem:[%s4996_s9 + $0x788] sm:$0xff]  ;;  %v3148_v44 = vld [vmem:[%s4996_s9 + $0x578] sm:$0xff] }
 0x37d   : > { %3970 = vmatpush.msrb.mxu1 %v3160_v50  ;;  %3993 = vmatpush.msrb.mxu2 %v3192_v3  ;;  %v3180_v54 = vld [vmem:[%s4996_s9 + $0x678] sm:$0xff]  ;;  %v3114_v50 = vld [vmem:[%s4996_s9 + $0x468] sm:$0xff] }
 0x37e   : > { %4016 = vmatpush.msrb.mxu3 %v3224_v7  ;;  %3948 = vmatpush.msrb.mxu0 %v3126_v13  ;;  %v3212_v43 = vld [vmem:[%s4996_s9 + $0x778] sm:$0xff]  ;;  %v3146_v3 = vld [vmem:[%s4996_s9 + $0x568] sm:$0xff] }
 0x37f   : > { %3971 = vmatpush.msrb.mxu1 %v3158_v16  ;;  %3994 = vmatpush.msrb.mxu2 %v3190_v10  ;;  %v3178_v7 = vld [vmem:[%s4996_s9 + $0x668] sm:$0xff]  ;;  %v3112_v16 = vld [vmem:[%s4996_s9 + $0x458] sm:$0xff] }
 0x380   : > { %4017 = vmatpush.msrb.mxu3 %v3222_v24  ;;  %3872 = vmatmul.f32.gmra.mxu0 %v6534_v59  ;;  %v3210_v13 = vld [vmem:[%s4996_s9 + $0x768] sm:$0xff]  ;;  %v3144_v10 = vld [vmem:[%s4996_s9 + $0x558] sm:$0xff] }
 0x381   : > { %3895 = vmatmul.f32.gmra.mxu1 %v6535_v51  ;;  %3918 = vmatmul.f32.gmra.mxu2 %v6536_v4  ;;  %v3176_v24 = vld [vmem:[%s4996_s9 + $0x658] sm:$0xff]  ;;  %v3142_v59 = vld [vmem:[%s4996_s9 + $0x548] sm:$0xff] }
 0x382   : > { %3941 = vmatmul.f32.gmra.mxu3 %v6537_v28  ;;  %3949 = vmatpush.msrb.mxu0 %v3124_v25  ;;  %v3208_v25 = vld [vmem:[%s4996_s9 + $0x758] sm:$0xff]  ;;  %v3174_v51 = vld [vmem:[%s4996_s9 + $0x648] sm:$0xff] }
 0x383   : > { %3972 = vmatpush.msrb.mxu1 %v3156_v6  ;;  %3995 = vmatpush.msrb.mxu2 %v3188_v21  ;;  %v3110_v6 = vld [vmem:[%s4996_s9 + $0x448] sm:$0xff]  ;;  %v3140_v4 = vld [vmem:[%s4996_s9 + $0x538] sm:$0xff] }
 0x384   : > { %4018 = vmatpush.msrb.mxu3 %v3220_v35  ;;  %3950 = vmatpush.msrb.mxu0 %v3122_v49  ;;  %v3206_v21 = vld [vmem:[%s4996_s9 + $0x748] sm:$0xff]  ;;  %v3108_v35 = vld [vmem:[%s4996_s9 + $0x438] sm:$0xff] }
 0x385   : > { %3973 = vmatpush.msrb.mxu1 %v3154_v8  ;;  %3996 = vmatpush.msrb.mxu2 %v3186_v26  ;;  %v3172_v28 = vld [vmem:[%s4996_s9 + $0x638] sm:$0xff]  ;;  %v3106_v8 = vld [vmem:[%s4996_s9 + $0x428] sm:$0xff] }
 0x386   : > { %4019 = vmatpush.msrb.mxu3 %v3218_v14  ;;  %3951 = vmatpush.msrb.mxu0 %v3120_v58  ;;  %v3204_v49 = vld [vmem:[%s4996_s9 + $0x738] sm:$0xff]  ;;  %v3138_v26 = vld [vmem:[%s4996_s9 + $0x528] sm:$0xff] }
 0x387   : > { %3974 = vmatpush.msrb.mxu1 %v3152_v41  ;;  %3997 = vmatpush.msrb.mxu2 %v3184_v30  ;;  %v3170_v14 = vld [vmem:[%s4996_s9 + $0x628] sm:$0xff]  ;;  %v3104_v41 = vld [vmem:[%s4996_s9 + $0x418] sm:$0xff] }
 0x388   : > { %4020 = vmatpush.msrb.mxu3 %v3216_v55  ;;  %3952 = vmatpush.msrb.mxu0 %v3118_v31  ;;  %v3202_v58 = vld [vmem:[%s4996_s9 + $0x728] sm:$0xff]  ;;  %v3136_v30 = vld [vmem:[%s4996_s9 + $0x518] sm:$0xff] }
 0x389   : > { %3975 = vmatpush.msrb.mxu1 %v3150_v40  ;;  %3998 = vmatpush.msrb.mxu2 %v3182_v62  ;;  %v3168_v55 = vld [vmem:[%s4996_s9 + $0x618] sm:$0xff]  ;;  %v3102_v40 = vld [vmem:[%s4996_s9 + $0x408] sm:$0xff] }
 0x38a   : > { %4021 = vmatpush.msrb.mxu3 %v3214_v45  ;;  %3953 = vmatpush.msrb.mxu0 %v3116_v34  ;;  %v3200_v31 = vld [vmem:[%s4996_s9 + $0x718] sm:$0xff]  ;;  %v3134_v62 = vld [vmem:[%s4996_s9 + $0x508] sm:$0xff] }
 0x38b   : > { %3976 = vmatpush.msrb.mxu1 %v3148_v44  ;;  %3999 = vmatpush.msrb.mxu2 %v3180_v54  ;;  %v3166_v45 = vld [vmem:[%s4996_s9 + $0x608] sm:$0xff]  ;;  %v3260_v44 = vld [vmem:[%s4996_s9 + $0x8f8] sm:$0xff] }
 0x38c   : > { %4022 = vmatpush.msrb.mxu3 %v3212_v43  ;;  %3954 = vmatpush.msrb.mxu0 %v3114_v50  ;;  %v3198_v34 = vld [vmem:[%s4996_s9 + $0x708] sm:$0xff]  ;;  %v3292_v54 = vld [vmem:[%s4996_s9 + $0x9f8] sm:$0xff]  ;;  %v6538_v43 = vmax.f32 %v5605_v9, 0.0  ;;  %v6539_v50 = vmax.f32 %v5608_v57, 0.0 }
 0x38d   : > { %3977 = vmatpush.msrb.mxu1 %v3146_v3  ;;  %4000 = vmatpush.msrb.mxu2 %v3178_v7  ;;  %v3324_v3 = vld [vmem:[%s4996_s9 + $0xaf8] sm:$0xff]  ;;  %v3322_v9 = vld [vmem:[%s4996_s9 + $0xae8] sm:$0xff] }
 0x38e   : > { %4023 = vmatpush.msrb.mxu3 %v3210_v13  ;;  %3955 = vmatpush.msrb.mxu0 %v3112_v16  ;;  %v3356_v7 = vld [vmem:[%s4996_s9 + $0xbf8] sm:$0xff]  ;;  %v6540_v13 = vmax.f32 %v5613_v19, 0.0  ;;  %v6541_v16 = vmax.f32 %v5616_v36, 0.0  ;;  %v3354_v57 = vld [vmem:[%s4996_s9 + $0xbe8] sm:$0xff] }
 0x38f   : > { %3978 = vmatpush.msrb.mxu1 %v3144_v10  ;;  %4001 = vmatpush.msrb.mxu2 %v3176_v24  ;;  %v3258_v10 = vld [vmem:[%s4996_s9 + $0x8e8] sm:$0xff]  ;;  %v3320_v19 = vld [vmem:[%s4996_s9 + $0xad8] sm:$0xff] }
 0x390   : > { %4024 = vmatpush.msrb.mxu3 %v3208_v25  ;;  %3956 = vmatpush.msrb.mxu0 %v3110_v6  ;;  %v3290_v24 = vld [vmem:[%s4996_s9 + $0x9e8] sm:$0xff]  ;;  %v3256_v25 = vld [vmem:[%s4996_s9 + $0x8d8] sm:$0xff] }
 0x391   : > { %3979 = vmatpush.msrb.mxu1 %v3142_v59  ;;  %4002 = vmatpush.msrb.mxu2 %v3174_v51  ;;  %v3288_v6 = vld [vmem:[%s4996_s9 + $0x9d8] sm:$0xff]  ;;  %v3254_v59 = vld [vmem:[%s4996_s9 + $0x8c8] sm:$0xff] }
 0x392   : > { %4025 = vmatpush.msrb.mxu3 %v3206_v21  ;;  %3957 = vmatpush.msrb.mxu0 %v3108_v35  ;;  %v3352_v36 = vld [vmem:[%s4996_s9 + $0xbd8] sm:$0xff]  ;;  %v3286_v51 = vld [vmem:[%s4996_s9 + $0x9c8] sm:$0xff] }
 0x393   : > { %3980 = vmatpush.msrb.mxu1 %v3140_v4  ;;  %4003 = vmatpush.msrb.mxu2 %v3172_v28  ;;  %v3318_v21 = vld [vmem:[%s4996_s9 + $0xac8] sm:$0xff]  ;;  %v3252_v4 = vld [vmem:[%s4996_s9 + $0x8b8] sm:$0xff] }
 0x394   : > { %4026 = vmatpush.msrb.mxu3 %v3204_v49  ;;  %3958 = vmatpush.msrb.mxu0 %v3106_v8  ;;  %v3350_v35 = vld [vmem:[%s4996_s9 + $0xbc8] sm:$0xff]  ;;  %v3284_v28 = vld [vmem:[%s4996_s9 + $0x9b8] sm:$0xff]  ;;  %v6542_v49 = vmax.f32 %v5661_v61, 0.0 }
 0x395   : > { %3981 = vmatpush.msrb.mxu1 %v3138_v26  ;;  %4004 = vmatpush.msrb.mxu2 %v3170_v14  ;;  %v6543_v8 = vld [vmem:[#allocation23_spill] sm:$0xff]  ;;  %v3316_v14 = vld [vmem:[%s4996_s9 + $0xab8] sm:$0xff] }
 0x396   : > { %4027 = vmatpush.msrb.mxu3 %v3202_v58  ;;  %3959 = vmatpush.msrb.mxu0 %v3104_v41  ;;  %v6544_v26 = vmax.f32 %v6543_v8, 0.0  ;;  %v3348_v58 = vld [vmem:[%s4996_s9 + $0xbb8] sm:$0xff]  ;;  %v6184_v41 = vpop.f32.mrf.mxu0  ;;  %v3282_v61 = vld [vmem:[%s4996_s9 + $0x9a8] sm:$0xff] }
 0x397   : > { %3982 = vmatpush.msrb.mxu1 %v3136_v30  ;;  %4005 = vmatpush.msrb.mxu2 %v3168_v55  ;;  %v6545_v30 = vld [vmem:[#allocation26_spill] sm:$0xff] }
 0x398   : > { %4028 = vmatpush.msrb.mxu3 %v3200_v31  ;;  %3960 = vmatpush.msrb.mxu0 %v3102_v40  ;;  %v6546_v55 = vmax.f32 %v6545_v30, 0.0  ;;  %v6547_v31 = vld [vmem:[#allocation29_spill] sm:$0xff]  ;;  %v3334_v30 = vld [vmem:[%s4996_s9 + $0xb48] sm:$0xff] }
 0x399   : > { %3983 = vmatpush.msrb.mxu1 %v3134_v62  ;;  %4006 = vmatpush.msrb.mxu2 %v3166_v45  ;;  %v6548_v40 = vmax.f32 %v6547_v31, 0.0  ;;  %v3250_v62 = vld [vmem:[%s4996_s9 + $0x8a8] sm:$0xff]  ;;  %v3336_v8 = vld [vmem:[%s4996_s9 + $0xb58] sm:$0xff] }
 0x39a   : > { %4029 = vmatpush.msrb.mxu3 %v3198_v34  ;;  %3961 = vmatmul.f32.vlgmr.msrb.gmra.mxu0 %v6538_v43  ;;  %v3314_v45 = vld [vmem:[%s4996_s9 + $0xaa8] sm:$0xff]  ;;  %v3312_v43 = vld [vmem:[%s4996_s9 + $0xa98] sm:$0xff] }
 0x39b   : > { %3984 = vmatmul.f32.vlgmr.msrb.gmra.mxu1 %v6539_v50  ;;  %4007 = vmatmul.f32.vlgmr.msrb.gmra.mxu2 %v6540_v13  ;;  %v3346_v34 = vld [vmem:[%s4996_s9 + $0xba8] sm:$0xff]  ;;  %v3344_v50 = vld [vmem:[%s4996_s9 + $0xb98] sm:$0xff] }
 0x39c   : > { %4030 = vmatmul.f32.vlgmr.msrb.gmra.mxu3 %v6541_v16  ;;  %4037 = vmatpush.msra.mxu0 %v3260_v44  ;;  %v3248_v44 = vld [vmem:[%s4996_s9 + $0x898] sm:$0xff]  ;;  %v3310_v13 = vld [vmem:[%s4996_s9 + $0xa88] sm:$0xff] }
 0x39d   : > { %4060 = vmatpush.msra.mxu1 %v3292_v54  ;;  %4083 = vmatpush.msra.mxu2 %v3324_v3  ;;  %v3280_v54 = vld [vmem:[%s4996_s9 + $0x998] sm:$0xff]  ;;  %v3246_v3 = vld [vmem:[%s4996_s9 + $0x888] sm:$0xff] }
 0x39e   : > { %4106 = vmatpush.msra.mxu3 %v3356_v7  ;;  %4038 = vmatpush.msra.mxu0 %v3258_v10  ;;  %v3278_v7 = vld [vmem:[%s4996_s9 + $0x988] sm:$0xff]  ;;  %v6202_v10 = vpop.f32.mrf.mxu1  ;;  %v3268_v31 = vld [vmem:[%s4996_s9 + $0x938] sm:$0xff] }
 0x39f   : > { %4061 = vmatpush.msra.mxu1 %v3290_v24  ;;  %4084 = vmatpush.msra.mxu2 %v3322_v9  ;;  %v3342_v16 = vld [vmem:[%s4996_s9 + $0xb88] sm:$0xff]  ;;  %v6204_v24 = vpop.f32.mrf.mxu2  ;;  %v3244_v9 = vld [vmem:[%s4996_s9 + $0x878] sm:$0xff] }
 0x3a0   : > { %4107 = vmatpush.msra.mxu3 %v3354_v57  ;;  %4039 = vmatpush.msra.mxu0 %v3256_v25  ;;  %v3276_v57 = vld [vmem:[%s4996_s9 + $0x978] sm:$0xff] }
 0x3a1   : > { %4062 = vmatpush.msra.mxu1 %v3288_v6  ;;  %4085 = vmatpush.msra.mxu2 %v3320_v19  ;;  %v3308_v25 = vld [vmem:[%s4996_s9 + $0xa78] sm:$0xff]  ;;  %v3242_v19 = vld [vmem:[%s4996_s9 + $0x868] sm:$0xff] }
 0x3a2   : > { %4108 = vmatpush.msra.mxu3 %v3352_v36  ;;  %4040 = vmatpush.msra.mxu0 %v3254_v59  ;;  %v3340_v6 = vld [vmem:[%s4996_s9 + $0xb78] sm:$0xff]  ;;  %v3274_v36 = vld [vmem:[%s4996_s9 + $0x968] sm:$0xff] }
 0x3a3   : > { %4063 = vmatpush.msra.mxu1 %v3286_v51  ;;  %4086 = vmatpush.msra.mxu2 %v3318_v21  ;;  %v3306_v59 = vld [vmem:[%s4996_s9 + $0xa68] sm:$0xff]  ;;  %v6214_v21 = vpop.f32.mrf.mxu0 }
 0x3a4   : > { %4109 = vmatpush.msra.mxu3 %v3350_v35  ;;  %3964 = vmatmul.f32.gmra.mxu0 %v6542_v49  ;;  %v3338_v51 = vld [vmem:[%s4996_s9 + $0xb68] sm:$0xff]  ;;  %v3240_v35 = vld [vmem:[%s4996_s9 + $0x858] sm:$0xff] }
 0x3a5   : > { %3987 = vmatmul.f32.gmra.mxu1 %v6544_v26  ;;  %4010 = vmatmul.f32.gmra.mxu2 %v6546_v55  ;;  %v3304_v49 = vld [vmem:[%s4996_s9 + $0xa58] sm:$0xff]  ;;  %v3238_v26 = vld [vmem:[%s4996_s9 + $0x848] sm:$0xff] }
 0x3a6   : > { %4033 = vmatmul.f32.gmra.mxu3 %v6548_v40  ;;  %4041 = vmatpush.msra.mxu0 %v3252_v4  ;;  %v3272_v4 = vld [vmem:[%s4996_s9 + $0x958] sm:$0xff] }
 0x3a7   : > { %4064 = vmatpush.msra.mxu1 %v3284_v28  ;;  %4087 = vmatpush.msra.mxu2 %v3316_v14  ;;  %v6218_v28 = vpop.f32.mrf.mxu3  ;;  %v3270_v14 = vld [vmem:[%s4996_s9 + $0x948] sm:$0xff]  ;;  %v3236_v55 = vld [vmem:[%s4996_s9 + $0x838] sm:$0xff] }
 0x3a8   : > { %4110 = vmatpush.msra.mxu3 %v3348_v58  ;;  %4042 = vmatpush.msra.mxu0 %v3250_v62  ;;  %v3302_v58 = vld [vmem:[%s4996_s9 + $0xa48] sm:$0xff]  ;;  %v3300_v40 = vld [vmem:[%s4996_s9 + $0xa38] sm:$0xff] }
 0x3a9   : > { %4065 = vmatpush.msra.mxu1 %v3282_v61  ;;  %4088 = vmatpush.msra.mxu2 %v3314_v45  ;;  %v3332_v62 = vld [vmem:[%s4996_s9 + $0xb38] sm:$0xff]  ;;  %v6230_v61 = vpop.f32.mrf.mxu1  ;;  %v6232_v45 = vpop.f32.mrf.mxu2 }
 0x3aa   : > { %4111 = vmatpush.msra.mxu3 %v3346_v34  ;;  %4043 = vmatpush.msra.mxu0 %v3248_v44  ;;  %v3234_v34 = vld [vmem:[%s4996_s9 + $0x828] sm:$0xff] }
 0x3ab   : > { %4066 = vmatpush.msra.mxu1 %v3280_v54  ;;  %4089 = vmatpush.msra.mxu2 %v3312_v43  ;;  %v3266_v44 = vld [vmem:[%s4996_s9 + $0x928] sm:$0xff] }
 0x3ac   : > { %4112 = vmatpush.msra.mxu3 %v3344_v50  ;;  %4044 = vmatpush.msra.mxu0 %v3246_v3  ;;  %v3298_v54 = vld [vmem:[%s4996_s9 + $0xa28] sm:$0xff]  ;;  %v6238_v50 = vpop.f32.mrf.mxu0  ;;  %v3232_v3 = vld [vmem:[%s4996_s9 + $0x818] sm:$0xff] }
 0x3ad   : > { %4067 = vmatpush.msra.mxu1 %v3278_v7  ;;  %4090 = vmatpush.msra.mxu2 %v3310_v13  ;;  %v3330_v43 = vld [vmem:[%s4996_s9 + $0xb28] sm:$0xff]  ;;  %v3264_v7 = vld [vmem:[%s4996_s9 + $0x918] sm:$0xff] }
 0x3ae   : > { %4113 = vmatpush.msra.mxu3 %v3342_v16  ;;  %4045 = vmatpush.msra.mxu0 %v3244_v9  ;;  %v3296_v13 = vld [vmem:[%s4996_s9 + $0xa18] sm:$0xff]  ;;  %v3230_v9 = vld [vmem:[%s4996_s9 + $0x808] sm:$0xff] }
 0x3af   : > { %4068 = vmatpush.msra.mxu1 %v3276_v57  ;;  %4091 = vmatpush.msra.mxu2 %v3308_v25  ;;  %v3328_v16 = vld [vmem:[%s4996_s9 + $0xb18] sm:$0xff]  ;;  %v3262_v57 = vld [vmem:[%s4996_s9 + $0x908] sm:$0xff]  ;;  %v6246_v25 = vpop.f32.mrf.mxu3 }
 0x3b0   : > { %4114 = vmatpush.msra.mxu3 %v3340_v6  ;;  %4046 = vmatpush.msra.mxu0 %v3242_v19  ;;  %v3294_v6 = vld [vmem:[%s4996_s9 + $0xa08] sm:$0xff] }
 0x3b1   : > { %4069 = vmatpush.msra.mxu1 %v3274_v36  ;;  %4092 = vmatpush.msra.mxu2 %v3306_v59  ;;  %v3326_v19 = vld [vmem:[%s4996_s9 + $0xb08] sm:$0xff]  ;;  %v6250_v36 = vpop.f32.mrf.mxu1  ;;  %v6252_v59 = vpop.f32.mrf.mxu2 }
 0x3b2   : > { %4115 = vmatpush.msra.mxu3 %v3338_v51  ;;  %4047 = vmatpush.msra.mxu0 %v3240_v35  ;;  %v3388_v51 = vld [vmem:[%s4996_s9 + $0xcf8] sm:$0xff] }
 0x3b3   : > { %4070 = vmatpush.msra.mxu1 %v3272_v4  ;;  %4093 = vmatpush.msra.mxu2 %v3304_v49  ;;  %v3420_v35 = vld [vmem:[%s4996_s9 + $0xdf8] sm:$0xff] }
 0x3b4   : > { %4116 = vmatpush.msra.mxu3 %v3336_v8  ;;  %4048 = vmatpush.msra.mxu0 %v3238_v26  ;;  %v3452_v4 = vld [vmem:[%s4996_s9 + $0xef8] sm:$0xff]  ;;  %v3526_v8 = vadd.f32 %v6202_v10, %v6184_v41  ;;  %v3386_v26 = vld [vmem:[%s4996_s9 + $0xce8] sm:$0xff] }
 0x3b5   : > { %4071 = vmatpush.msra.mxu1 %v3270_v14  ;;  %4094 = vmatpush.msra.mxu2 %v3302_v58  ;;  %v3484_v49 = vld [vmem:[%s4996_s9 + $0xff8] sm:$0xff]  ;;  %v6273_v14 = vpop.f32.mrf.mxu0  ;;  %v3382_v10 = vld [vmem:[%s4996_s9 + $0xcc8] sm:$0xff] }
 0x3b6   : > { %4117 = vmatpush.msra.mxu3 %v3334_v30  ;;  %4049 = vmatpush.msra.mxu0 %v3236_v55  ;;  %v3480_v41 = vld [vmem:[%s4996_s9 + $0xfd8] sm:$0xff]  ;;  %v3414_v58 = vld [vmem:[%s4996_s9 + $0xdc8] sm:$0xff] }
 0x3b7   : > { %4072 = vmatpush.msra.mxu1 %v3268_v31  ;;  %4095 = vmatpush.msra.mxu2 %v3300_v40  ;;  %v3478_v30 = vld [vmem:[%s4996_s9 + $0xfc8] sm:$0xff] }
 0x3b8   : > { %4118 = vmatpush.msra.mxu3 %v3332_v62  ;;  %4050 = vmatpush.msra.mxu0 %v3234_v34  ;;  %v3380_v34 = vld [vmem:[%s4996_s9 + $0xcb8] sm:$0xff] }
 0x3b9   : > { %4073 = vmatpush.msra.mxu1 %v3266_v44  ;;  %4096 = vmatpush.msra.mxu2 %v3298_v54  ;;  %v6287_v40 = vpop.f32.mrf.mxu1  ;;  %v6289_v62 = vpop.f32.mrf.mxu2  ;;  %v3412_v44 = vld [vmem:[%s4996_s9 + $0xdb8] sm:$0xff]  ;;  %v6549_v54 = vmax.f32 %v5851_v1, 0.0 }
 0x3ba   : > { %4119 = vmatpush.msra.mxu3 %v3330_v43  ;;  %4051 = vmatpush.msra.mxu0 %v3232_v3  ;;  %v6550_v43 = vmax.f32 %v5854_v27, 0.0  ;;  %v3476_v3 = vld [vmem:[%s4996_s9 + $0xfb8] sm:$0xff]  ;;  %v3442_v27 = vld [vmem:[%s4996_s9 + $0xea8] sm:$0xff] }
 0x3bb   : > { %4074 = vmatpush.msra.mxu1 %v3264_v7  ;;  %4097 = vmatpush.msra.mxu2 %v3296_v13  ;;  %v6551_v13 = vmax.f32 %v5859_v42, 0.0  ;;  %v3376_v42 = vld [vmem:[%s4996_s9 + $0xc98] sm:$0xff] }
 0x3bc   : > { %4120 = vmatpush.msra.mxu3 %v3328_v16  ;;  %4052 = vmatpush.msra.mxu0 %v3230_v9  ;;  %v6552_v16 = vmax.f32 %v5862_v20, 0.0  ;;  %v3378_v9 = vld [vmem:[%s4996_s9 + $0xca8] sm:$0xff]  ;;  %v3408_v20 = vld [vmem:[%s4996_s9 + $0xd98] sm:$0xff] }
 0x3bd   : > { %4075 = vmatpush.msra.mxu1 %v3262_v57  ;;  %4098 = vmatpush.msra.mxu2 %v3294_v6  ;;  %v3686_v7 = vpop.f32.mrf.mxu0 }
 0x3be   : > { %4121 = vmatpush.msra.mxu3 %v3326_v19  ;;  %4053 = vmatmul.f32.vlgmr.msra.gmra.mxu0 %v2949_v56  ;;  %v3482_v56 = vld [vmem:[%s4996_s9 + $0xfe8] sm:$0xff]  ;;  %v3440_v19 = vld [vmem:[%s4996_s9 + $0xe98] sm:$0xff] }
 0x3bf   : > { %4076 = vmatmul.f32.vlgmr.msra.gmra.mxu1 %v2950_v15  ;;  %4099 = vmatmul.f32.vlgmr.msra.gmra.mxu2 %v2951_v60  ;;  %v3549_v15 = vadd.f32 %v6204_v24, %v3526_v8  ;;  %v6277_v60 = vpop.f32.mrf.mxu3  ;;  %v3446_v24 = vld [vmem:[%s4996_s9 + $0xec8] sm:$0xff] }
 0x3c0   : > { %4122 = vmatmul.f32.vlgmr.msra.gmra.mxu3 %v2952_v5  ;;  %4129 = vmatpush.msrb.mxu0 %v3388_v51  ;;  %v3448_v5 = vld [vmem:[%s4996_s9 + $0xed8] sm:$0xff]  ;;  %v3470_v8 = vld [vmem:[%s4996_s9 + $0xf88] sm:$0xff] }
 0x3c1   : > { %4152 = vmatpush.msrb.mxu1 %v3420_v35  ;;  %4175 = vmatpush.msrb.mxu2 %v3452_v4  ;;  %v3572_v55 = vadd.f32 %v6218_v28, %v3549_v15  ;;  %v3529_v28 = vadd.f32 %v6230_v61, %v6214_v21  ;;  %v3410_v21 = vld [vmem:[%s4996_s9 + $0xda8] sm:$0xff]  ;;  %v3468_v15 = vld [vmem:[%s4996_s9 + $0xf78] sm:$0xff] }
 0x3c2   : > { %4198 = vmatpush.msrb.mxu3 %v3484_v49  ;;  %4130 = vmatpush.msrb.mxu0 %v3386_v26  ;;  %v3474_v61 = vld [vmem:[%s4996_s9 + $0xfa8] sm:$0xff]  ;;  %v3709_v26 = vpop.f32.mrf.mxu1 }
 0x3c3   : > { %4153 = vmatpush.msrb.mxu1 %v3418_v18  ;;  %4176 = vmatpush.msrb.mxu2 %v3450_v52  ;;  %v3595_v31 = vadd.f32 %v6238_v50, %v3572_v55  ;;  %v3444_v50 = vld [vmem:[%s4996_s9 + $0xeb8] sm:$0xff]  ;;  %v3552_v1 = vadd.f32 %v6232_v45, %v3529_v28  ;;  %v3374_v35 = vld [vmem:[%s4996_s9 + $0xc88] sm:$0xff]  ;;  %v3732_v18 = vpop.f32.mrf.mxu2 }
 0x3c4   : > { %4199 = vmatpush.msrb.mxu3 %v3482_v56  ;;  %4131 = vmatpush.msrb.mxu0 %v3384_v17  ;;  %v3472_v45 = vld [vmem:[%s4996_s9 + $0xf98] sm:$0xff]  ;;  %v3438_v49 = vld [vmem:[%s4996_s9 + $0xe88] sm:$0xff] }
 0x3c5   : > { %4154 = vmatpush.msrb.mxu1 %v3416_v29  ;;  %4177 = vmatpush.msrb.mxu2 %v3448_v5  ;;  %v3618_v57 = vadd.f32 %v6250_v36, %v3595_v31  ;;  %v3406_v36 = vld [vmem:[%s4996_s9 + $0xd88] sm:$0xff]  ;;  %v3575_v4 = vadd.f32 %v6246_v25, %v3552_v1  ;;  %v3404_v52 = vld [vmem:[%s4996_s9 + $0xd78] sm:$0xff] }
 0x3c6   : > { %4200 = vmatpush.msrb.mxu3 %v3480_v41  ;;  %4132 = vmatpush.msrb.mxu0 %v3382_v10  ;;  %v3436_v25 = vld [vmem:[%s4996_s9 + $0xe78] sm:$0xff]  ;;  %v3370_v29 = vld [vmem:[%s4996_s9 + $0xc68] sm:$0xff] }
 0x3c7   : > { %4155 = vmatpush.msrb.mxu1 %v3414_v58  ;;  %4178 = vmatpush.msrb.mxu2 %v3446_v24  ;;  %v6313_v6 = vpop.f32.mrf.mxu3  ;;  %v3641_v51 = vadd.f32 %v6252_v59, %v3618_v57  ;;  %v3372_v59 = vld [vmem:[%s4996_s9 + $0xc78] sm:$0xff]  ;;  %v3598_v56 = vadd.f32 %v6273_v14, %v3575_v4  ;;  %v3402_v5 = vld [vmem:[%s4996_s9 + $0xd68] sm:$0xff]  ;;  %v3689_v58 = vpop.f32.mrf.mxu0 }
 0x3c8   : > { %4201 = vmatpush.msrb.mxu3 %v3478_v30  ;;  %4056 = vmatmul.f32.gmra.mxu0 %v6549_v54  ;;  %v3434_v41 = vld [vmem:[%s4996_s9 + $0xe68] sm:$0xff]  ;;  %v3368_v24 = vld [vmem:[%s4996_s9 + $0xc58] sm:$0xff] }
 0x3c9   : > { %4079 = vmatmul.f32.gmra.mxu1 %v6550_v43  ;;  %4102 = vmatmul.f32.gmra.mxu2 %v6551_v13  ;;  %v3664_v17 = vadd.f32 %v6277_v60, %v3641_v51  ;;  %v3466_v10 = vld [vmem:[%s4996_s9 + $0xf68] sm:$0xff]  ;;  %v3400_v60 = vld [vmem:[%s4996_s9 + $0xd58] sm:$0xff]  ;;  %v3621_v30 = vadd.f32 %v6287_v40, %v3598_v56 }
 0x3ca   : > { %4125 = vmatmul.f32.gmra.mxu3 %v6552_v16  ;;  %4133 = vmatpush.msrb.mxu0 %v3380_v34  ;;  %v3432_v31 = vld [vmem:[%s4996_s9 + $0xe58] sm:$0xff]  ;;  %v3398_v28 = vld [vmem:[%s4996_s9 + $0xd48] sm:$0xff] }
 0x3cb   : > { %4156 = vmatpush.msrb.mxu1 %v3412_v44  ;;  %4179 = vmatpush.msrb.mxu2 %v3444_v50  ;;  %v3687_v14 = vadd.f32 %v3686_v7, %v3664_v17  ;;  %v3464_v34 = vld [vmem:[%s4996_s9 + $0xf58] sm:$0xff]  ;;  %v3366_v44 = vld [vmem:[%s4996_s9 + $0xc48] sm:$0xff]  ;;  %v3644_v54 = vadd.f32 %v6289_v62, %v3621_v30  ;;  %v6365_v17 = vld [vmem:[%s346_s26] sm:$0x3] }
 0x3cc   : > { %4202 = vmatpush.msrb.mxu3 %v3476_v3  ;;  %4134 = vmatpush.msrb.mxu0 %v3378_v9  ;;  %v3430_v43 = vld [vmem:[%s4996_s9 + $0xe48] sm:$0xff]  ;;  %v3364_v3 = vld [vmem:[%s4996_s9 + $0xc38] sm:$0xff]  ;;  %v3712_v9 = vpop.f32.mrf.mxu1 }
 0x3cd   : > { %4157 = vmatpush.msrb.mxu1 %v3410_v21  ;;  %4180 = vmatpush.msrb.mxu2 %v3442_v27  ;;  %v3462_v40 = vld [vmem:[%s4996_s9 + $0xf48] sm:$0xff]  ;;  %v3710_v50 = vadd.f32 %v3709_v26, %v3687_v14  ;;  %v3396_v7 = vld [vmem:[%s4996_s9 + $0xd38] sm:$0xff]  ;;  %v3735_v21 = vpop.f32.mrf.mxu2 }
 0x3ce   : > { %4203 = vmatpush.msrb.mxu3 %v3474_v61  ;;  %4135 = vmatpush.msrb.mxu0 %v3376_v42  ;;  %v3428_v13 = vld [vmem:[%s4996_s9 + $0xe38] sm:$0xff]  ;;  %v3362_v1 = vld [vmem:[%s4996_s9 + $0xc28] sm:$0xff]  ;;  %v3667_v61 = vadd.f32 %v6313_v6, %v3644_v54 }
 0x3cf   : > { %4158 = vmatpush.msrb.mxu1 %v3408_v20  ;;  %4181 = vmatpush.msrb.mxu2 %v3440_v19  ;;  %v3755_v55 = vpop.f32.mrf.mxu3  ;;  %v3460_v16 = vld [vmem:[%s4996_s9 + $0xf38] sm:$0xff]  ;;  %v3733_v62 = vadd.f32 %v3732_v18, %v3710_v50  ;;  %v3394_v27 = vld [vmem:[%s4996_s9 + $0xd28] sm:$0xff] }
 0x3d0   : > { %4204 = vmatpush.msrb.mxu3 %v3472_v45  ;;  %4136 = vmatpush.msrb.mxu0 %v3374_v35  ;;  %v3426_v57 = vld [vmem:[%s4996_s9 + $0xe28] sm:$0xff]  ;;  %v3360_v20 = vld [vmem:[%s4996_s9 + $0xc18] sm:$0xff]  ;;  %v3778_v45 = vpop.f32.mrf.mxu0  ;;  %v3690_v51 = vadd.f32 %v3689_v58, %v3667_v61 }
 0x3d1   : > { %4159 = vmatpush.msrb.mxu1 %v3406_v36  ;;  %4182 = vmatpush.msrb.mxu2 %v3438_v49  ;;  %v3458_v42 = vld [vmem:[%s4996_s9 + $0xf28] sm:$0xff]  ;;  %v3392_v19 = vld [vmem:[%s4996_s9 + $0xd18] sm:$0xff]  ;;  %v3756_v6 = vadd.f32 %v3755_v55, %v3733_v62 }
 0x3d2   : > { %4205 = vmatpush.msrb.mxu3 %v3470_v8  ;;  %4137 = vmatpush.msrb.mxu0 %v3372_v59  ;;  %v3424_v35 = vld [vmem:[%s4996_s9 + $0xe18] sm:$0xff]  ;;  %v3358_v4 = vld [vmem:[%s4996_s9 + $0xc08] sm:$0xff] }
 0x3d3   : > { %4160 = vmatpush.msrb.mxu1 %v3404_v52  ;;  %4183 = vmatpush.msrb.mxu2 %v3436_v25  ;;  %v3456_v36 = vld [vmem:[%s4996_s9 + $0xf18] sm:$0xff]  ;;  %v3390_v49 = vld [vmem:[%s4996_s9 + $0xd08] sm:$0xff]  ;;  %v3779_v59 = vadd.f32 %v3778_v45, %v3756_v6  ;;  %v3713_v52 = vadd.f32 %v3712_v9, %v3690_v51 }
 0x3d4   : > { %4206 = vmatpush.msrb.mxu3 %v3468_v15  ;;  %4138 = vmatpush.msrb.mxu0 %v3370_v29  ;;  %v3422_v26 = vld [vmem:[%s4996_s9 + $0xe08] sm:$0xff]  ;;  %v3801_v56 = vpop.f32.mrf.mxu1 }
 0x3d5   : > { %4161 = vmatpush.msrb.mxu1 %v3402_v5  ;;  %4184 = vmatpush.msrb.mxu2 %v3434_v41  ;;  %v3454_v18 = vld [vmem:[%s4996_s9 + $0xf08] sm:$0xff]  ;;  %v3736_v15 = vadd.f32 %v3735_v21, %v3713_v52  ;;  %v3802_v29 = vadd.f32 %v3801_v56, %v3779_v59 }
 0x3d6   : > { %4207 = vmatpush.msrb.mxu3 %v3466_v10  ;;  %4139 = vmatpush.msrb.mxu0 %v3368_v24  ;;  %v3824_v25 = vpop.f32.mrf.mxu2  ;;  %v393_v10 = vperm.slane %v6365_v17, 0 }
 0x3d7   : > { %4162 = vmatpush.msrb.mxu1 %v3400_v60  ;;  %4185 = vmatpush.msrb.mxu2 %v3432_v31  ;;  %v3758_v8 = vpop.f32.mrf.mxu3  ;;  %v3825_v5 = vadd.f32 %v3824_v25, %v3802_v29 }
 0x3d8   : > { %4208 = vmatpush.msrb.mxu3 %v3464_v34  ;;  %4140 = vmatpush.msrb.mxu0 %v3366_v44  ;;  %v3759_v2 = vadd.f32 %v3758_v8, %v3736_v15 }
 0x3d9   : > { %4163 = vmatpush.msrb.mxu1 %v3398_v28  ;;  %4186 = vmatpush.msrb.mxu2 %v3430_v43  ;;  %v3781_v41 = vpop.f32.mrf.mxu0 }
 0x3da   : > { %4209 = vmatpush.msrb.mxu3 %v3462_v40  ;;  %4141 = vmatpush.msrb.mxu0 %v3364_v3  ;;  %v3782_v48 = vadd.f32 %v3781_v41, %v3759_v2 }
 0x3db   : > { %4164 = vmatpush.msrb.mxu1 %v3396_v7  ;;  %4187 = vmatpush.msrb.mxu2 %v3428_v13 }
 0x3dc   : > { %4210 = vmatpush.msrb.mxu3 %v3460_v16  ;;  %4142 = vmatpush.msrb.mxu0 %v3362_v1  ;;  %v3804_v46 = vpop.f32.mrf.mxu1 }
 0x3dd   : > { %4165 = vmatpush.msrb.mxu1 %v3394_v27  ;;  %4188 = vmatpush.msrb.mxu2 %v3426_v57  ;;  %v3805_v0 = vadd.f32 %v3804_v46, %v3782_v48 }
 0x3de   : > { %4211 = vmatpush.msrb.mxu3 %v3458_v42  ;;  %4143 = vmatpush.msrb.mxu0 %v3360_v20 }
 0x3df   : > { %4166 = vmatpush.msrb.mxu1 %v3392_v19  ;;  %4189 = vmatpush.msrb.mxu2 %v3424_v35 }
 0x3e0   : > { %4212 = vmatpush.msrb.mxu3 %v3456_v36  ;;  %4144 = vmatpush.msrb.mxu0 %v3358_v4 }
 0x3e1   : > { %4167 = vmatpush.msrb.mxu1 %v3390_v49  ;;  %4190 = vmatpush.msrb.mxu2 %v3422_v26 }
 0x3e2   : > { %4213 = vmatpush.msrb.mxu3 %v3454_v18  ;;  %4145 = vmatmul.f32.vlgmr.msrb.gmra.mxu0 %v2953_v33 }
 0x3e3   : > { %4168 = vmatmul.f32.vlgmr.msrb.gmra.mxu1 %v2954_v37  ;;  %4191 = vmatmul.f32.vlgmr.msrb.gmra.mxu2 %v2955_v22  ;;  %v3827_v22 = vpop.f32.mrf.mxu2 }
 0x3e4   : > { %4214 = vmatmul.f32.vlgmr.msrb.gmra.mxu3 %v2956_v32  ;;  %v3828_v32 = vadd.f32 %v3827_v22, %v3805_v0 }
 0x3e7   : > { %v3847_v33 = vpop.f32.mrf.mxu3 }
 0x3e8   : > { %v3848_v14 = vadd.f32 %v3847_v33, %v3825_v5 }
 0x3ea   : > { %v4244_v37 = vadd.f32 %v3848_v14, %v393_v10  ;;  %4148 = vmatmul.f32.gmra.mxu0 %v2969_v23  ;;  %v394_v14 = vperm.slane %v6365_v17, 1 }
 0x3eb   : > { %4171 = vmatmul.f32.gmra.mxu1 %v2970_v38  ;;  %4194 = vmatmul.f32.gmra.mxu2 %v2971_v47 }
 0x3ec   : > { %4217 = vmatmul.f32.gmra.mxu3 %v2972_v11  ;;  %4248 = vst [vmem:[%s6381_s25] sm:$0xff] %v4244_v37 }
 0x3ef   : > { %v3850_v53 = vpop.f32.mrf.mxu3 }
 0x3f0   : > { %v3851_v23 = vadd.f32 %v3850_v53, %v3828_v32 }
 0x3f2   : > { %v4246_v58 = vadd.f32 %v3851_v23, %v393_v10 }
 0x3f3   : > { %v3870_v63 = vpop.f32.mrf.mxu0 }
 0x3f4   : > { %4250 = vst [vmem:[%s6381_s25 + $0x10] sm:$0xff] %v4246_v58  ;;  %v3893_v38 = vpop.f32.mrf.mxu1 }
 0x3f5   : > { %v3894_v31 = vadd.f32 %v3893_v38, %v3870_v63 }
 0x3fa   : > { %v3916_v39 = vpop.f32.mrf.mxu2 }
 0x3fb   : > { %v3939_v47 = vpop.f32.mrf.mxu3  ;;  %v3917_v28 = vadd.f32 %v3916_v39, %v3894_v31 }
 0x3fd   : > { %v3873_v24 = vpop.f32.mrf.mxu0  ;;  %v3940_v43 = vadd.f32 %v3939_v47, %v3917_v28 }
 0x3fe   : > { %v3896_v12 = vpop.f32.mrf.mxu1 }
 0x3ff   : > { %v3897_v50 = vadd.f32 %v3896_v12, %v3873_v24 }
 0x404   : > { %v3919_v11 = vpop.f32.mrf.mxu2 }
 0x405   : > { %v3942_v60 = vpop.f32.mrf.mxu3  ;;  %v3920_v7 = vadd.f32 %v3919_v11, %v3897_v50 }
 0x407   : > { %v3943_v21 = vadd.f32 %v3942_v60, %v3920_v7 }
 0x417   : > { %v3962_v30 = vpop.f32.mrf.mxu0 }
 0x418   : > { %v3985_v55 = vpop.f32.mrf.mxu1  ;;  %v3963_v3 = vadd.f32 %v3962_v30, %v3940_v43 }
 0x41a   : > { %v3986_v62 = vadd.f32 %v3985_v55, %v3963_v3 }
 0x41e   : > { %v4008_v34 = vpop.f32.mrf.mxu2 }
 0x41f   : > { %v4031_v44 = vpop.f32.mrf.mxu3  ;;  %v4009_v1 = vadd.f32 %v4008_v34, %v3986_v62 }
 0x421   : > { %v3965_v54 = vpop.f32.mrf.mxu0  ;;  %v4032_v57 = vadd.f32 %v4031_v44, %v4009_v1 }
 0x422   : > { %v3988_v40 = vpop.f32.mrf.mxu1  ;;  %v3966_v61 = vadd.f32 %v3965_v54, %v3943_v21 }
 0x424   : > { %v3989_v19 = vadd.f32 %v3988_v40, %v3966_v61 }
 0x428   : > { %v4011_v13 = vpop.f32.mrf.mxu2 }
 0x429   : > { %v4034_v16 = vpop.f32.mrf.mxu3  ;;  %v4012_v51 = vadd.f32 %v4011_v13, %v3989_v19 }
 0x42b   : > { %v4035_v4 = vadd.f32 %v4034_v16, %v4012_v51 }
 0x43b   : > { %v4054_v9 = vpop.f32.mrf.mxu0 }
 0x43c   : > { %v4077_v27 = vpop.f32.mrf.mxu1  ;;  %v4055_v45 = vadd.f32 %v4054_v9, %v4032_v57 }
 0x43e   : > { %v4078_v36 = vadd.f32 %v4077_v27, %v4055_v45 }
 0x442   : > { %v4100_v42 = vpop.f32.mrf.mxu2 }
 0x443   : > { %v4123_v20 = vpop.f32.mrf.mxu3  ;;  %v4101_v49 = vadd.f32 %v4100_v42, %v4078_v36 }
 0x445   : > { %v4057_v35 = vpop.f32.mrf.mxu0  ;;  %v4124_v59 = vadd.f32 %v4123_v20, %v4101_v49 }
 0x446   : > { %v4080_v6 = vpop.f32.mrf.mxu1  ;;  %v4058_v8 = vadd.f32 %v4057_v35, %v4035_v4 }
 0x448   : > { %v4081_v56 = vadd.f32 %v4080_v6, %v4058_v8 }
 0x44c   : > { %v4103_v26 = vpop.f32.mrf.mxu2 }
 0x44d   : > { %v4126_v18 = vpop.f32.mrf.mxu3  ;;  %v4104_v29 = vadd.f32 %v4103_v26, %v4081_v56 }
 0x44f   : > { %v4127_v2 = vadd.f32 %v4126_v18, %v4104_v29 }
 0x45f   : > { %v4146_v52 = vpop.f32.mrf.mxu0 }
 0x460   : > { %v4147_v25 = vadd.f32 %v4146_v52, %v4124_v59  ;;  %v4169_v15 = vpop.f32.mrf.mxu1 }
 0x462   : > { %v4170_v5 = vadd.f32 %v4169_v15, %v4147_v25 }
 0x466   : > { %v4192_v41 = vpop.f32.mrf.mxu2 }
 0x467   : > { %v4215_v10 = vpop.f32.mrf.mxu3  ;;  %v4193_v33 = vadd.f32 %v4192_v41, %v4170_v5  ;;  %v4149_v48 = vpop.f32.mrf.mxu0 }
 0x468   : > { %v4150_v46 = vadd.f32 %v4149_v48, %v4127_v2  ;;  %v4172_v0 = vpop.f32.mrf.mxu1 }
 0x469   : > { %v4216_v37 = vadd.f32 %v4215_v10, %v4193_v33 }
 0x46a   : > { %v4173_v32 = vadd.f32 %v4172_v0, %v4150_v46 }
 0x46b   : > { %v4245_v22 = vadd.f32 %v4216_v37, %v394_v14 }
 0x46d   : > { %4249 = vst [vmem:[%s6381_s25 + $0x8] sm:$0xff] %v4245_v22 }
 0x46e   : > { %v4195_v53 = vpop.f32.mrf.mxu2 }
 0x46f   : > { %v4196_v23 = vadd.f32 %v4195_v53, %v4173_v32  ;;  %v4218_v17 = vpop.f32.mrf.mxu3 }
 0x471   : > { %v4219_v58 = vadd.f32 %v4218_v17, %v4196_v23 }
 0x473   : > { %v4247_v63 = vadd.f32 %v4219_v58, %v394_v14 }
 0x475   : > { %4251 = vst [vmem:[%s6381_s25 + $0x18] sm:$0xff] %v4247_v63 }
 0x476   : > { %4753 = shalt.err (!%p4750_p0)
}
 0x477   : > { %s4827_s10 = smov 256   ;;  %s4828_s3 = smov 512  }
 0x478   : > { %s4829_s18 = smov 16  }
 0x479   : > { %4460 = dma.vmem_to_hbm [thread:$0]  (%p4941_p5), %s4269_s11, 512, %s4271_s17, %s4253_s21, %s4827_s10, %s4828_s3, %s4829_s18  }
 0x47a PF: > { %s6553_s23 = sld [smem:[#allocation17_spill]]  ;;  %p4480_p3 = pnand %p4424_p11, %p4905_p6 }
 0x47b   : > { %s6555_s9 = sld [smem:[#allocation19_spill]] }
 0x47c   : > { %p4481_p7 = pneg %p4480_p3 }
 0x480   : > { %s4285_s24 = sand.u32 1, %s6553_s23  }
 0x481   : > { %s4286_s26 = scalar_lea.sflag [#allocation5], %s4285_s24 }
 0x482   : > { %4791 = dma.done.wait (%p4481_p7), %s4286_s26, 512  }
 0x483   : > { %4793 = vsyncadd (%p4481_p7), %s4286_s26, 4294966784  ;;  %s23_s23 = sadd.s32 1, %s6555_s9   ;;  %s6556_s12 = sld [smem:[#allocation18_spill]] }
 0x484   : > { %p20_p9 = scmp.ge.s32.totalorder %s23_s23, 4   ;;  %s6557_s20 = sld [smem:[#allocation22_spill]] }
 0x485   : > { %s6558_s15 = sld [smem:[#allocation21_spill]]  ;;  %s6559_s18 = smov %s4800_s19 }
 0x486   : > { %s6561_s21 = smov %s4812_s22 }
 0x487   :  { %22 = sbr.rel (!%p20_p9) target bundleno = 11 (0xb), region = 124 }
 0x489   : > { %s6560_s19 = smov %s6556_s12 }
 0x48b   : > { %s6562_s22 = smov %s6558_s15 }
 0x48c   :  { %4292 = vsyncpa [#allocation4], 1 }
 0x48d   :  { %4294 = vsyncpa [#allocation4 + $0x1], 1 }
 0x48e   :  { %4295 = vsyncpa [#allocation7], 1 }
 0x48f   :  { %4296 = vsyncpa [#allocation10], 1 }
 0x490   :  { %4298 = vsyncpa [#allocation10 + $0x1], 1 }
 0x491   :  { %4299 = vsyncpa [#allocation5], 1 }
 0x492   :  { %4301 = vsyncpa [#allocation5 + $0x1], 1 }

</bundles_post_ra>
